<compile_context>
chip_gen: v6e
topology: v6e:2x2x1
jax: 0.10.0
libtpu: 0.0.40
codegen_flags: <defaults>
</compile_context>

<pallas_src>
import functools

import jax
import jax.numpy as jnp
from jax import lax
from jax.experimental import pallas as pl
from jax.experimental.pallas import tpu as pltpu


def _convlstm_kernel(x_ref, h_ref, w_ref, b_ref, c_ref,
                     h_out_ref, c_out_ref,
                     pad_ref, lhs_ref, *, kh, kw):
    # x_ref:   (1, H, W, Cx)   f32   input frame (NHWC block)
    # h_ref:   (1, H, W, Hd)   f32   previous hidden state (NHWC block)
    # w_ref:   (Cout, K)       bf16  flat conv weight, K = kh*kw*(Cx+Hd)
    # b_ref:   (Cout, 1)       f32
    # c_ref:   (1, Hd, HW)     f32   previous cell state, channels-major
    # outputs: (1, Hd, HW)     f32
    # pad_ref: (Hp, Wp, Cin)   f32   VMEM scratch: zero-padded [x, h] concat
    # lhs_ref: (HW, K)         bf16  VMEM scratch: im2col LHS
    Hp, Wp, Cin = pad_ref.shape
    Cout, K = w_ref.shape
    _, Hd, HW = c_ref.shape
    Cx = x_ref.shape[-1]
    H = Hp - kh + 1
    W = Wp - kw + 1
    ph, pw = kh // 2, kw // 2

    # In-kernel concat([x, h], channel) + 'same' zero-pad: write both inputs
    # into the interior of a zeroed scratch.  Re-zeroed every step so the
    # border is valid even when the batch axis is sharded across TensorCores.
    pad_ref[...] = jnp.zeros_like(pad_ref)
    pad_ref[ph:ph + H, pw:pw + W, 0:Cx] = x_ref[0]
    pad_ref[ph:ph + H, pw:pw + W, Cx:Cin] = h_ref[0]

    comb = pad_ref[...]                                        # (Hp, Wp, Cin)

    # im2col LHS in VMEM: row m = y*W + x, columns [t*Cin, (t+1)*Cin) hold the
    # (ky, kx)-shifted window.  In NHWC layout the (H, W, Cin)->(HW, Cin)
    # reshape is just a sublane re-grouping (no cross-lane movement).
    for t in range(kh * kw):
        ky, kx = divmod(t, kw)
        win = comb[ky:ky + H, kx:kx + W, :].reshape(HW, Cin)
        lhs_ref[:, t * Cin:(t + 1) * Cin] = win.astype(lhs_ref.dtype)

    # One bf16 MXU matmul, f32 accumulation; result channels-major (Cout, HW)
    # so every downstream tensor is lane-dense (HW multiple of 128 here).
    acc = jnp.einsum("ok,mk->om", w_ref[...], lhs_ref[...],
                     preferred_element_type=jnp.float32)       # (Cout, HW)
    acc = acc + b_ref[...]                                     # (Cout,1) bcast

    # Gates: sublane-aligned row slices of the pre-activations.
    i = jax.nn.sigmoid(acc[0 * Hd:1 * Hd, :])
    f = jax.nn.sigmoid(acc[1 * Hd:2 * Hd, :])
    o = jax.nn.sigmoid(acc[2 * Hd:3 * Hd, :])
    g = jnp.tanh(acc[3 * Hd:4 * Hd, :])

    c_cur = c_ref[0]                                           # (Hd, HW)
    c_next = f * c_cur + i * g
    h_next = o * jnp.tanh(c_next)

    h_out_ref[0] = h_next.astype(h_out_ref.dtype)
    c_out_ref[0] = c_next.astype(c_out_ref.dtype)


@functools.partial(jax.jit, static_argnames=("kernel_size",))
def convlstm_cell_forward(x_nchw, h_nchw, c_nchw, w_oikk, bias, kernel_size):
    """ConvLSTMCell forward. Inputs/outputs are NCHW to mirror PyTorch."""
    kh, kw = kernel_size
    assert kh % 2 == 1 and kw % 2 == 1, (
        "only odd kernel sizes give PyTorch-style 'same' padding")

    N, Cx, H, W = x_nchw.shape
    Hd = h_nchw.shape[1]
    Cin = Cx + Hd
    Cout = 4 * Hd
    K = kh * kw * Cin
    HW = H * W
    Hp, Wp = H + kh - 1, W + kw - 1

    # --- wrapper glue (plain JAX) ---
    # Only the NCHW->NHWC transpose of x/h remains wrapper-side; concat and
    # zero-pad are fused into the kernel.
    x_nhwc = jnp.transpose(x_nchw, (0, 2, 3, 1)).astype(jnp.float32)
    h_nhwc = jnp.transpose(h_nchw, (0, 2, 3, 1)).astype(jnp.float32)

    # PyTorch Conv2d weight (O, I, kh, kw) -> flat (O, kh*kw*I), bf16 for MXU.
    # Column order (ky, kx, i) matches the im2col column layout in the kernel.
    w_flat = jnp.transpose(w_oikk, (0, 2, 3, 1)).reshape(Cout, K)
    w_flat = w_flat.astype(jnp.bfloat16)
    b2d = bias.reshape(Cout, 1).astype(jnp.float32)

    # Cell state channels-major with lane-dense last dim (free reshape of NCHW).
    c2d = c_nchw.reshape(N, Hd, HW).astype(jnp.float32)

    kernel = functools.partial(_convlstm_kernel, kh=kh, kw=kw)

    h_next, c_next = pl.pallas_call(
        kernel,
        out_shape=(
            jax.ShapeDtypeStruct((N, Hd, HW), jnp.float32),
            jax.ShapeDtypeStruct((N, Hd, HW), jnp.float32),
        ),
        grid_spec=pltpu.PrefetchScalarGridSpec(
            num_scalar_prefetch=0,
            grid=(N,),
            in_specs=[
                pl.BlockSpec((1, H, W, Cx), lambda b: (b, 0, 0, 0)),
                pl.BlockSpec((1, H, W, Hd), lambda b: (b, 0, 0, 0)),
                pl.BlockSpec((Cout, K), lambda b: (0, 0)),
                pl.BlockSpec((Cout, 1), lambda b: (0, 0)),
                pl.BlockSpec((1, Hd, HW), lambda b: (b, 0, 0)),
            ],
            out_specs=[
                pl.BlockSpec((1, Hd, HW), lambda b: (b, 0, 0)),
                pl.BlockSpec((1, Hd, HW), lambda b: (b, 0, 0)),
            ],
            scratch_shapes=[
                pltpu.VMEM((Hp, Wp, Cin), jnp.float32),   # padded [x,h] concat
                pltpu.VMEM((HW, K), jnp.bfloat16),        # im2col LHS
            ],
        ),
        compiler_params=pltpu.CompilerParams(
            dimension_semantics=("parallel",),      # batches are independent
            vmem_limit_bytes=32 * 1024 * 1024,
        ),
    )(x_nhwc, h_nhwc, w_flat, b2d, c2d)

    # (N, Hd, H*W) -> NCHW (pure reshape, no transpose needed).
    return h_next.reshape(N, Hd, H, W), c_next.reshape(N, Hd, H, W)


def _reference_forward(x, h, c, w_oikk, bias, kernel_size):
    """Plain-JAX reference matching the PyTorch module (NCHW, f32)."""
    kh, kw = kernel_size
    ph, pw = kh // 2, kw // 2
    combined = jnp.concatenate([x, h], axis=1)
    cc = lax.conv_general_dilated(
        combined, w_oikk,
        window_strides=(1, 1),
        padding=((ph, ph), (pw, pw)),
        dimension_numbers=("NCHW", "OIHW", "NCHW"),
    ) + bias.reshape(1, -1, 1, 1)
    Hd = h.shape[1]
    cc_i, cc_f, cc_o, cc_g = jnp.split(cc, [Hd, 2 * Hd, 3 * Hd], axis=1)
    i = jax.nn.sigmoid(cc_i)
    f = jax.nn.sigmoid(cc_f)
    o = jax.nn.sigmoid(cc_o)
    g = jnp.tanh(cc_g)
    c_next = f * c + i * g
    h_next = o * jnp.tanh(c_next)
    return h_next, c_next


if __name__ == "__main__":
    # Small, module-consistent shapes.
    batch, input_dim, hidden_dim = 2, 4, 8
    height, width = 16, 16
    kernel_size = (3, 3)

    key = jax.random.PRNGKey(0)
    kx, kh_, kc, kw_, kb = jax.random.split(key, 5)

    x = jax.random.normal(kx, (batch, input_dim, height, width), jnp.float32)
    h_cur = jax.random.normal(kh_, (batch, hidden_dim, height, width), jnp.float32)
    c_cur = jax.random.normal(kc, (batch, hidden_dim, height, width), jnp.float32)

    # Deterministic synthetic Conv2d parameters:
    #   weight: (4*hidden, input_dim + hidden, kh, kw), bias: (4*hidden,)
    cin_total = input_dim + hidden_dim
    w = 0.1 * jax.random.normal(
        kw_, (4 * hidden_dim, cin_total, kernel_size[0], kernel_size[1]),
        jnp.float32)
    b = 0.1 * jax.random.normal(kb, (4 * hidden_dim,), jnp.float32)

    h_next, c_next = convlstm_cell_forward(x, h_cur, c_cur, w, b, kernel_size)
    jax.block_until_ready((h_next, c_next))

    h_ref, c_ref = _reference_forward(x, h_cur, c_cur, w, b, kernel_size)
    assert h_next.shape == (batch, hidden_dim, height, width)
    assert c_next.shape == (batch, hidden_dim, height, width)
    # bf16 matmul operands (f32 accumulation) -> loosen tolerance vs f32 ref.
    assert jnp.allclose(h_next, h_ref, atol=3e-2, rtol=3e-2)
    assert jnp.allclose(c_next, c_ref, atol=3e-2, rtol=3e-2)

    print("KERNEL_OK")
</pallas_src>

<mosaic_0001>
module attributes {stable_mosaic.version = 11 : i64} {
  func.func @_convlstm_kernel(%arg0: i32, %arg1: memref<1x16x16x4xf32, #tpu.memory_space<vmem>>, %arg2: memref<1x16x16x8xf32, #tpu.memory_space<vmem>>, %arg3: memref<32x108xbf16, #tpu.memory_space<vmem>>, %arg4: memref<32x1xf32, #tpu.memory_space<vmem>>, %arg5: memref<1x8x256xf32, #tpu.memory_space<vmem>>, %arg6: memref<1x8x256xf32, #tpu.memory_space<vmem>>, %arg7: memref<1x8x256xf32, #tpu.memory_space<vmem>>, %arg8: memref<18x18x12xf32, #tpu.memory_space<vmem>>, %arg9: memref<256x108xbf16, #tpu.memory_space<vmem>>) attributes {dimension_semantics = [#tpu.dimension_semantics<parallel>], iteration_bounds = array<i64: 2>, scalar_prefetch = 0 : i64, scratch_operands = 2 : i64, tpu.core_type = #tpu.core_type<tc>, window_params = [{transform_indices = @transform_0, window_bounds = array<i64: 1, 16, 16, 4>}, {transform_indices = @transform_1, window_bounds = array<i64: 1, 16, 16, 8>}, {pipeline_mode = #tpu.pipeline_mode<synchronous>, transform_indices = @transform_2, window_bounds = array<i64: 32, 108>}, {pipeline_mode = #tpu.pipeline_mode<synchronous>, transform_indices = @transform_3, window_bounds = array<i64: 32, 1>}, {transform_indices = @transform_4, window_bounds = array<i64: 1, 8, 256>}, {transform_indices = @transform_5, window_bounds = array<i64: 1, 8, 256>}, {transform_indices = @transform_6, window_bounds = array<i64: 1, 8, 256>}]} {
    %cst = arith.constant 0.000000e+00 : f32
    %0 = vector.broadcast %cst : f32 to vector<18x18x12xf32>
    %c0 = arith.constant 0 : index
    %c0_0 = arith.constant 0 : index
    %c0_1 = arith.constant 0 : index
    %1 = vector.load %arg8[%c0, %c0_0, %c0_1] : memref<18x18x12xf32, #tpu.memory_space<vmem>>, vector<18x18x12xf32>
    tpu.vector_store %arg8[%c0, %c0_0, %c0_1], %0 {strides = array<i32>} : memref<18x18x12xf32, #tpu.memory_space<vmem>>, vector<18x18x12xf32>,
    %c0_2 = arith.constant 0 : index
    %c0_3 = arith.constant 0 : index
    %c0_4 = arith.constant 0 : index
    %c0_5 = arith.constant 0 : index
    %2 = vector.load %arg1[%c0_2, %c0_3, %c0_4, %c0_5] : memref<1x16x16x4xf32, #tpu.memory_space<vmem>>, vector<1x16x16x4xf32>
    %3 = vector.shape_cast %2 : vector<1x16x16x4xf32> to vector<16x16x4xf32>
    %c1 = arith.constant 1 : index
    %c1_6 = arith.constant 1 : index
    %c0_7 = arith.constant 0 : index
    %4 = vector.load %arg8[%c1, %c1_6, %c0_7] : memref<18x18x12xf32, #tpu.memory_space<vmem>>, vector<16x16x4xf32>
    tpu.vector_store %arg8[%c1, %c1_6, %c0_7], %3 {strides = array<i32>} : memref<18x18x12xf32, #tpu.memory_space<vmem>>, vector<16x16x4xf32>,
    %c0_8 = arith.constant 0 : index
    %c0_9 = arith.constant 0 : index
    %c0_10 = arith.constant 0 : index
    %c0_11 = arith.constant 0 : index
    %5 = vector.load %arg2[%c0_8, %c0_9, %c0_10, %c0_11] : memref<1x16x16x8xf32, #tpu.memory_space<vmem>>, vector<1x16x16x8xf32>
    %6 = vector.shape_cast %5 : vector<1x16x16x8xf32> to vector<16x16x8xf32>
    %c1_12 = arith.constant 1 : index
    %c1_13 = arith.constant 1 : index
    %c4 = arith.constant 4 : index
    %7 = vector.load %arg8[%c1_12, %c1_13, %c4] : memref<18x18x12xf32, #tpu.memory_space<vmem>>, vector<16x16x8xf32>
    tpu.vector_store %arg8[%c1_12, %c1_13, %c4], %6 {strides = array<i32>} : memref<18x18x12xf32, #tpu.memory_space<vmem>>, vector<16x16x8xf32>,
    %c0_14 = arith.constant 0 : index
    %c0_15 = arith.constant 0 : index
    %c0_16 = arith.constant 0 : index
    %8 = vector.load %arg8[%c0_14, %c0_15, %c0_16] : memref<18x18x12xf32, #tpu.memory_space<vmem>>, vector<18x18x12xf32>
    %9 = vector.extract_strided_slice %8 {offsets = [0, 0, 0], sizes = [16, 16, 12], strides = [1, 1, 1]} : vector<18x18x12xf32> to vector<16x16x12xf32>
    %10 = vector.shape_cast %9 : vector<16x16x12xf32> to vector<256x12xf32>
    %11 = arith.truncf %10 : vector<256x12xf32> to vector<256x12xbf16>
    %c0_17 = arith.constant 0 : index
    %c0_18 = arith.constant 0 : index
    %12 = vector.load %arg9[%c0_17, %c0_18] : memref<256x108xbf16, #tpu.memory_space<vmem>>, vector<256x12xbf16>
    tpu.vector_store %arg9[%c0_17, %c0_18], %11 {strides = array<i32>} : memref<256x108xbf16, #tpu.memory_space<vmem>>, vector<256x12xbf16>,
    %13 = vector.extract_strided_slice %8 {offsets = [0, 1, 0], sizes = [16, 16, 12], strides = [1, 1, 1]} : vector<18x18x12xf32> to vector<16x16x12xf32>
    %14 = vector.shape_cast %13 : vector<16x16x12xf32> to vector<256x12xf32>
    %15 = arith.truncf %14 : vector<256x12xf32> to vector<256x12xbf16>
    %c0_19 = arith.constant 0 : index
    %c12 = arith.constant 12 : index
    %16 = vector.load %arg9[%c0_19, %c12] : memref<256x108xbf16, #tpu.memory_space<vmem>>, vector<256x12xbf16>
    tpu.vector_store %arg9[%c0_19, %c12], %15 {strides = array<i32>} : memref<256x108xbf16, #tpu.memory_space<vmem>>, vector<256x12xbf16>,
    %17 = vector.extract_strided_slice %8 {offsets = [0, 2, 0], sizes = [16, 16, 12], strides = [1, 1, 1]} : vector<18x18x12xf32> to vector<16x16x12xf32>
    %18 = vector.shape_cast %17 : vector<16x16x12xf32> to vector<256x12xf32>
    %19 = arith.truncf %18 : vector<256x12xf32> to vector<256x12xbf16>
    %c0_20 = arith.constant 0 : index
    %c24 = arith.constant 24 : index
    %20 = vector.load %arg9[%c0_20, %c24] : memref<256x108xbf16, #tpu.memory_space<vmem>>, vector<256x12xbf16>
    tpu.vector_store %arg9[%c0_20, %c24], %19 {strides = array<i32>} : memref<256x108xbf16, #tpu.memory_space<vmem>>, vector<256x12xbf16>,
    %21 = vector.extract_strided_slice %8 {offsets = [1, 0, 0], sizes = [16, 16, 12], strides = [1, 1, 1]} : vector<18x18x12xf32> to vector<16x16x12xf32>
    %22 = vector.shape_cast %21 : vector<16x16x12xf32> to vector<256x12xf32>
    %23 = arith.truncf %22 : vector<256x12xf32> to vector<256x12xbf16>
    %c0_21 = arith.constant 0 : index
    %c36 = arith.constant 36 : index
    %24 = vector.load %arg9[%c0_21, %c36] : memref<256x108xbf16, #tpu.memory_space<vmem>>, vector<256x12xbf16>
    tpu.vector_store %arg9[%c0_21, %c36], %23 {strides = array<i32>} : memref<256x108xbf16, #tpu.memory_space<vmem>>, vector<256x12xbf16>,
    %25 = vector.extract_strided_slice %8 {offsets = [1, 1, 0], sizes = [16, 16, 12], strides = [1, 1, 1]} : vector<18x18x12xf32> to vector<16x16x12xf32>
    %26 = vector.shape_cast %25 : vector<16x16x12xf32> to vector<256x12xf32>
    %27 = arith.truncf %26 : vector<256x12xf32> to vector<256x12xbf16>
    %c0_22 = arith.constant 0 : index
    %c48 = arith.constant 48 : index
    %28 = vector.load %arg9[%c0_22, %c48] : memref<256x108xbf16, #tpu.memory_space<vmem>>, vector<256x12xbf16>
    tpu.vector_store %arg9[%c0_22, %c48], %27 {strides = array<i32>} : memref<256x108xbf16, #tpu.memory_space<vmem>>, vector<256x12xbf16>,
    %29 = vector.extract_strided_slice %8 {offsets = [1, 2, 0], sizes = [16, 16, 12], strides = [1, 1, 1]} : vector<18x18x12xf32> to vector<16x16x12xf32>
    %30 = vector.shape_cast %29 : vector<16x16x12xf32> to vector<256x12xf32>
    %31 = arith.truncf %30 : vector<256x12xf32> to vector<256x12xbf16>
    %c0_23 = arith.constant 0 : index
    %c60 = arith.constant 60 : index
    %32 = vector.load %arg9[%c0_23, %c60] : memref<256x108xbf16, #tpu.memory_space<vmem>>, vector<256x12xbf16>
    tpu.vector_store %arg9[%c0_23, %c60], %31 {strides = array<i32>} : memref<256x108xbf16, #tpu.memory_space<vmem>>, vector<256x12xbf16>,
    %33 = vector.extract_strided_slice %8 {offsets = [2, 0, 0], sizes = [16, 16, 12], strides = [1, 1, 1]} : vector<18x18x12xf32> to vector<16x16x12xf32>
    %34 = vector.shape_cast %33 : vector<16x16x12xf32> to vector<256x12xf32>
    %35 = arith.truncf %34 : vector<256x12xf32> to vector<256x12xbf16>
    %c0_24 = arith.constant 0 : index
    %c72 = arith.constant 72 : index
    %36 = vector.load %arg9[%c0_24, %c72] : memref<256x108xbf16, #tpu.memory_space<vmem>>, vector<256x12xbf16>
    tpu.vector_store %arg9[%c0_24, %c72], %35 {strides = array<i32>} : memref<256x108xbf16, #tpu.memory_space<vmem>>, vector<256x12xbf16>,
    %37 = vector.extract_strided_slice %8 {offsets = [2, 1, 0], sizes = [16, 16, 12], strides = [1, 1, 1]} : vector<18x18x12xf32> to vector<16x16x12xf32>
    %38 = vector.shape_cast %37 : vector<16x16x12xf32> to vector<256x12xf32>
    %39 = arith.truncf %38 : vector<256x12xf32> to vector<256x12xbf16>
    %c0_25 = arith.constant 0 : index
    %c84 = arith.constant 84 : index
    %40 = vector.load %arg9[%c0_25, %c84] : memref<256x108xbf16, #tpu.memory_space<vmem>>, vector<256x12xbf16>
    tpu.vector_store %arg9[%c0_25, %c84], %39 {strides = array<i32>} : memref<256x108xbf16, #tpu.memory_space<vmem>>, vector<256x12xbf16>,
    %41 = vector.extract_strided_slice %8 {offsets = [2, 2, 0], sizes = [16, 16, 12], strides = [1, 1, 1]} : vector<18x18x12xf32> to vector<16x16x12xf32>
    %42 = vector.shape_cast %41 : vector<16x16x12xf32> to vector<256x12xf32>
    %43 = arith.truncf %42 : vector<256x12xf32> to vector<256x12xbf16>
    %c0_26 = arith.constant 0 : index
    %c96 = arith.constant 96 : index
    %44 = vector.load %arg9[%c0_26, %c96] : memref<256x108xbf16, #tpu.memory_space<vmem>>, vector<256x12xbf16>
    tpu.vector_store %arg9[%c0_26, %c96], %43 {strides = array<i32>} : memref<256x108xbf16, #tpu.memory_space<vmem>>, vector<256x12xbf16>,
    %c0_27 = arith.constant 0 : index
    %c0_28 = arith.constant 0 : index
    %45 = vector.load %arg3[%c0_27, %c0_28] : memref<32x108xbf16, #tpu.memory_space<vmem>>, vector<32x108xbf16>
    %c0_29 = arith.constant 0 : index
    %c0_30 = arith.constant 0 : index
    %46 = vector.load %arg9[%c0_29, %c0_30] : memref<256x108xbf16, #tpu.memory_space<vmem>>, vector<256x108xbf16>
    "tpu.trace_start"() <{level = 10 : i32, message = "ok,mk->om"}> : () -> ()
    %cst_31 = arith.constant dense<0.000000e+00> : vector<32x256xf32>
    %47 = tpu.matmul %45, %46, %cst_31 {dimension_numbers = #tpu.dot_dimension_numbers<[1], [1], [0], [0], [0, 0, 1, 0], [], []>} : vector<32x108xbf16>, vector<256x108xbf16>, vector<32x256xf32> -> vector<32x256xf32>
    "tpu.trace_stop"() : () -> ()
    %c0_32 = arith.constant 0 : index
    %c0_33 = arith.constant 0 : index
    %48 = vector.load %arg4[%c0_32, %c0_33] : memref<32x1xf32, #tpu.memory_space<vmem>>, vector<32x1xf32>
    %49 = vector.broadcast %48 : vector<32x1xf32> to vector<32x256xf32>
    %50 = arith.addf %47, %49 : vector<32x256xf32>
    %51 = vector.extract_strided_slice %50 {offsets = [0, 0], sizes = [8, 256], strides = [1, 1]} : vector<32x256xf32> to vector<8x256xf32>
    %52 = arith.negf %51 : vector<8x256xf32>
    %53 = math.exp %52 : vector<8x256xf32>
    %cst_34 = arith.constant 1.000000e+00 : f32
    %54 = vector.broadcast %cst_34 : f32 to vector<8x256xf32>
    %55 = arith.addf %54, %53 : vector<8x256xf32>
    %56 = arith.divf %54, %55 : vector<8x256xf32>
    %57 = vector.extract_strided_slice %50 {offsets = [8, 0], sizes = [8, 256], strides = [1, 1]} : vector<32x256xf32> to vector<8x256xf32>
    %58 = arith.negf %57 : vector<8x256xf32>
    %59 = math.exp %58 : vector<8x256xf32>
    %cst_35 = arith.constant 1.000000e+00 : f32
    %60 = vector.broadcast %cst_35 : f32 to vector<8x256xf32>
    %61 = arith.addf %60, %59 : vector<8x256xf32>
    %62 = arith.divf %60, %61 : vector<8x256xf32>
    %63 = vector.extract_strided_slice %50 {offsets = [16, 0], sizes = [8, 256], strides = [1, 1]} : vector<32x256xf32> to vector<8x256xf32>
    %64 = arith.negf %63 : vector<8x256xf32>
    %65 = math.exp %64 : vector<8x256xf32>
    %cst_36 = arith.constant 1.000000e+00 : f32
    %66 = vector.broadcast %cst_36 : f32 to vector<8x256xf32>
    %67 = arith.addf %66, %65 : vector<8x256xf32>
    %68 = arith.divf %66, %67 : vector<8x256xf32>
    %69 = vector.extract_strided_slice %50 {offsets = [24, 0], sizes = [8, 256], strides = [1, 1]} : vector<32x256xf32> to vector<8x256xf32>
    %70 = math.tanh %69 : vector<8x256xf32>
    %c0_37 = arith.constant 0 : index
    %c0_38 = arith.constant 0 : index
    %c0_39 = arith.constant 0 : index
    %71 = vector.load %arg5[%c0_37, %c0_38, %c0_39] : memref<1x8x256xf32, #tpu.memory_space<vmem>>, vector<1x8x256xf32>
    %72 = vector.shape_cast %71 : vector<1x8x256xf32> to vector<8x256xf32>
    %73 = arith.mulf %62, %72 : vector<8x256xf32>
    %74 = arith.mulf %56, %70 : vector<8x256xf32>
    %75 = arith.addf %73, %74 : vector<8x256xf32>
    %76 = math.tanh %75 : vector<8x256xf32>
    %77 = arith.mulf %68, %76 : vector<8x256xf32>
    %c0_40 = arith.constant 0 : index
    %c0_41 = arith.constant 0 : index
    %c0_42 = arith.constant 0 : index
    %78 = vector.load %arg6[%c0_40, %c0_41, %c0_42] : memref<1x8x256xf32, #tpu.memory_space<vmem>>, vector<1x8x256xf32>
    %79 = vector.shape_cast %78 : vector<1x8x256xf32> to vector<8x256xf32>
    %80 = vector.shape_cast %77 : vector<8x256xf32> to vector<1x8x256xf32>
    tpu.vector_store %arg6[%c0_40, %c0_41, %c0_42], %80 {strides = array<i32>} : memref<1x8x256xf32, #tpu.memory_space<vmem>>, vector<1x8x256xf32>,
    %c0_43 = arith.constant 0 : index
    %c0_44 = arith.constant 0 : index
    %c0_45 = arith.constant 0 : index
    %81 = vector.load %arg7[%c0_43, %c0_44, %c0_45] : memref<1x8x256xf32, #tpu.memory_space<vmem>>, vector<1x8x256xf32>
    %82 = vector.shape_cast %81 : vector<1x8x256xf32> to vector<8x256xf32>
    %83 = vector.shape_cast %75 : vector<8x256xf32> to vector<1x8x256xf32>
    tpu.vector_store %arg7[%c0_43, %c0_44, %c0_45], %83 {strides = array<i32>} : memref<1x8x256xf32, #tpu.memory_space<vmem>>, vector<1x8x256xf32>,
    return
  }
  func.func @transform_0(%arg0: i32) -> (i32, i32, i32, i32) {
    %c0_i32 = arith.constant 0 : i32
    %c0_i32_0 = arith.constant 0 : i32
    %c0_i32_1 = arith.constant 0 : i32
    %c0_i32_2 = arith.constant 0 : i32
    return %arg0, %c0_i32, %c0_i32_0, %c0_i32_1 : i32, i32, i32, i32
  }
  func.func @transform_1(%arg0: i32) -> (i32, i32, i32, i32) {
    %c0_i32 = arith.constant 0 : i32
    %c0_i32_0 = arith.constant 0 : i32
    %c0_i32_1 = arith.constant 0 : i32
    %c0_i32_2 = arith.constant 0 : i32
    return %arg0, %c0_i32, %c0_i32_0, %c0_i32_1 : i32, i32, i32, i32
  }
  func.func @transform_2(%arg0: i32) -> (i32, i32) {
    %c0_i32 = arith.constant 0 : i32
    %c0_i32_0 = arith.constant 0 : i32
    %c0_i32_1 = arith.constant 0 : i32
    return %c0_i32, %c0_i32_0 : i32, i32
  }
  func.func @transform_3(%arg0: i32) -> (i32, i32) {
    %c0_i32 = arith.constant 0 : i32
    %c0_i32_0 = arith.constant 0 : i32
    %c0_i32_1 = arith.constant 0 : i32
    return %c0_i32, %c0_i32_0 : i32, i32
  }
  func.func @transform_4(%arg0: i32) -> (i32, i32, i32) {
    %c0_i32 = arith.constant 0 : i32
    %c0_i32_0 = arith.constant 0 : i32
    %c0_i32_1 = arith.constant 0 : i32
    return %arg0, %c0_i32, %c0_i32_0 : i32, i32, i32
  }
  func.func @transform_5(%arg0: i32) -> (i32, i32, i32) {
    %c0_i32 = arith.constant 0 : i32
    %c0_i32_0 = arith.constant 0 : i32
    %c0_i32_1 = arith.constant 0 : i32
    return %arg0, %c0_i32, %c0_i32_0 : i32, i32, i32
  }
  func.func @transform_6(%arg0: i32) -> (i32, i32, i32) {
    %c0_i32 = arith.constant 0 : i32
    %c0_i32_0 = arith.constant 0 : i32
    %c0_i32_1 = arith.constant 0 : i32
    return %arg0, %c0_i32, %c0_i32_0 : i32, i32, i32
  }
}

</mosaic_0001>

<bundles_post_ra>
// kernel: convlstm_cell_forward.1
= control target key start
LH: loop header
LB: loop body
LE: loop exit
PB: predicated region body
PF: predicated region fallthrough
CT: control target
= control target key end

     0   :  { %s3269_s21 = smov 0   ;;  %s4910_s0 = inlined_call_operand.vmem [shape: f32[2,16,16,4], index: 0, kind: input, shape index: {}]   ;;  %s4911_s1 = inlined_call_operand.vmem [shape: f32[2,16,16,8], index: 1, kind: input, shape index: {}]   ;;  %s4912_s2 = inlined_call_operand.vmem [shape: bf16[32,108], index: 2, kind: input, shape index: {}]   ;;  %s4913_s3 = inlined_call_operand.vmem [shape: f32[32,1], index: 3, kind: input, shape index: {}]   ;;  %s4914_s4 = inlined_call_operand.vmem [shape: f32[2,8,256], index: 4, kind: input, shape index: {}]   ;;  %s4915_s5 = inlined_call_operand.vmem [shape: f32[2,8,256], index: 5, kind: output, shape index: {0}]   ;;  %s4916_s6 = inlined_call_operand.vmem [shape: f32[2,8,256], index: 6, kind: output, shape index: {1}]  }
   0x1 LB: > { %s2828_s22 = sadd.s32 4294967295, %s3221_s21   ;;  %p2832_p0 = scmp.ge.s32.totalorder %s3221_s21, 1  ;;  %s3221_s21 = sphi %s3269_s21, %s17_s21  }
   0x2   : > { %p235_p1 = scmp.lt.s32.totalorder %s3221_s21, 3 }
   0x4   : > { %p236_p2 = pnand %p2832_p0, %p235_p1 }
   0x6   : > { %239 = sbr.rel (%p236_p2) target bundleno = 1034 (0x40a), region = 40 }
   0xb   : > { %p3279_p3 = scmp.lt.s32.totalorder %s2828_s22, 1  ;;  %vm306_vm0 = vcmask 97280   ;;  %v3223_v0 = vmov 0.0   ;;  %vm309_vm1 = vcmask 91136   ;;  %s3224_s28 = smov 4   ;;  %vm395_vm2 = vcmask 31744  }
   0xc   : > { %314 = vst.msk [vmem:[#allocation2 + $0x30] sm:$0xff] %vm306_vm0, %v3223_v0  ;;  %315 = vst.msk [vmem:[#allocation2 + $0x38] sm:$0xff] %vm306_vm0, %v3223_v0  ;;  %vm884_vm3 = vcmask 1046528   ;;  %vm1222_vm4 = vcmask 1045504   ;;  %s3225_s8 = smov 12   ;;  %s3226_s9 = smov 24  }
   0xd   : > { %307 = vst.msk [vmem:[#allocation2] sm:$0xff] %vm306_vm0, %v3223_v0  ;;  %308 = vst.msk [vmem:[#allocation2 + $0x8] sm:$0xff] %vm306_vm0, %v3223_v0  ;;  %s5113_s22 = smov (!%p3279_p3, %s2828_s22), 1  ;;  %vm803_vm5 = vcmask 93184   ;;  %vm588_vm6 = vcmask 97312   ;;  %vm1189_vm7 = vcmask 191584  }
   0xe   : > { %311 = vst.msk [vmem:[#allocation2 + $0x18] sm:$0xff] %vm306_vm0, %v3223_v0  ;;  %312 = vst.msk [vmem:[#allocation2 + $0x20] sm:$0xff] %vm306_vm0, %v3223_v0  ;;  %s2979_s24 = sshll.u32 %s5113_s22, 8  ;;  %vm1527_vm8 = vcmask 289984   ;;  %s3227_s10 = smov 36   ;;  %vm1662_vm9 = vcmask 388384  }
   0xf   : > { %317 = vst.msk [vmem:[#allocation2 + $0x48] sm:$0xff] %vm306_vm0, %v3223_v0  ;;  %318 = vst.msk [vmem:[#allocation2 + $0x50] sm:$0xff] %vm306_vm0, %v3223_v0  ;;  %s3347_s27 = scalar_lea.vmem %s4911_s1, %s2979_s24  ;;  %s3362_s7 = scalar_lea.vmem %s4910_s0, %s2979_s24  ;;  %vm1807_vm10 = vcmask 486784   ;;  %vm1949_vm11 = vcmask 585184   ;;  %vm2084_vm12 = vcmask 683584   ;;  %vm2229_vm13 = vcmask 781984  }
  0x10   : > { %320 = vst.msk [vmem:[#allocation2 + $0x60] sm:$0xff] %vm306_vm0, %v3223_v0  ;;  %321 = vst.msk [vmem:[#allocation2 + $0x68] sm:$0xff] %vm306_vm0, %v3223_v0  ;;  %v430_v1 = vld [vmem:[%s3347_s27 + $0x10] sm:$0xff]  ;;  %v428_v2 = vld [vmem:[%s3347_s27] sm:$0xff]  ;;  %s3228_s11 = smov 48   ;;  %s3229_s12 = smov 60  }
  0x11   : > { %323 = vst.msk [vmem:[#allocation2 + $0x78] sm:$0xff] %vm306_vm0, %v3223_v0  ;;  %324 = vst.msk [vmem:[#allocation2 + $0x80] sm:$0xff] %vm306_vm0, %v3223_v0  ;;  %496 = vrot.lane.b32.xlu1 %v430_v1, %s3224_s28  ;;  %492 = vrot.lane.b32.xlu0 %v428_v2, %s3224_s28  ;;  %v431_v3 = vld [vmem:[%s3347_s27 + $0x18] sm:$0xff]  ;;  %v429_v4 = vld [vmem:[%s3347_s27 + $0x8] sm:$0xff]  ;;  %s3230_s13 = smov 72   ;;  %s3231_s14 = smov 84  }
  0x12   : > { %326 = vst.msk [vmem:[#allocation2 + $0x90] sm:$0xff] %vm306_vm0, %v3223_v0  ;;  %327 = vst.msk [vmem:[#allocation2 + $0x98] sm:$0xff] %vm306_vm0, %v3223_v0  ;;  %v433_v5 = vld [vmem:[%s3347_s27 + $0x28] sm:$0xff]  ;;  %v432_v6 = vld [vmem:[%s3347_s27 + $0x20] sm:$0xff]  ;;  %s3232_s15 = smov 96   ;;  %vm2371_vm14 = vcmask 880384  }
  0x13   : > { %329 = vst.msk [vmem:[#allocation2 + $0xa8] sm:$0xff] %vm306_vm0, %v3223_v0  ;;  %330 = vst.msk [vmem:[#allocation2 + $0xb0] sm:$0xff] %vm306_vm0, %v3223_v0  ;;  %v435_v7 = vld [vmem:[%s3347_s27 + $0x38] sm:$0xff]  ;;  %v434_v8 = vld [vmem:[%s3347_s27 + $0x30] sm:$0xff]  ;;  %vm2554_vm15 = vcmask 883712   ;;  %s4893_s30 = sshll.u32 %s5113_s22, 4 }
  0x14   : > { %332 = vst.msk [vmem:[#allocation2 + $0xc0] sm:$0xff] %vm306_vm0, %v3223_v0  ;;  %333 = vst.msk [vmem:[#allocation2 + $0xc8] sm:$0xff] %vm306_vm0, %v3223_v0  ;;  %v364_v9 = vld [vmem:[%s3362_s7 + $0x10] sm:$0xff]  ;;  %v362_v10 = vld [vmem:[%s3362_s7] sm:$0xff] }
  0x15   : > { %335 = vst.msk [vmem:[#allocation2 + $0xd8] sm:$0xff] %vm306_vm0, %v3223_v0  ;;  %336 = vst.msk [vmem:[#allocation2 + $0xe0] sm:$0xff] %vm306_vm0, %v3223_v0  ;;  %498 = vrot.lane.b32.xlu1 %v431_v3, %s3224_s28  ;;  %494 = vrot.lane.b32.xlu0 %v429_v4, %s3224_s28  ;;  %v365_v11 = vld [vmem:[%s3362_s7 + $0x18] sm:$0xff]  ;;  %v437_v12 = vld [vmem:[%s3347_s27 + $0x48] sm:$0xff] }
  0x16   : > { %338 = vst.msk [vmem:[#allocation2 + $0xf0] sm:$0xff] %vm306_vm0, %v3223_v0  ;;  %339 = vst.msk [vmem:[#allocation2 + $0xf8] sm:$0xff] %vm306_vm0, %v3223_v0  ;;  %v436_v13 = vld [vmem:[%s3347_s27 + $0x40] sm:$0xff]  ;;  %v363_v14 = vld [vmem:[%s3362_s7 + $0x8] sm:$0xff] }
  0x17   : > { %341 = vst.msk [vmem:[#allocation2 + $0x108] sm:$0xff] %vm306_vm0, %v3223_v0  ;;  %342 = vst.msk [vmem:[#allocation2 + $0x110] sm:$0xff] %vm306_vm0, %v3223_v0  ;;  %v367_v15 = vld [vmem:[%s3362_s7 + $0x28] sm:$0xff]  ;;  %v366_v16 = vld [vmem:[%s3362_s7 + $0x20] sm:$0xff] }
  0x18   : > { %344 = vst.msk [vmem:[#allocation2 + $0x120] sm:$0xff] %vm306_vm0, %v3223_v0  ;;  %345 = vst.msk [vmem:[#allocation2 + $0x128] sm:$0xff] %vm306_vm0, %v3223_v0  ;;  %v369_v17 = vld [vmem:[%s3362_s7 + $0x38] sm:$0xff]  ;;  %v368_v18 = vld [vmem:[%s3362_s7 + $0x30] sm:$0xff] }
  0x19   : > { %347 = vst.msk [vmem:[#allocation2 + $0x138] sm:$0xff] %vm306_vm0, %v3223_v0  ;;  %348 = vst.msk [vmem:[#allocation2 + $0x140] sm:$0xff] %vm306_vm0, %v3223_v0  ;;  %502 = vrot.lane.b32.xlu1 %v433_v5, %s3224_s28  ;;  %500 = vrot.lane.b32.xlu0 %v432_v6, %s3224_s28  ;;  %v371_v19 = vld [vmem:[%s3362_s7 + $0x48] sm:$0xff]  ;;  %v370_v20 = vld [vmem:[%s3362_s7 + $0x40] sm:$0xff] }
  0x1a   : > { %350 = vst.msk [vmem:[#allocation2 + $0x150] sm:$0xff] %vm306_vm0, %v3223_v0  ;;  %351 = vst.msk [vmem:[#allocation2 + $0x158] sm:$0xff] %vm306_vm0, %v3223_v0  ;;  %v373_v21 = vld [vmem:[%s3362_s7 + $0x58] sm:$0xff]  ;;  %v372_v22 = vld [vmem:[%s3362_s7 + $0x50] sm:$0xff] }
  0x1b   : > { %353 = vst.msk [vmem:[#allocation2 + $0x168] sm:$0xff] %vm306_vm0, %v3223_v0  ;;  %354 = vst.msk [vmem:[#allocation2 + $0x170] sm:$0xff] %vm306_vm0, %v3223_v0  ;;  %v375_v23 = vld [vmem:[%s3362_s7 + $0x68] sm:$0xff]  ;;  %v374_v24 = vld [vmem:[%s3362_s7 + $0x60] sm:$0xff] }
  0x1c   : > { %356 = vst.msk [vmem:[#allocation2 + $0x180] sm:$0xff] %vm306_vm0, %v3223_v0  ;;  %357 = vst.msk [vmem:[#allocation2 + $0x188] sm:$0xff] %vm306_vm0, %v3223_v0  ;;  %v377_v25 = vld [vmem:[%s3362_s7 + $0x78] sm:$0xff]  ;;  %v376_v26 = vld [vmem:[%s3362_s7 + $0x70] sm:$0xff] }
  0x1d   : > { %359 = vst.msk [vmem:[#allocation2 + $0x198] sm:$0xff] %vm306_vm0, %v3223_v0  ;;  %360 = vst.msk [vmem:[#allocation2 + $0x1a0] sm:$0xff] %vm306_vm0, %v3223_v0  ;;  %506 = vrot.lane.b32.xlu1 %v435_v7, %s3224_s28  ;;  %504 = vrot.lane.b32.xlu0 %v434_v8, %s3224_s28  ;;  %v439_v27 = vld [vmem:[%s3347_s27 + $0x58] sm:$0xff]  ;;  %v438_v28 = vld [vmem:[%s3347_s27 + $0x50] sm:$0xff] }
  0x1e   : > { %316 = vst.msk [vmem:[#allocation2 + $0x40] sm:$0x3] %vm309_vm1, %v3223_v0  ;;  %310 = vst.msk [vmem:[#allocation2 + $0x10] sm:$0x3] %vm309_vm1, %v3223_v0  ;;  %v379_v29 = vld [vmem:[%s3362_s7 + $0x88] sm:$0xff]  ;;  %v378_v30 = vld [vmem:[%s3362_s7 + $0x80] sm:$0xff] }
  0x1f   : > { %313 = vst.msk [vmem:[#allocation2 + $0x28] sm:$0x3] %vm309_vm1, %v3223_v0  ;;  %319 = vst.msk [vmem:[#allocation2 + $0x58] sm:$0x3] %vm309_vm1, %v3223_v0  ;;  %v441_v31 = vld [vmem:[%s3347_s27 + $0x68] sm:$0xff]  ;;  %v440_v32 = vld [vmem:[%s3347_s27 + $0x60] sm:$0xff] }
  0x20   : > { %322 = vst.msk [vmem:[#allocation2 + $0x70] sm:$0x3] %vm309_vm1, %v3223_v0  ;;  %325 = vst.msk [vmem:[#allocation2 + $0x88] sm:$0x3] %vm309_vm1, %v3223_v0  ;;  %v381_v33 = vld [vmem:[%s3362_s7 + $0x98] sm:$0xff]  ;;  %v380_v34 = vld [vmem:[%s3362_s7 + $0x90] sm:$0xff] }
  0x21   : > { %328 = vst.msk [vmem:[#allocation2 + $0xa0] sm:$0x3] %vm309_vm1, %v3223_v0  ;;  %331 = vst.msk [vmem:[#allocation2 + $0xb8] sm:$0x3] %vm309_vm1, %v3223_v0  ;;  %510 = vrot.lane.b32.xlu1 %v437_v12, %s3224_s28  ;;  %508 = vrot.lane.b32.xlu0 %v436_v13, %s3224_s28  ;;  %v443_v35 = vld [vmem:[%s3347_s27 + $0x78] sm:$0xff]  ;;  %v442_v36 = vld [vmem:[%s3347_s27 + $0x70] sm:$0xff] }
  0x22   : > { %334 = vst.msk [vmem:[#allocation2 + $0xd0] sm:$0x3] %vm309_vm1, %v3223_v0  ;;  %337 = vst.msk [vmem:[#allocation2 + $0xe8] sm:$0x3] %vm309_vm1, %v3223_v0  ;;  %v383_v37 = vld [vmem:[%s3362_s7 + $0xa8] sm:$0xff]  ;;  %v382_v38 = vld [vmem:[%s3362_s7 + $0xa0] sm:$0xff] }
  0x23   : > { %340 = vst.msk [vmem:[#allocation2 + $0x100] sm:$0x3] %vm309_vm1, %v3223_v0  ;;  %343 = vst.msk [vmem:[#allocation2 + $0x118] sm:$0x3] %vm309_vm1, %v3223_v0  ;;  %v445_v39 = vld [vmem:[%s3347_s27 + $0x88] sm:$0xff]  ;;  %v444_v40 = vld [vmem:[%s3347_s27 + $0x80] sm:$0xff] }
  0x24   : > { %346 = vst.msk [vmem:[#allocation2 + $0x130] sm:$0x3] %vm309_vm1, %v3223_v0  ;;  %349 = vst.msk [vmem:[#allocation2 + $0x148] sm:$0x3] %vm309_vm1, %v3223_v0  ;;  %v385_v41 = vld [vmem:[%s3362_s7 + $0xb8] sm:$0xff]  ;;  %v384_v42 = vld [vmem:[%s3362_s7 + $0xb0] sm:$0xff] }
  0x25   : > { %352 = vst.msk [vmem:[#allocation2 + $0x160] sm:$0x3] %vm309_vm1, %v3223_v0  ;;  %355 = vst.msk [vmem:[#allocation2 + $0x178] sm:$0x3] %vm309_vm1, %v3223_v0  ;;  %514 = vrot.lane.b32.xlu1 %v439_v27, %s3224_s28  ;;  %512 = vrot.lane.b32.xlu0 %v438_v28, %s3224_s28  ;;  %v447_v43 = vld [vmem:[%s3347_s27 + $0x98] sm:$0xff]  ;;  %v446_v44 = vld [vmem:[%s3347_s27 + $0x90] sm:$0xff] }
  0x26   : > { %358 = vst.msk [vmem:[#allocation2 + $0x190] sm:$0x3] %vm309_vm1, %v3223_v0  ;;  %361 = vst.msk [vmem:[#allocation2 + $0x1a8] sm:$0x3] %vm309_vm1, %v3223_v0  ;;  %v387_v45 = vld [vmem:[%s3362_s7 + $0xc8] sm:$0xff]  ;;  %v386_v46 = vld [vmem:[%s3362_s7 + $0xc0] sm:$0xff] }
  0x27   : > { %398 = vst.msk [vmem:[#allocation2 + $0x31] sm:$0xff] %vm395_vm2, %v364_v9  ;;  %396 = vst.msk [vmem:[#allocation2 + $0x19] sm:$0xff] %vm395_vm2, %v362_v10  ;;  %v449_v47 = vld [vmem:[%s3347_s27 + $0xa8] sm:$0xff]  ;;  %v448_v48 = vld [vmem:[%s3347_s27 + $0xa0] sm:$0xff] }
  0x28   : > { %399 = vst.msk [vmem:[#allocation2 + $0x39] sm:$0xff] %vm395_vm2, %v365_v11  ;;  %397 = vst.msk [vmem:[#allocation2 + $0x21] sm:$0xff] %vm395_vm2, %v363_v14  ;;  %v389_v49 = vld [vmem:[%s3362_s7 + $0xd8] sm:$0xff]  ;;  %v388_v50 = vld [vmem:[%s3362_s7 + $0xd0] sm:$0xff] }
  0x29   : > { %401 = vst.msk [vmem:[#allocation2 + $0x51] sm:$0xff] %vm395_vm2, %v367_v15  ;;  %400 = vst.msk [vmem:[#allocation2 + $0x49] sm:$0xff] %vm395_vm2, %v366_v16  ;;  %518 = vrot.lane.b32.xlu1 %v441_v31, %s3224_s28  ;;  %516 = vrot.lane.b32.xlu0 %v440_v32, %s3224_s28  ;;  %v451_v51 = vld [vmem:[%s3347_s27 + $0xb8] sm:$0xff]  ;;  %v450_v52 = vld [vmem:[%s3347_s27 + $0xb0] sm:$0xff] }
  0x2a   : > { %403 = vst.msk [vmem:[#allocation2 + $0x69] sm:$0xff] %vm395_vm2, %v369_v17  ;;  %402 = vst.msk [vmem:[#allocation2 + $0x61] sm:$0xff] %vm395_vm2, %v368_v18  ;;  %v391_v53 = vld [vmem:[%s3362_s7 + $0xe8] sm:$0xff]  ;;  %v390_v54 = vld [vmem:[%s3362_s7 + $0xe0] sm:$0xff] }
  0x2b   : > { %405 = vst.msk [vmem:[#allocation2 + $0x81] sm:$0xff] %vm395_vm2, %v371_v19  ;;  %404 = vst.msk [vmem:[#allocation2 + $0x79] sm:$0xff] %vm395_vm2, %v370_v20  ;;  %v453_v55 = vld [vmem:[%s3347_s27 + $0xc8] sm:$0xff]  ;;  %v452_v56 = vld [vmem:[%s3347_s27 + $0xc0] sm:$0xff] }
  0x2c   : > { %407 = vst.msk [vmem:[#allocation2 + $0x99] sm:$0xff] %vm395_vm2, %v373_v21  ;;  %406 = vst.msk [vmem:[#allocation2 + $0x91] sm:$0xff] %vm395_vm2, %v372_v22  ;;  %v455_v57 = vld [vmem:[%s3347_s27 + $0xd8] sm:$0xff]  ;;  %v454_v58 = vld [vmem:[%s3347_s27 + $0xd0] sm:$0xff] }
  0x2d   : > { %409 = vst.msk [vmem:[#allocation2 + $0xb1] sm:$0xff] %vm395_vm2, %v375_v23  ;;  %408 = vst.msk [vmem:[#allocation2 + $0xa9] sm:$0xff] %vm395_vm2, %v374_v24  ;;  %522 = vrot.lane.b32.xlu1 %v443_v35, %s3224_s28  ;;  %520 = vrot.lane.b32.xlu0 %v442_v36, %s3224_s28  ;;  %v622_v59 = vld [vmem:[#allocation2 + $0x8] sm:$0xff]  ;;  %v623_v60 = vld [vmem:[#allocation2 + $0x10] sm:$0x3] }
  0x2e   : > { %411 = vst.msk [vmem:[#allocation2 + $0xc9] sm:$0xff] %vm395_vm2, %v377_v25  ;;  %410 = vst.msk [vmem:[#allocation2 + $0xc1] sm:$0xff] %vm395_vm2, %v376_v26  ;;  %v621_v61 = vld [vmem:[#allocation2] sm:$0xff]  ;;  %v457_v62 = vld [vmem:[%s3347_s27 + $0xe8] sm:$0xff]  ;;  %v886_v0 = vrot.slane %v622_v59, 1  ;;  %v888_v1 = vrot.slane %v623_v60, 1  ;;  %v2985_v18 = vpack.c.bf16 %v622_v59, %v622_v59 }
  0x2f   : > { %413 = vst.msk [vmem:[#allocation2 + $0xe1] sm:$0xff] %vm395_vm2, %v379_v29  ;;  %412 = vst.msk [vmem:[#allocation2 + $0xd9] sm:$0xff] %vm395_vm2, %v378_v30  ;;  %v456_v63 = vld [vmem:[%s3347_s27 + $0xe0] sm:$0xff]  ;;  %v885_v2 = vrot.slane %v621_v61, 1  ;;  %v1224_v3 = vrot.slane %v622_v59, 2  ;;  %v459_v4 = vld [vmem:[%s3347_s27 + $0xf8] sm:$0xff]  ;;  %v2984_v19 = vpack.c.bf16 %v621_v61, %v621_v61 }
  0x30   : > { %415 = vst.msk [vmem:[#allocation2 + $0xf9] sm:$0xff] %vm395_vm2, %v381_v33  ;;  %414 = vst.msk [vmem:[#allocation2 + $0xf1] sm:$0xff] %vm395_vm2, %v380_v34  ;;  %v458_v5 = vld [vmem:[%s3347_s27 + $0xf0] sm:$0xff]  ;;  %v889_v6 = vsel %vm884_vm3, %v886_v0, %v888_v1  ;;  %v1226_v8 = vrot.slane %v623_v60, 2  ;;  %v1223_v9 = vrot.slane %v621_v61, 2  ;;  %v393_v16 = vld [vmem:[%s3362_s7 + $0xf8] sm:$0xff] }
  0x31   : > { %417 = vst.msk [vmem:[#allocation2 + $0x111] sm:$0xff] %vm395_vm2, %v383_v37  ;;  %416 = vst.msk [vmem:[#allocation2 + $0x109] sm:$0xff] %vm395_vm2, %v382_v38  ;;  %526 = vrot.lane.b32.xlu1 %v445_v39, %s3224_s28  ;;  %524 = vrot.lane.b32.xlu0 %v444_v40, %s3224_s28  ;;  %v887_v7 = vsel %vm884_vm3, %v885_v2, %v886_v0  ;;  %v3017_v10 = vpack.c.bf16 %v889_v6, %v889_v6  ;;  %v392_v17 = vld [vmem:[%s3362_s7 + $0xf0] sm:$0xff] }
  0x32   : > { %419 = vst.msk [vmem:[#allocation2 + $0x129] sm:$0xff] %vm395_vm2, %v385_v41  ;;  %418 = vst.msk [vmem:[#allocation2 + $0x121] sm:$0xff] %vm395_vm2, %v384_v42  ;;  %v3016_v11 = vpack.c.bf16 %v887_v7, %v887_v7  ;;  %v1227_v12 = vsel %vm1222_vm4, %v1224_v3, %v1226_v8  ;;  %v1225_v13 = vsel %vm1222_vm4, %v1223_v9, %v1224_v3 }
  0x33   : > { %421 = vst.msk [vmem:[#allocation2 + $0x141] sm:$0xff] %vm395_vm2, %v387_v45  ;;  %420 = vst.msk [vmem:[#allocation2 + $0x139] sm:$0xff] %vm395_vm2, %v386_v46  ;;  %v3049_v14 = vpack.c.bf16 %v1227_v12, %v1227_v12  ;;  %v3048_v15 = vpack.c.bf16 %v1225_v13, %v1225_v13 }
  0x34   : > { %423 = vst.msk [vmem:[#allocation2 + $0x159] sm:$0xff] %vm395_vm2, %v389_v49  ;;  %422 = vst.msk [vmem:[#allocation2 + $0x151] sm:$0xff] %vm395_vm2, %v388_v50 }
  0x35   : > { %530 = vrot.lane.b32.xlu1 %v447_v43, %s3224_s28  ;;  %528 = vrot.lane.b32.xlu0 %v446_v44, %s3224_s28  ;;  %425 = vst.msk [vmem:[#allocation2 + $0x171] sm:$0xff] %vm395_vm2, %v391_v53  ;;  %424 = vst.msk [vmem:[#allocation2 + $0x169] sm:$0xff] %vm395_vm2, %v390_v54 }
  0x36   : > { %427 = vst.msk [vmem:[#allocation2 + $0x189] sm:$0xff] %vm395_vm2, %v393_v16  ;;  %426 = vst.msk [vmem:[#allocation2 + $0x181] sm:$0xff] %vm395_vm2, %v392_v17 }
  0x37   : > { %805 = vst.msk [vmem:[#allocation3 + $0x4] sm:$0xf] %vm803_vm5, %v2985_v18  ;;  %804 = vst.msk [vmem:[#allocation3] sm:$0xf] %vm803_vm5, %v2984_v19 }
  0x39   : > { %534 = vrot.lane.b32.xlu1 %v449_v47, %s3224_s28  ;;  %532 = vrot.lane.b32.xlu0 %v448_v48, %s3224_s28 }
  0x3d   : > { %538 = vrot.lane.b32.xlu1 %v451_v51, %s3224_s28  ;;  %536 = vrot.lane.b32.xlu0 %v450_v52, %s3224_s28 }
  0x41   : > { %542 = vrot.lane.b32.xlu1 %v453_v55, %s3224_s28  ;;  %540 = vrot.lane.b32.xlu0 %v452_v56, %s3224_s28 }
  0x45   : > { %546 = vrot.lane.b32.xlu1 %v455_v57, %s3224_s28  ;;  %544 = vrot.lane.b32.xlu0 %v454_v58, %s3224_s28 }
  0x49   : > { %550 = vrot.lane.b32.xlu1 %v457_v62, %s3224_s28  ;;  %548 = vrot.lane.b32.xlu0 %v456_v63, %s3224_s28 }
  0x4d   : > { %554 = vrot.lane.b32.xlu1 %v459_v4, %s3224_s28  ;;  %552 = vrot.lane.b32.xlu0 %v458_v5, %s3224_s28 }
  0x51   : > { %1095 = vrot.lane.b32.xlu1 %v3017_v10, %s3225_s8  ;;  %1093 = vrot.lane.b32.xlu0 %v3016_v11, %s3225_s8 }
  0x55   : > { %1433 = vrot.lane.b32.xlu1 %v3049_v14, %s3226_s9  ;;  %1431 = vrot.lane.b32.xlu0 %v3048_v15, %s3226_s9 }
  0x83   : > { %v497_v20 = vpop.permute.xlu1 %496  ;;  %v493_v21 = vpop.permute.xlu0 %492 }
  0x84   : > { %591 = vst.msk [vmem:[#allocation2 + $0x31] sm:$0xff] %vm588_vm6, %v497_v20  ;;  %589 = vst.msk [vmem:[#allocation2 + $0x19] sm:$0xff] %vm588_vm6, %v493_v21 }
  0x87   : > { %v499_v22 = vpop.permute.xlu1 %498  ;;  %v495_v23 = vpop.permute.xlu0 %494 }
  0x88   : > { %592 = vst.msk [vmem:[#allocation2 + $0x39] sm:$0xff] %vm588_vm6, %v499_v22  ;;  %590 = vst.msk [vmem:[#allocation2 + $0x21] sm:$0xff] %vm588_vm6, %v495_v23 }
  0x8b   : > { %v503_v24 = vpop.permute.xlu1 %502  ;;  %v501_v25 = vpop.permute.xlu0 %500  ;;  %v3496_v26 = vld [vmem:[#allocation2 + $0x18] sm:$0xff]  ;;  %v3498_v27 = vld [vmem:[#allocation2 + $0x30] sm:$0xff] }
  0x8c   : > { %594 = vst.msk [vmem:[#allocation2 + $0x51] sm:$0xff] %vm588_vm6, %v503_v24  ;;  %593 = vst.msk [vmem:[#allocation2 + $0x49] sm:$0xff] %vm588_vm6, %v501_v25  ;;  %v3504_v28 = vpack.c.bf16 %v3496_v26, %v3496_v26  ;;  %v3508_v29 = vpack.c.bf16 %v3498_v27, %v3498_v27  ;;  %v895_v35 = vrot.slane %v3498_v27, 1  ;;  %v890_v38 = vrot.slane %v3496_v26, 1 }
  0x8e   : > { %5010 = vst [vmem:[#allocation4_spill] sm:$0xff] %v3508_v29  ;;  %806 = vst.msk [vmem:[#allocation3 + $0x8] sm:$0xf] %vm803_vm5, %v3504_v28 }
  0x8f   : > { %v507_v30 = vpop.permute.xlu1 %506  ;;  %v505_v31 = vpop.permute.xlu0 %504  ;;  %v3510_v32 = vld [vmem:[#allocation2 + $0x20] sm:$0xff]  ;;  %v3512_v33 = vld [vmem:[#allocation2 + $0x28] sm:$0x3]  ;;  %v3514_v34 = vld [vmem:[#allocation2 + $0x38] sm:$0xff]  ;;  %808 = vst.msk [vmem:[#allocation3 + $0x10] sm:$0xf] %vm803_vm5, %v3508_v29 }
  0x90   : > { %596 = vst.msk [vmem:[#allocation2 + $0x69] sm:$0xff] %vm588_vm6, %v507_v30  ;;  %595 = vst.msk [vmem:[#allocation2 + $0x61] sm:$0xff] %vm588_vm6, %v505_v31  ;;  %v891_v36 = vrot.slane %v3510_v32, 1  ;;  %v893_v37 = vrot.slane %v3512_v33, 1  ;;  %v3526_v39 = vld [vmem:[#allocation2 + $0x40] sm:$0x3]  ;;  %v3609_v25 = vpack.c.bf16 %v3510_v32, %v3510_v32 }
  0x91   : > { %v896_v40 = vrot.slane %v3514_v34, 1  ;;  %v898_v41 = vrot.slane %v3526_v39, 1 }
  0x92   : > { %v894_v42 = vsel %vm884_vm3, %v891_v36, %v893_v37  ;;  %v892_v43 = vsel %vm884_vm3, %v890_v38, %v891_v36  ;;  %807 = vst.msk [vmem:[#allocation3 + $0xc] sm:$0xf] %vm803_vm5, %v3609_v25 }
  0x93   : > { %v3532_v44 = vpack.c.bf16 %v894_v42, %v894_v42  ;;  %v3534_v45 = vpack.c.bf16 %v892_v43, %v892_v43  ;;  %v511_v46 = vpop.permute.xlu1 %510  ;;  %v509_v47 = vpop.permute.xlu0 %508  ;;  %v897_v48 = vsel %vm884_vm3, %v895_v35, %v896_v40  ;;  %v3537_v49 = vld [vmem:[#allocation2 + $0x50] sm:$0xff]  ;;  %v3539_v50 = vld [vmem:[#allocation2 + $0x58] sm:$0x3]  ;;  %v3541_v51 = vld [vmem:[#allocation2 + $0x48] sm:$0xff]  ;;  %v899_v52 = vsel %vm884_vm3, %v896_v40, %v898_v41 }
  0x94   : > { %598 = vst.msk [vmem:[#allocation2 + $0x81] sm:$0xff] %vm588_vm6, %v511_v46  ;;  %597 = vst.msk [vmem:[#allocation2 + $0x79] sm:$0xff] %vm588_vm6, %v509_v47  ;;  %v901_v53 = vrot.slane %v3537_v49, 1  ;;  %v903_v54 = vrot.slane %v3539_v50, 1  ;;  %v900_v55 = vrot.slane %v3541_v51, 1  ;;  %v3555_v58 = vpack.c.bf16 %v899_v52, %v899_v52 }
  0x95   : > { %5011 = vst [vmem:[#allocation5_spill] sm:$0xff] %v3532_v44  ;;  %5012 = vst [vmem:[#allocation6_spill] sm:$0xff] %v3534_v45  ;;  %1099 = vrot.lane.b32.xlu1 %v3532_v44, %s3225_s8  ;;  %1097 = vrot.lane.b32.xlu0 %v3534_v45, %s3225_s8  ;;  %v3557_v59 = vpack.c.bf16 %v897_v48, %v897_v48  ;;  %v3630_v41 = vpack.c.bf16 %v3514_v34, %v3514_v34 }
  0x96   : > { %v904_v56 = vsel %vm884_vm3, %v901_v53, %v903_v54  ;;  %v902_v57 = vsel %vm884_vm3, %v900_v55, %v901_v53  ;;  %5013 = vst [vmem:[#allocation7_spill] sm:$0xff] %v3555_v58 }
  0x97   : > { %5014 = vst [vmem:[#allocation8_spill] sm:$0xff] %v3557_v59  ;;  %v515_v60 = vpop.permute.xlu1 %514  ;;  %v513_v61 = vpop.permute.xlu0 %512  ;;  %v3559_v62 = vld [vmem:[#allocation2 + $0x68] sm:$0xff]  ;;  %v3561_v63 = vld [vmem:[#allocation2 + $0x70] sm:$0x3]  ;;  %v3563_v0 = vld [vmem:[#allocation2 + $0x60] sm:$0xff]  ;;  %v3574_v4 = vpack.c.bf16 %v904_v56, %v904_v56  ;;  %v3576_v5 = vpack.c.bf16 %v902_v57, %v902_v57 }
  0x98   : > { %600 = vst.msk [vmem:[#allocation2 + $0x99] sm:$0xff] %vm588_vm6, %v515_v60  ;;  %599 = vst.msk [vmem:[#allocation2 + $0x91] sm:$0xff] %vm588_vm6, %v513_v61  ;;  %v906_v1 = vrot.slane %v3559_v62, 1  ;;  %v908_v2 = vrot.slane %v3561_v63, 1  ;;  %v905_v3 = vrot.slane %v3563_v0, 1  ;;  %v3657_v61 = vpack.c.bf16 %v3537_v49, %v3537_v49 }
  0x99   : > { %1103 = vrot.lane.b32.xlu1 %v3555_v58, %s3225_s8  ;;  %1101 = vrot.lane.b32.xlu0 %v3557_v59, %s3225_s8  ;;  %5015 = vst [vmem:[#allocation9_spill] sm:$0xff] %v3574_v4  ;;  %5016 = vst [vmem:[#allocation10_spill] sm:$0xff] %v3576_v5 }
  0x9a   : > { %v909_v6 = vsel %vm884_vm3, %v906_v1, %v908_v2  ;;  %v907_v7 = vsel %vm884_vm3, %v905_v3, %v906_v1  ;;  %5021 = vst [vmem:[#allocation15_spill] sm:$0xff] %v3630_v41  ;;  %809 = vst.msk [vmem:[#allocation3 + $0x14] sm:$0xf] %vm803_vm5, %v3630_v41  ;;  %v3661_v1 = vpack.c.bf16 %v3541_v51, %v3541_v51 }
  0x9b   : > { %v519_v8 = vpop.permute.xlu1 %518  ;;  %v517_v9 = vpop.permute.xlu0 %516  ;;  %v3580_v10 = vld [vmem:[#allocation2 + $0x80] sm:$0xff]  ;;  %v3582_v11 = vld [vmem:[#allocation2 + $0x88] sm:$0x3]  ;;  %v3584_v12 = vld [vmem:[#allocation2 + $0x78] sm:$0xff]  ;;  %v3595_v16 = vpack.c.bf16 %v909_v6, %v909_v6  ;;  %v3597_v17 = vpack.c.bf16 %v907_v7, %v907_v7  ;;  %5024 = vst [vmem:[#allocation18_spill] sm:$0xff] %v3657_v61 }
  0x9c   : > { %602 = vst.msk [vmem:[#allocation2 + $0xb1] sm:$0xff] %vm588_vm6, %v519_v8  ;;  %601 = vst.msk [vmem:[#allocation2 + $0xa9] sm:$0xff] %vm588_vm6, %v517_v9  ;;  %v911_v13 = vrot.slane %v3580_v10, 1  ;;  %v913_v14 = vrot.slane %v3582_v11, 1  ;;  %v910_v15 = vrot.slane %v3584_v12, 1  ;;  %v3756_v44 = vpack.c.bf16 %v3584_v12, %v3584_v12 }
  0x9d   : > { %1107 = vrot.lane.b32.xlu1 %v3574_v4, %s3225_s8  ;;  %1105 = vrot.lane.b32.xlu0 %v3576_v5, %s3225_s8  ;;  %5017 = vst [vmem:[#allocation11_spill] sm:$0xff] %v3595_v16  ;;  %5018 = vst [vmem:[#allocation12_spill] sm:$0xff] %v3597_v17 }
  0x9e   : > { %v914_v18 = vsel %vm884_vm3, %v911_v13, %v913_v14  ;;  %v912_v19 = vsel %vm884_vm3, %v910_v15, %v911_v13  ;;  %5025 = vst [vmem:[#allocation19_spill] sm:$0xff] %v3661_v1  ;;  %811 = vst.msk [vmem:[#allocation3 + $0x1c] sm:$0xf] %vm803_vm5, %v3657_v61 }
  0x9f   : > { %v523_v20 = vpop.permute.xlu1 %522  ;;  %v521_v21 = vpop.permute.xlu0 %520  ;;  %v3601_v22 = vld [vmem:[#allocation2 + $0x98] sm:$0xff]  ;;  %v3603_v23 = vld [vmem:[#allocation2 + $0xa0] sm:$0x3]  ;;  %v3605_v24 = vld [vmem:[#allocation2 + $0x90] sm:$0xff]  ;;  %v3620_v36 = vpack.c.bf16 %v914_v18, %v914_v18  ;;  %v3622_v37 = vpack.c.bf16 %v912_v19, %v912_v19  ;;  %810 = vst.msk [vmem:[#allocation3 + $0x18] sm:$0xf] %vm803_vm5, %v3661_v1 }
  0xa0   : > { %604 = vst.msk [vmem:[#allocation2 + $0xc9] sm:$0xff] %vm588_vm6, %v523_v20  ;;  %603 = vst.msk [vmem:[#allocation2 + $0xc1] sm:$0xff] %vm588_vm6, %v521_v21  ;;  %v916_v30 = vrot.slane %v3601_v22, 1  ;;  %v918_v31 = vrot.slane %v3603_v23, 1  ;;  %v915_v35 = vrot.slane %v3605_v24, 1  ;;  %v3690_v21 = vpack.c.bf16 %v3559_v62, %v3559_v62 }
  0xa1   : > { %1111 = vrot.lane.b32.xlu1 %v3595_v16, %s3225_s8  ;;  %1109 = vrot.lane.b32.xlu0 %v3597_v17, %s3225_s8  ;;  %5019 = vst [vmem:[#allocation13_spill] sm:$0xff] %v3620_v36  ;;  %5020 = vst [vmem:[#allocation14_spill] sm:$0xff] %v3622_v37  ;;  %v3789_v17 = vpack.c.bf16 %v3601_v22, %v3601_v22  ;;  %v1228_v1 = vrot.slane %v3496_v26, 2 }
  0xa2   : > { %v919_v38 = vsel %vm884_vm3, %v916_v30, %v918_v31  ;;  %v917_v40 = vsel %vm884_vm3, %v915_v35, %v916_v30  ;;  %5028 = vst [vmem:[#allocation22_spill] sm:$0xff] %v3690_v21  ;;  %v3694_v30 = vpack.c.bf16 %v3563_v0, %v3563_v0  ;;  %813 = vst.msk [vmem:[#allocation3 + $0x24] sm:$0xf] %vm803_vm5, %v3690_v21 }
  0xa3   : > { %v527_v42 = vpop.permute.xlu1 %526  ;;  %v525_v43 = vpop.permute.xlu0 %524  ;;  %v3632_v46 = vld [vmem:[#allocation2 + $0xb0] sm:$0xff]  ;;  %v3634_v47 = vld [vmem:[#allocation2 + $0xb8] sm:$0x3]  ;;  %v3636_v48 = vld [vmem:[#allocation2 + $0xa8] sm:$0xff]  ;;  %v3649_v55 = vpack.c.bf16 %v919_v38, %v919_v38  ;;  %v3651_v56 = vpack.c.bf16 %v917_v40, %v917_v40  ;;  %5035 = vst [vmem:[#allocation29_spill] sm:$0xff] %v3756_v44  ;;  %v3793_v21 = vpack.c.bf16 %v3605_v24, %v3605_v24 }
  0xa4   : > { %606 = vst.msk [vmem:[#allocation2 + $0xe1] sm:$0xff] %vm588_vm6, %v527_v42  ;;  %605 = vst.msk [vmem:[#allocation2 + $0xd9] sm:$0xff] %vm588_vm6, %v525_v43  ;;  %v921_v52 = vrot.slane %v3632_v46, 1  ;;  %v923_v53 = vrot.slane %v3634_v47, 1  ;;  %v920_v54 = vrot.slane %v3636_v48, 1 }
  0xa5   : > { %1115 = vrot.lane.b32.xlu1 %v3620_v36, %s3225_s8  ;;  %1113 = vrot.lane.b32.xlu0 %v3622_v37, %s3225_s8  ;;  %5022 = vst [vmem:[#allocation16_spill] sm:$0xff] %v3649_v55  ;;  %5023 = vst [vmem:[#allocation17_spill] sm:$0xff] %v3651_v56 }
  0xa6   : > { %v924_v57 = vsel %vm884_vm3, %v921_v52, %v923_v53  ;;  %v922_v60 = vsel %vm884_vm3, %v920_v54, %v921_v52  ;;  %5029 = vst [vmem:[#allocation23_spill] sm:$0xff] %v3694_v30  ;;  %812 = vst.msk [vmem:[#allocation3 + $0x20] sm:$0xf] %vm803_vm5, %v3694_v30 }
  0xa7   : > { %v531_v2 = vpop.permute.xlu1 %530  ;;  %v529_v3 = vpop.permute.xlu0 %528  ;;  %v3663_v6 = vld [vmem:[#allocation2 + $0xc8] sm:$0xff]  ;;  %v3665_v7 = vld [vmem:[#allocation2 + $0xd0] sm:$0x3]  ;;  %v3667_v8 = vld [vmem:[#allocation2 + $0xc0] sm:$0xff]  ;;  %v3682_v15 = vpack.c.bf16 %v924_v57, %v924_v57  ;;  %v3684_v18 = vpack.c.bf16 %v922_v60, %v922_v60  ;;  %814 = vst.msk [vmem:[#allocation3 + $0x28] sm:$0xf] %vm803_vm5, %v3756_v44 }
  0xa8   : > { %608 = vst.msk [vmem:[#allocation2 + $0xf9] sm:$0xff] %vm588_vm6, %v531_v2  ;;  %607 = vst.msk [vmem:[#allocation2 + $0xf1] sm:$0xff] %vm588_vm6, %v529_v3  ;;  %v926_v9 = vrot.slane %v3663_v6, 1  ;;  %v928_v13 = vrot.slane %v3665_v7, 1  ;;  %v925_v14 = vrot.slane %v3667_v8, 1  ;;  %v3723_v3 = vpack.c.bf16 %v3667_v8, %v3667_v8 }
  0xa9   : > { %1119 = vrot.lane.b32.xlu1 %v3649_v55, %s3225_s8  ;;  %1117 = vrot.lane.b32.xlu0 %v3651_v56, %s3225_s8  ;;  %5026 = vst [vmem:[#allocation20_spill] sm:$0xff] %v3682_v15  ;;  %5027 = vst [vmem:[#allocation21_spill] sm:$0xff] %v3684_v18  ;;  %v3760_v59 = vpack.c.bf16 %v3663_v6, %v3663_v6  ;;  %v3822_v55 = vpack.c.bf16 %v3632_v46, %v3632_v46 }
  0xaa   : > { %v929_v19 = vsel %vm884_vm3, %v926_v9, %v928_v13  ;;  %v927_v20 = vsel %vm884_vm3, %v925_v14, %v926_v9  ;;  %v3727_v9 = vpack.c.bf16 %v3580_v10, %v3580_v10  ;;  %820 = vst.msk [vmem:[#allocation3 + $0x40] sm:$0xf] %vm803_vm5, %v3723_v3  ;;  %5039 = vst [vmem:[#allocation33_spill] sm:$0xff] %v3789_v17 }
  0xab   : > { %v535_v31 = vpop.permute.xlu1 %534  ;;  %v533_v35 = vpop.permute.xlu0 %532  ;;  %v3696_v38 = vld [vmem:[#allocation2 + $0xe0] sm:$0xff]  ;;  %v3698_v40 = vld [vmem:[#allocation2 + $0xe8] sm:$0x3]  ;;  %v3700_v42 = vld [vmem:[#allocation2 + $0xd8] sm:$0xff]  ;;  %v3715_v54 = vpack.c.bf16 %v929_v19, %v929_v19  ;;  %v3717_v57 = vpack.c.bf16 %v927_v20, %v927_v20  ;;  %5036 = vst [vmem:[#allocation30_spill] sm:$0xff] %v3760_v59  ;;  %v3826_v56 = vpack.c.bf16 %v3636_v48, %v3636_v48 }
  0xac   : > { %610 = vst.msk [vmem:[#allocation2 + $0x111] sm:$0xff] %vm588_vm6, %v535_v31  ;;  %609 = vst.msk [vmem:[#allocation2 + $0x109] sm:$0xff] %vm588_vm6, %v533_v35  ;;  %v931_v43 = vrot.slane %v3696_v38, 1  ;;  %v933_v52 = vrot.slane %v3698_v40, 1  ;;  %v930_v53 = vrot.slane %v3700_v42, 1 }
  0xad   : > { %1123 = vrot.lane.b32.xlu1 %v3682_v15, %s3225_s8  ;;  %1121 = vrot.lane.b32.xlu0 %v3684_v18, %s3225_s8  ;;  %5030 = vst [vmem:[#allocation24_spill] sm:$0xff] %v3715_v54  ;;  %5031 = vst [vmem:[#allocation25_spill] sm:$0xff] %v3717_v57  ;;  %v3855_v18 = vpack.c.bf16 %v3696_v38, %v3696_v38 }
  0xae   : > { %v934_v60 = vsel %vm884_vm3, %v931_v43, %v933_v52  ;;  %v932_v2 = vsel %vm884_vm3, %v930_v53, %v931_v43  ;;  %5032 = vst [vmem:[#allocation26_spill] sm:$0xff] %v3727_v9  ;;  %815 = vst.msk [vmem:[#allocation3 + $0x2c] sm:$0xf] %vm803_vm5, %v3727_v9 }
  0xaf   : > { %v539_v13 = vpop.permute.xlu1 %538  ;;  %v537_v14 = vpop.permute.xlu0 %536  ;;  %v3729_v31 = vld [vmem:[#allocation2 + $0xf8] sm:$0xff]  ;;  %v3731_v19 = vld [vmem:[#allocation2 + $0x100] sm:$0x3]  ;;  %v3733_v20 = vld [vmem:[#allocation2 + $0xf0] sm:$0xff]  ;;  %v3748_v53 = vpack.c.bf16 %v934_v60, %v934_v60  ;;  %821 = vst.msk [vmem:[#allocation3 + $0x44] sm:$0xf] %vm803_vm5, %v3760_v59 }
  0xb0   : > { %612 = vst.msk [vmem:[#allocation2 + $0x129] sm:$0xff] %vm588_vm6, %v539_v13  ;;  %611 = vst.msk [vmem:[#allocation2 + $0x121] sm:$0xff] %vm588_vm6, %v537_v14  ;;  %v936_v35 = vrot.slane %v3729_v31, 1  ;;  %v938_v43 = vrot.slane %v3731_v19, 1  ;;  %v935_v52 = vrot.slane %v3733_v20, 1  ;;  %v3750_v13 = vpack.c.bf16 %v932_v2, %v932_v2 }
  0xb1   : > { %1127 = vrot.lane.b32.xlu1 %v3715_v54, %s3225_s8  ;;  %1125 = vrot.lane.b32.xlu0 %v3717_v57, %s3225_s8  ;;  %5033 = vst [vmem:[#allocation27_spill] sm:$0xff] %v3748_v53  ;;  %5040 = vst [vmem:[#allocation34_spill] sm:$0xff] %v3793_v21 }
  0xb2   : > { %5034 = vst [vmem:[#allocation28_spill] sm:$0xff] %v3750_v13  ;;  %v939_v14 = vsel %vm884_vm3, %v936_v35, %v938_v43  ;;  %v937_v45 = vsel %vm884_vm3, %v935_v52, %v936_v35  ;;  %817 = vst.msk [vmem:[#allocation3 + $0x34] sm:$0xf] %vm803_vm5, %v3789_v17 }
  0xb3   : > { %v543_v58 = vpop.permute.xlu1 %542  ;;  %v541_v5 = vpop.permute.xlu0 %540  ;;  %v3762_v4 = vld [vmem:[#allocation2 + $0x110] sm:$0xff]  ;;  %v3764_v60 = vld [vmem:[#allocation2 + $0x118] sm:$0x3]  ;;  %v3766_v2 = vld [vmem:[#allocation2 + $0x108] sm:$0xff]  ;;  %816 = vst.msk [vmem:[#allocation3 + $0x30] sm:$0xf] %vm803_vm5, %v3793_v21 }
  0xb4   : > { %614 = vst.msk [vmem:[#allocation2 + $0x141] sm:$0xff] %vm588_vm6, %v543_v58  ;;  %613 = vst.msk [vmem:[#allocation2 + $0x139] sm:$0xff] %vm588_vm6, %v541_v5  ;;  %v941_v35 = vrot.slane %v3762_v4, 1  ;;  %v943_v43 = vrot.slane %v3764_v60, 1  ;;  %v940_v52 = vrot.slane %v3766_v2, 1  ;;  %v3781_v58 = vpack.c.bf16 %v939_v14, %v939_v14 }
  0xb5   : > { %1131 = vrot.lane.b32.xlu1 %v3748_v53, %s3225_s8  ;;  %1129 = vrot.lane.b32.xlu0 %v3750_v13, %s3225_s8  ;;  %v3783_v5 = vpack.c.bf16 %v937_v45, %v937_v45  ;;  %5043 = vst [vmem:[#allocation37_spill] sm:$0xff] %v3822_v55  ;;  %5044 = vst [vmem:[#allocation38_spill] sm:$0xff] %v3826_v56 }
  0xb6   : > { %5037 = vst [vmem:[#allocation31_spill] sm:$0xff] %v3781_v58  ;;  %v944_v61 = vsel %vm884_vm3, %v941_v35, %v943_v43  ;;  %v942_v16 = vsel %vm884_vm3, %v940_v52, %v941_v35  ;;  %819 = vst.msk [vmem:[#allocation3 + $0x3c] sm:$0xf] %vm803_vm5, %v3822_v55  ;;  %v3859_v55 = vpack.c.bf16 %v3700_v42, %v3700_v42 }
  0xb7   : > { %5038 = vst [vmem:[#allocation32_spill] sm:$0xff] %v3783_v5  ;;  %v547_v30 = vpop.permute.xlu1 %546  ;;  %v545_v36 = vpop.permute.xlu0 %544  ;;  %v3795_v37 = vld [vmem:[#allocation2 + $0x128] sm:$0xff]  ;;  %v3797_v14 = vld [vmem:[#allocation2 + $0x130] sm:$0x3]  ;;  %v3799_v45 = vld [vmem:[#allocation2 + $0x120] sm:$0xff] }
  0xb8   : > { %616 = vst.msk [vmem:[#allocation2 + $0x159] sm:$0xff] %vm588_vm6, %v547_v30  ;;  %615 = vst.msk [vmem:[#allocation2 + $0x151] sm:$0xff] %vm588_vm6, %v545_v36  ;;  %v946_v35 = vrot.slane %v3795_v37, 1  ;;  %v948_v43 = vrot.slane %v3797_v14, 1  ;;  %v945_v52 = vrot.slane %v3799_v45, 1  ;;  %v3814_v30 = vpack.c.bf16 %v944_v61, %v944_v61 }
  0xb9   : > { %1135 = vrot.lane.b32.xlu1 %v3781_v58, %s3225_s8  ;;  %1133 = vrot.lane.b32.xlu0 %v3783_v5, %s3225_s8  ;;  %v3816_v36 = vpack.c.bf16 %v942_v16, %v942_v16  ;;  %818 = vst.msk [vmem:[#allocation3 + $0x38] sm:$0xf] %vm803_vm5, %v3826_v56  ;;  %5047 = vst [vmem:[#allocation41_spill] sm:$0xff] %v3855_v18 }
  0xba   : > { %5041 = vst [vmem:[#allocation35_spill] sm:$0xff] %v3814_v30  ;;  %v949_v9 = vsel %vm884_vm3, %v946_v35, %v948_v43  ;;  %v947_v44 = vsel %vm884_vm3, %v945_v52, %v946_v35  ;;  %5048 = vst [vmem:[#allocation42_spill] sm:$0xff] %v3859_v55 }
  0xbb   : > { %5042 = vst [vmem:[#allocation36_spill] sm:$0xff] %v3816_v36  ;;  %v551_v58 = vpop.permute.xlu1 %550  ;;  %v549_v17 = vpop.permute.xlu0 %548  ;;  %v3828_v21 = vld [vmem:[#allocation2 + $0x140] sm:$0xff]  ;;  %v3830_v61 = vld [vmem:[#allocation2 + $0x148] sm:$0x3]  ;;  %v3832_v16 = vld [vmem:[#allocation2 + $0x138] sm:$0xff] }
  0xbc   : > { %618 = vst.msk [vmem:[#allocation2 + $0x171] sm:$0xff] %vm588_vm6, %v551_v58  ;;  %617 = vst.msk [vmem:[#allocation2 + $0x169] sm:$0xff] %vm588_vm6, %v549_v17  ;;  %v951_v35 = vrot.slane %v3828_v21, 1  ;;  %v953_v43 = vrot.slane %v3830_v61, 1  ;;  %v950_v52 = vrot.slane %v3832_v16, 1  ;;  %v3847_v58 = vpack.c.bf16 %v949_v9, %v949_v9 }
  0xbd   : > { %1139 = vrot.lane.b32.xlu1 %v3814_v30, %s3225_s8  ;;  %1137 = vrot.lane.b32.xlu0 %v3816_v36, %s3225_s8  ;;  %v3849_v17 = vpack.c.bf16 %v947_v44, %v947_v44  ;;  %823 = vst.msk [vmem:[#allocation3 + $0x4c] sm:$0xf] %vm803_vm5, %v3855_v18  ;;  %822 = vst.msk [vmem:[#allocation3 + $0x48] sm:$0xf] %vm803_vm5, %v3859_v55  ;;  %v3888_v18 = vpack.c.bf16 %v3729_v31, %v3729_v31 }
  0xbe   : > { %5045 = vst [vmem:[#allocation39_spill] sm:$0xff] %v3847_v58  ;;  %v954_v5 = vsel %vm884_vm3, %v951_v35, %v953_v43  ;;  %v952_v15 = vsel %vm884_vm3, %v950_v52, %v951_v35  ;;  %v3892_v55 = vpack.c.bf16 %v3733_v20, %v3733_v20 }
  0xbf   : > { %5046 = vst [vmem:[#allocation40_spill] sm:$0xff] %v3849_v17  ;;  %v3861_v30 = vld [vmem:[#allocation2 + $0x158] sm:$0xff]  ;;  %v3863_v56 = vld [vmem:[#allocation2 + $0x160] sm:$0x3]  ;;  %v3865_v9 = vld [vmem:[#allocation2 + $0x150] sm:$0xff]  ;;  %v555_v44 = vpop.permute.xlu1 %554  ;;  %v553_v36 = vpop.permute.xlu0 %552  ;;  %v3880_v53 = vpack.c.bf16 %v954_v5, %v954_v5  ;;  %v3882_v13 = vpack.c.bf16 %v952_v15, %v952_v15 }
  0xc0   : > { %v956_v43 = vrot.slane %v3861_v30, 1  ;;  %v958_v35 = vrot.slane %v3863_v56, 1  ;;  %v955_v52 = vrot.slane %v3865_v9, 1  ;;  %620 = vst.msk [vmem:[#allocation2 + $0x189] sm:$0xff] %vm588_vm6, %v555_v44  ;;  %619 = vst.msk [vmem:[#allocation2 + $0x181] sm:$0xff] %vm588_vm6, %v553_v36 }
  0xc1   : > { %1143 = vrot.lane.b32.xlu1 %v3847_v58, %s3225_s8  ;;  %1141 = vrot.lane.b32.xlu0 %v3849_v17, %s3225_s8  ;;  %5049 = vst [vmem:[#allocation43_spill] sm:$0xff] %v3880_v53  ;;  %5050 = vst [vmem:[#allocation44_spill] sm:$0xff] %v3882_v13 }
  0xc2   : > { %v959_v44 = vsel %vm884_vm3, %v956_v43, %v958_v35  ;;  %v957_v36 = vsel %vm884_vm3, %v955_v52, %v956_v43  ;;  %5051 = vst [vmem:[#allocation45_spill] sm:$0xff] %v3888_v18  ;;  %5052 = vst [vmem:[#allocation46_spill] sm:$0xff] %v3892_v55 }
  0xc3   : > { %v3894_v58 = vld [vmem:[#allocation2 + $0x170] sm:$0xff]  ;;  %v3896_v17 = vld [vmem:[#allocation2 + $0x178] sm:$0x3]  ;;  %v3898_v5 = vld [vmem:[#allocation2 + $0x168] sm:$0xff]  ;;  %v1096_v15 = vpop.permute.xlu1 %1095  ;;  %v1094_v54 = vpop.permute.xlu0 %1093  ;;  %825 = vst.msk [vmem:[#allocation3 + $0x54] sm:$0xf] %vm803_vm5, %v3888_v18  ;;  %v3913_v57 = vpack.c.bf16 %v959_v44, %v959_v44  ;;  %v3915_v59 = vpack.c.bf16 %v957_v36, %v957_v36 }
  0xc4   : > { %v961_v35 = vrot.slane %v3894_v58, 1  ;;  %v963_v43 = vrot.slane %v3896_v17, 1  ;;  %v960_v52 = vrot.slane %v3898_v5, 1  ;;  %1191 = vst.msk [vmem:[#allocation3 + $0x4] sm:$0xf] %vm1189_vm7, %v1096_v15  ;;  %v1229_v15 = vrot.slane %v3510_v32, 2 }
  0xc5   : > { %1190 = vst.msk [vmem:[#allocation3] sm:$0xf] %vm1189_vm7, %v1094_v54  ;;  %1147 = vrot.lane.b32.xlu1 %v3880_v53, %s3225_s8  ;;  %1145 = vrot.lane.b32.xlu0 %v3882_v13, %s3225_s8  ;;  %v3926_v53 = vpack.c.bf16 %v3766_v2, %v3766_v2  ;;  %v1231_v36 = vrot.slane %v3512_v33, 2 }
  0xc6   : > { %824 = vst.msk [vmem:[#allocation3 + $0x50] sm:$0xf] %vm803_vm5, %v3892_v55  ;;  %v964_v54 = vsel %vm884_vm3, %v961_v35, %v963_v43  ;;  %v962_v18 = vsel %vm884_vm3, %v960_v52, %v961_v35  ;;  %v3922_v55 = vpack.c.bf16 %v3762_v4, %v3762_v4  ;;  %v1230_v26 = vsel %vm1222_vm4, %v1228_v1, %v1229_v15 }
  0xc7   : > { %5054 = vst [vmem:[#allocation48_spill] sm:$0xff] %v3926_v53  ;;  %v1434_v13 = vpop.permute.xlu1 %1433  ;;  %v1432_v44 = vpop.permute.xlu0 %1431  ;;  %826 = vst.msk [vmem:[#allocation3 + $0x58] sm:$0xf] %vm803_vm5, %v3926_v53  ;;  %v3940_v32 = vpack.c.bf16 %v964_v54, %v964_v54  ;;  %v3942_v33 = vpack.c.bf16 %v962_v18, %v962_v18  ;;  %v1236_v35 = vrot.slane %v3526_v39, 2  ;;  %v1233_v43 = vrot.slane %v3498_v27, 2 }
  0xc8   : > { %5053 = vst [vmem:[#allocation47_spill] sm:$0xff] %v3922_v55  ;;  %1529 = vst.msk [vmem:[#allocation3 + $0x4] sm:$0xf] %vm1527_vm8, %v1434_v13  ;;  %v1234_v13 = vrot.slane %v3514_v34, 2  ;;  %v3950_v52 = vpack.c.bf16 %v3795_v37, %v3795_v37  ;;  %v3957_v18 = vpack.c.bf16 %v1230_v26, %v1230_v26  ;;  %v3963_v27 = vpack.c.bf16 %v3799_v45, %v3799_v45 }
  0xc9   : > { %1528 = vst.msk [vmem:[#allocation3] sm:$0xf] %vm1527_vm8, %v1432_v44  ;;  %1151 = vrot.lane.b32.xlu1 %v3913_v57, %s3225_s8  ;;  %1149 = vrot.lane.b32.xlu0 %v3915_v59, %s3225_s8  ;;  %v1232_v44 = vsel %vm1222_vm4, %v1229_v15, %v1231_v36  ;;  %v1239_v39 = vrot.slane %v3537_v49, 2  ;;  %v3969_v1 = vpack.c.bf16 %v3828_v21, %v3828_v21  ;;  %v1238_v53 = vrot.slane %v3541_v51, 2 }
  0xca   : > { %827 = vst.msk [vmem:[#allocation3 + $0x5c] sm:$0xf] %vm803_vm5, %v3922_v55  ;;  %5055 = vst [vmem:[#allocation49_spill] sm:$0xff] %v3950_v52  ;;  %v1237_v34 = vsel %vm1222_vm4, %v1234_v13, %v1236_v35  ;;  %v3973_v15 = vpack.c.bf16 %v3832_v16, %v3832_v16  ;;  %v3975_v54 = vpack.c.bf16 %v1232_v44, %v1232_v44  ;;  %v1241_v35 = vrot.slane %v3539_v50, 2 }
  0xcb   : > { %5056 = vst [vmem:[#allocation50_spill] sm:$0xff] %v3957_v18  ;;  %829 = vst.msk [vmem:[#allocation3 + $0x64] sm:$0xf] %vm803_vm5, %v3950_v52  ;;  %v1235_v36 = vsel %vm1222_vm4, %v1233_v43, %v1234_v13  ;;  %v3982_v26 = vpack.c.bf16 %v3861_v30, %v3861_v30  ;;  %v3986_v49 = vpack.c.bf16 %v3865_v9, %v3865_v9  ;;  %v1244_v44 = vrot.slane %v3559_v62, 2 }
  0xcc   : > { %5057 = vst [vmem:[#allocation51_spill] sm:$0xff] %v3975_v54  ;;  %828 = vst.msk [vmem:[#allocation3 + $0x60] sm:$0xf] %vm803_vm5, %v3963_v27  ;;  %v3996_v13 = vpack.c.bf16 %v3894_v58, %v3894_v58  ;;  %v4000_v43 = vpack.c.bf16 %v3898_v5, %v3898_v5  ;;  %v4014_v50 = vpack.c.bf16 %v1237_v34, %v1237_v34  ;;  %v1243_v52 = vrot.slane %v3563_v0, 2 }
  0xcd   : > { %1155 = vrot.lane.b32.xlu1 %v3940_v32, %s3225_s8  ;;  %1153 = vrot.lane.b32.xlu0 %v3942_v33, %s3225_s8  ;;  %831 = vst.msk [vmem:[#allocation3 + $0x6c] sm:$0xf] %vm803_vm5, %v3969_v1  ;;  %830 = vst.msk [vmem:[#allocation3 + $0x68] sm:$0xf] %vm803_vm5, %v3973_v15  ;;  %v4016_v51 = vpack.c.bf16 %v1235_v36, %v1235_v36  ;;  %v1240_v55 = vsel %vm1222_vm4, %v1238_v53, %v1239_v39  ;;  %v1251_v53 = vrot.slane %v3582_v11, 2 }
  0xce   : > { %833 = vst.msk [vmem:[#allocation3 + $0x74] sm:$0xf] %vm803_vm5, %v3982_v26  ;;  %832 = vst.msk [vmem:[#allocation3 + $0x70] sm:$0xf] %vm803_vm5, %v3986_v49  ;;  %v4029_v36 = vpack.c.bf16 %v1240_v55, %v1240_v55  ;;  %v1248_v0 = vrot.slane %v3584_v12, 2  ;;  %v1253_v12 = vrot.slane %v3605_v24, 2 }
  0xcf   : > { %835 = vst.msk [vmem:[#allocation3 + $0x7c] sm:$0xf] %vm803_vm5, %v3996_v13  ;;  %834 = vst.msk [vmem:[#allocation3 + $0x78] sm:$0xf] %vm803_vm5, %v4000_v43  ;;  %v1258_v24 = vrot.slane %v3636_v48, 2  ;;  %v1263_v48 = vrot.slane %v3667_v8, 2 }
  0xd0   : > { %v1268_v8 = vrot.slane %v3700_v42, 2  ;;  %v1273_v42 = vrot.slane %v3733_v20, 2  ;;  %v1278_v20 = vrot.slane %v3766_v2, 2  ;;  %v1283_v2 = vrot.slane %v3799_v45, 2 }
  0xd1   : > { %1437 = vrot.lane.b32.xlu1 %v3975_v54, %s3226_s9  ;;  %1435 = vrot.lane.b32.xlu0 %v3957_v18, %s3226_s9  ;;  %v1246_v18 = vrot.slane %v3561_v63, 2  ;;  %v1242_v54 = vsel %vm1222_vm4, %v1239_v39, %v1241_v35  ;;  %v1245_v63 = vsel %vm1222_vm4, %v1243_v52, %v1244_v44  ;;  %v1249_v35 = vrot.slane %v3580_v10, 2 }
  0xd2   : > { %v4027_v34 = vpack.c.bf16 %v1242_v54, %v1242_v54  ;;  %v4042_v55 = vpack.c.bf16 %v1245_v63, %v1245_v63  ;;  %v1256_v52 = vrot.slane %v3603_v23, 2  ;;  %v1261_v63 = vrot.slane %v3634_v47, 2 }
  0xd3   : > { %v1247_v62 = vsel %vm1222_vm4, %v1244_v44, %v1246_v18  ;;  %v1254_v18 = vrot.slane %v3601_v22, 2  ;;  %v1252_v10 = vsel %vm1222_vm4, %v1249_v35, %v1251_v53  ;;  %v1250_v11 = vsel %vm1222_vm4, %v1248_v0, %v1249_v35 }
  0xd4   : > { %v4040_v39 = vpack.c.bf16 %v1247_v62, %v1247_v62  ;;  %v4053_v54 = vpack.c.bf16 %v1252_v10, %v1252_v10  ;;  %v4055_v44 = vpack.c.bf16 %v1250_v11, %v1250_v11  ;;  %v1259_v62 = vrot.slane %v3632_v46, 2 }
  0xd5   : > { %1441 = vrot.lane.b32.xlu1 %v4014_v50, %s3226_s9  ;;  %1439 = vrot.lane.b32.xlu0 %v4016_v51, %s3226_s9  ;;  %v1257_v22 = vsel %vm1222_vm4, %v1254_v18, %v1256_v52  ;;  %v1255_v23 = vsel %vm1222_vm4, %v1253_v12, %v1254_v18  ;;  %v1264_v0 = vrot.slane %v3663_v6, 2  ;;  %v1266_v18 = vrot.slane %v3665_v7, 2 }
  0xd6   : > { %v4066_v35 = vpack.c.bf16 %v1257_v22, %v1257_v22  ;;  %v4068_v53 = vpack.c.bf16 %v1255_v23, %v1255_v23  ;;  %v1262_v46 = vsel %vm1222_vm4, %v1259_v62, %v1261_v63  ;;  %v1260_v47 = vsel %vm1222_vm4, %v1258_v24, %v1259_v62 }
  0xd7   : > { %v4079_v52 = vpack.c.bf16 %v1262_v46, %v1262_v46  ;;  %v4081_v10 = vpack.c.bf16 %v1260_v47, %v1260_v47  ;;  %v1267_v6 = vsel %vm1222_vm4, %v1264_v0, %v1266_v18  ;;  %v1265_v7 = vsel %vm1222_vm4, %v1263_v48, %v1264_v0 }
  0xd8   : > { %v1269_v11 = vrot.slane %v3696_v38, 2  ;;  %v1271_v12 = vrot.slane %v3698_v40, 2  ;;  %v4092_v22 = vpack.c.bf16 %v1267_v6, %v1267_v6  ;;  %v4094_v23 = vpack.c.bf16 %v1265_v7, %v1265_v7 }
  0xd9   : > { %1445 = vrot.lane.b32.xlu1 %v4027_v34, %s3226_s9  ;;  %1443 = vrot.lane.b32.xlu0 %v4029_v36, %s3226_s9  ;;  %v1274_v62 = vrot.slane %v3729_v31, 2  ;;  %v1276_v63 = vrot.slane %v3731_v19, 2  ;;  %v1279_v18 = vrot.slane %v3762_v4, 2  ;;  %v1281_v46 = vrot.slane %v3764_v60, 2 }
  0xda   : > { %v1272_v38 = vsel %vm1222_vm4, %v1269_v11, %v1271_v12  ;;  %v1270_v40 = vsel %vm1222_vm4, %v1268_v8, %v1269_v11  ;;  %v1284_v6 = vrot.slane %v3795_v37, 2  ;;  %v1286_v7 = vrot.slane %v3797_v14, 2 }
  0xdb   : > { %v4105_v24 = vpack.c.bf16 %v1272_v38, %v1272_v38  ;;  %v4107_v0 = vpack.c.bf16 %v1270_v40, %v1270_v40  ;;  %v1277_v31 = vsel %vm1222_vm4, %v1274_v62, %v1276_v63  ;;  %v1275_v19 = vsel %vm1222_vm4, %v1273_v42, %v1274_v62 }
  0xdc   : > { %v4118_v47 = vpack.c.bf16 %v1277_v31, %v1277_v31  ;;  %v4120_v48 = vpack.c.bf16 %v1275_v19, %v1275_v19  ;;  %v1282_v4 = vsel %vm1222_vm4, %v1279_v18, %v1281_v46  ;;  %v1280_v60 = vsel %vm1222_vm4, %v1278_v20, %v1279_v18 }
  0xdd   : > { %1449 = vrot.lane.b32.xlu1 %v4040_v39, %s3226_s9  ;;  %1447 = vrot.lane.b32.xlu0 %v4042_v55, %s3226_s9  ;;  %v4131_v11 = vpack.c.bf16 %v1282_v4, %v1282_v4  ;;  %v4133_v12 = vpack.c.bf16 %v1280_v60, %v1280_v60  ;;  %v1287_v37 = vsel %vm1222_vm4, %v1284_v6, %v1286_v7  ;;  %v1289_v8 = vrot.slane %v3828_v21, 2 }
  0xde   : > { %5058 = vst [vmem:[#allocation52_spill] sm:$0xff] %v4120_v48  ;;  %v1285_v14 = vsel %vm1222_vm4, %v1283_v2, %v1284_v6  ;;  %v1291_v62 = vrot.slane %v3830_v61, 2  ;;  %v1288_v45 = vrot.slane %v3832_v16, 2  ;;  %v4144_v63 = vpack.c.bf16 %v1287_v37, %v1287_v37 }
  0xdf   : > { %v4146_v38 = vpack.c.bf16 %v1285_v14, %v1285_v14  ;;  %v1294_v40 = vrot.slane %v3861_v30, 2  ;;  %v1296_v42 = vrot.slane %v3863_v56, 2  ;;  %v1293_v16 = vrot.slane %v3865_v9, 2 }
  0xe0   : > { %v1292_v21 = vsel %vm1222_vm4, %v1289_v8, %v1291_v62  ;;  %v1290_v61 = vsel %vm1222_vm4, %v1288_v45, %v1289_v8  ;;  %v1299_v18 = vrot.slane %v3894_v58, 2  ;;  %v1301_v46 = vrot.slane %v3896_v17, 2 }
  0xe1   : > { %1453 = vrot.lane.b32.xlu1 %v4053_v54, %s3226_s9  ;;  %1451 = vrot.lane.b32.xlu0 %v4055_v44, %s3226_s9  ;;  %v4157_v31 = vpack.c.bf16 %v1292_v21, %v1292_v21  ;;  %v4159_v19 = vpack.c.bf16 %v1290_v61, %v1290_v61  ;;  %v1297_v30 = vsel %vm1222_vm4, %v1294_v40, %v1296_v42  ;;  %v1298_v9 = vrot.slane %v3898_v5, 2 }
  0xe2   : > { %v1295_v56 = vsel %vm1222_vm4, %v1293_v16, %v1294_v40  ;;  %v4170_v20 = vpack.c.bf16 %v1297_v30, %v1297_v30  ;;  %v1302_v7 = vsel %vm1222_vm4, %v1299_v18, %v1301_v46  ;;  %v670_v40 = vld [vmem:[#allocation2 + $0x188] sm:$0xff] }
  0xe3   : > { %v4172_v6 = vpack.c.bf16 %v1295_v56, %v1295_v56  ;;  %v1300_v4 = vsel %vm1222_vm4, %v1298_v9, %v1299_v18  ;;  %v4180_v5 = vpack.c.bf16 %v1302_v7, %v1302_v7  ;;  %v1699_v30 = vrot.slane %v670_v40, 1  ;;  %v5060_v56 = vld [vmem:[#allocation30_spill] sm:$0xff]  ;;  %v671_v18 = vld [vmem:[#allocation2 + $0x190] sm:$0x3] }
  0xe4   : > { %v4182_v60 = vpack.c.bf16 %v1300_v4, %v1300_v4  ;;  %v4216_v7 = vpack.c.bf16 %v670_v40, %v670_v40 }
  0xe5   : > { %1457 = vrot.lane.b32.xlu1 %v4066_v35, %s3226_s9  ;;  %1455 = vrot.lane.b32.xlu0 %v4068_v53, %s3226_s9 }
  0xe9   : > { %1461 = vrot.lane.b32.xlu1 %v4079_v52, %s3226_s9  ;;  %1459 = vrot.lane.b32.xlu0 %v4081_v10, %s3226_s9 }
  0xed   : > { %1465 = vrot.lane.b32.xlu1 %v4092_v22, %s3226_s9  ;;  %1463 = vrot.lane.b32.xlu0 %v4094_v23, %s3226_s9 }
  0xf1   : > { %1469 = vrot.lane.b32.xlu1 %v4105_v24, %s3226_s9  ;;  %1467 = vrot.lane.b32.xlu0 %v4107_v0, %s3226_s9 }
  0xf5   : > { %1473 = vrot.lane.b32.xlu1 %v4118_v47, %s3226_s9  ;;  %1471 = vrot.lane.b32.xlu0 %v4120_v48, %s3226_s9 }
  0xf9   : > { %1477 = vrot.lane.b32.xlu1 %v4131_v11, %s3226_s9  ;;  %1475 = vrot.lane.b32.xlu0 %v4133_v12, %s3226_s9 }
  0xfd   : > { %1481 = vrot.lane.b32.xlu1 %v4144_v63, %s3226_s9  ;;  %1479 = vrot.lane.b32.xlu0 %v4146_v38, %s3226_s9 }
 0x101   : > { %1485 = vrot.lane.b32.xlu1 %v4157_v31, %s3226_s9  ;;  %1483 = vrot.lane.b32.xlu0 %v4159_v19, %s3226_s9 }
 0x105   : > { %1489 = vrot.lane.b32.xlu1 %v4170_v20, %s3226_s9  ;;  %1487 = vrot.lane.b32.xlu0 %v4172_v6, %s3226_s9 }
 0x107   : > { %v1100_v58 = vpop.permute.xlu1 %1099  ;;  %v1098_v17 = vpop.permute.xlu0 %1097 }
 0x108   : > { %1193 = vst.msk [vmem:[#allocation3 + $0xc] sm:$0xf] %vm1189_vm7, %v1100_v58  ;;  %1192 = vst.msk [vmem:[#allocation3 + $0x8] sm:$0xf] %vm1189_vm7, %v1098_v17  ;;  %v1701_v58 = vrot.slane %v671_v18, 1  ;;  %v5061_v17 = vld [vmem:[#allocation25_spill] sm:$0xff] }
 0x109   : > { %1493 = vrot.lane.b32.xlu1 %v4180_v5, %s3226_s9  ;;  %1491 = vrot.lane.b32.xlu0 %v4182_v60, %s3226_s9  ;;  %s294_s9 = scalar_lea.vmem %s4914_s4, %s4893_s30 }
 0x10b   : > { %v1104_v2 = vpop.permute.xlu1 %1103  ;;  %v1102_v37 = vpop.permute.xlu0 %1101 }
 0x10c   : > { %1195 = vst.msk [vmem:[#allocation3 + $0x14] sm:$0xf] %vm1189_vm7, %v1104_v2  ;;  %1194 = vst.msk [vmem:[#allocation3 + $0x10] sm:$0xf] %vm1189_vm7, %v1102_v37 }
 0x10d   : > { %1568 = vrot.lane.b32.xlu1 %v3609_v25, %s3227_s10  ;;  %1566 = vrot.lane.b32.xlu0 %v3504_v28, %s3227_s10  ;;  %v669_v25 = vld [vmem:[#allocation2 + $0x180] sm:$0xff]  ;;  %v5059_v28 = vld [vmem:[#allocation19_spill] sm:$0xff] }
 0x10e   : > { %v4208_v61 = vpack.c.bf16 %v669_v25, %v669_v25  ;;  %v1698_v16 = vrot.slane %v669_v25, 1 }
 0x10f   : > { %v1108_v14 = vpop.permute.xlu1 %1107  ;;  %v1106_v8 = vpop.permute.xlu0 %1105 }
 0x110   : > { %1197 = vst.msk [vmem:[#allocation3 + $0x1c] sm:$0xf] %vm1189_vm7, %v1108_v14  ;;  %1196 = vst.msk [vmem:[#allocation3 + $0x18] sm:$0xf] %vm1189_vm7, %v1106_v8  ;;  %v1700_v4 = vsel %vm884_vm3, %v1698_v16, %v1699_v30  ;;  %v1840_v8 = vrot.slane %v669_v25, 2 }
 0x111   : > { %1572 = vrot.lane.b32.xlu1 %v3630_v41, %s3227_s10  ;;  %1570 = vrot.lane.b32.xlu0 %v3508_v29, %s3227_s10  ;;  %v4225_v14 = vpack.c.bf16 %v1700_v4, %v1700_v4 }
 0x113   : > { %v1112_v62 = vpop.permute.xlu1 %1111  ;;  %v1110_v45 = vpop.permute.xlu0 %1109 }
 0x114   : > { %1199 = vst.msk [vmem:[#allocation3 + $0x24] sm:$0xf] %vm1189_vm7, %v1112_v62  ;;  %1198 = vst.msk [vmem:[#allocation3 + $0x20] sm:$0xf] %vm1189_vm7, %v1110_v45  ;;  %v1841_v62 = vrot.slane %v670_v40, 2  ;;  %v1702_v45 = vsel %vm884_vm3, %v1699_v30, %v1701_v58  ;;  %v1843_v40 = vrot.slane %v671_v18, 2 }
 0x115   : > { %1594 = vrot.lane.b32.xlu1 %v3723_v3, %s3227_s10  ;;  %1574 = vrot.lane.b32.xlu0 %v5059_v28, %s3227_s10  ;;  %v672_v18 = vld [vmem:[#allocation2 + $0x198] sm:$0xff] }
 0x116   : > { %v1842_v25 = vsel %vm1222_vm4, %v1840_v8, %v1841_v62  ;;  %v1844_v58 = vsel %vm1222_vm4, %v1841_v62, %v1843_v40  ;;  %v3086_v62 = vpack.c.bf16 %v672_v18, %v672_v18 }
 0x117   : > { %v1116_v42 = vpop.permute.xlu1 %1115  ;;  %v1114_v21 = vpop.permute.xlu0 %1113  ;;  %v4243_v4 = vpack.c.bf16 %v1842_v25, %v1842_v25  ;;  %v4252_v8 = vpack.c.bf16 %v1844_v58, %v1844_v58  ;;  %v5064_v58 = vld [vmem:[#allocation41_spill] sm:$0xff] }
 0x118   : > { %1201 = vst.msk [vmem:[#allocation3 + $0x2c] sm:$0xf] %vm1189_vm7, %v1116_v42  ;;  %1200 = vst.msk [vmem:[#allocation3 + $0x28] sm:$0xf] %vm1189_vm7, %v1114_v21  ;;  %v5062_v42 = vld [vmem:[#allocation24_spill] sm:$0xff] }
 0x119   : > { %1626 = vrot.lane.b32.xlu1 %v4208_v61, %s3227_s10  ;;  %1596 = vrot.lane.b32.xlu0 %v5060_v56, %s3227_s10 }
 0x11b   : > { %v1120_v46 = vpop.permute.xlu1 %1119  ;;  %v1118_v9 = vpop.permute.xlu0 %1117 }
 0x11c   : > { %1203 = vst.msk [vmem:[#allocation3 + $0x34] sm:$0xf] %vm1189_vm7, %v1120_v46  ;;  %1202 = vst.msk [vmem:[#allocation3 + $0x30] sm:$0xf] %vm1189_vm7, %v1118_v9  ;;  %v4234_v46 = vpack.c.bf16 %v1702_v45, %v1702_v45  ;;  %v673_v45 = vld [vmem:[#allocation2 + $0x1a0] sm:$0xff] }
 0x11d   : > { %1739 = vrot.lane.b32.xlu1 %v5061_v17, %s3228_s11  ;;  %1628 = vrot.lane.b32.xlu0 %v4216_v7, %s3227_s10  ;;  %v2121_v25 = vrot.slane %v673_v45, 1  ;;  %v2263_v28 = vrot.slane %v673_v45, 2 }
 0x11f   : > { %v1124_v2 = vpop.permute.xlu1 %1123  ;;  %v1122_v37 = vpop.permute.xlu0 %1121 }
 0x120   : > { %1205 = vst.msk [vmem:[#allocation3 + $0x3c] sm:$0xf] %vm1189_vm7, %v1124_v2  ;;  %1204 = vst.msk [vmem:[#allocation3 + $0x38] sm:$0xf] %vm1189_vm7, %v1122_v37 }
 0x121   : > { %1771 = vrot.lane.b32.xlu1 %v4225_v14, %s3228_s11  ;;  %1741 = vrot.lane.b32.xlu0 %v5062_v42, %s3228_s11 }
 0x123   : > { %v1128_v21 = vpop.permute.xlu1 %1127  ;;  %v1126_v16 = vpop.permute.xlu0 %1125 }
 0x124   : > { %1207 = vst.msk [vmem:[#allocation3 + $0x44] sm:$0xf] %vm1189_vm7, %v1128_v21  ;;  %1206 = vst.msk [vmem:[#allocation3 + $0x40] sm:$0xf] %vm1189_vm7, %v1126_v16  ;;  %v5063_v21 = vld [vmem:[#allocation42_spill] sm:$0xff]  ;;  %v2120_v16 = vrot.slane %v672_v18, 1 }
 0x125   : > { %1881 = vrot.lane.b32.xlu1 %v4094_v23, %s3229_s12  ;;  %1773 = vrot.lane.b32.xlu0 %v4234_v46, %s3228_s11 }
 0x127   : > { %v1132_v30 = vpop.permute.xlu1 %1131  ;;  %v1130_v9 = vpop.permute.xlu0 %1129 }
 0x128   : > { %1209 = vst.msk [vmem:[#allocation3 + $0x4c] sm:$0xf] %vm1189_vm7, %v1132_v30  ;;  %1208 = vst.msk [vmem:[#allocation3 + $0x48] sm:$0xf] %vm1189_vm7, %v1130_v9  ;;  %v674_v9 = vld [vmem:[#allocation2 + $0x1a8] sm:$0x3] }
 0x129   : > { %1913 = vrot.lane.b32.xlu1 %v4243_v4, %s3229_s12  ;;  %1883 = vrot.lane.b32.xlu0 %v4092_v22, %s3229_s12  ;;  %v2123_v29 = vrot.slane %v674_v9, 1 }
 0x12b   : > { %v1136_v2 = vpop.permute.xlu1 %1135  ;;  %v1134_v37 = vpop.permute.xlu0 %1133 }
 0x12c   : > { %1211 = vst.msk [vmem:[#allocation3 + $0x54] sm:$0xf] %vm1189_vm7, %v1136_v2  ;;  %1210 = vst.msk [vmem:[#allocation3 + $0x50] sm:$0xf] %vm1189_vm7, %v1134_v37  ;;  %v3087_v2 = vpack.c.bf16 %v673_v45, %v673_v45  ;;  %v2122_v37 = vsel %vm884_vm3, %v2120_v16, %v2121_v25 }
 0x12d   : > { %2016 = vrot.lane.b32.xlu1 %v5063_v21, %s3230_s13  ;;  %1915 = vrot.lane.b32.xlu0 %v4252_v8, %s3229_s12 }
 0x12f   : > { %v1140_v40 = vpop.permute.xlu1 %1139  ;;  %v1138_v30 = vpop.permute.xlu0 %1137 }
 0x130   : > { %1213 = vst.msk [vmem:[#allocation3 + $0x5c] sm:$0xf] %vm1189_vm7, %v1140_v40  ;;  %1212 = vst.msk [vmem:[#allocation3 + $0x58] sm:$0xf] %vm1189_vm7, %v1138_v30  ;;  %v5065_v40 = vld [vmem:[#allocation28_spill] sm:$0xff]  ;;  %v2262_v30 = vrot.slane %v672_v18, 2 }
 0x131   : > { %2048 = vrot.lane.b32.xlu1 %v3086_v62, %s3230_s13  ;;  %2018 = vrot.lane.b32.xlu0 %v5064_v58, %s3230_s13  ;;  %v3088_v62 = vpack.c.bf16 %v2122_v37, %v2122_v37  ;;  %v2124_v58 = vsel %vm884_vm3, %v2121_v25, %v2123_v29 }
 0x133   : > { %v1144_v41 = vpop.permute.xlu1 %1143  ;;  %v1142_v21 = vpop.permute.xlu0 %1141 }
 0x134   : > { %1215 = vst.msk [vmem:[#allocation3 + $0x64] sm:$0xf] %vm1189_vm7, %v1144_v41  ;;  %1214 = vst.msk [vmem:[#allocation3 + $0x60] sm:$0xf] %vm1189_vm7, %v1142_v21  ;;  %v5066_v41 = vld [vmem:[#allocation27_spill] sm:$0xff]  ;;  %v3089_v21 = vpack.c.bf16 %v2124_v58, %v2124_v58 }
 0x135   : > { %2161 = vrot.lane.b32.xlu1 %v5065_v40, %s3231_s14  ;;  %2050 = vrot.lane.b32.xlu0 %v3087_v2, %s3230_s13  ;;  %v2264_v40 = vsel %vm1222_vm4, %v2262_v30, %v2263_v28  ;;  %v2265_v2 = vrot.slane %v674_v9, 2 }
 0x136   : > { %v3090_v29 = vpack.c.bf16 %v2264_v40, %v2264_v40 }
 0x137   : > { %v1148_v48 = vpop.permute.xlu1 %1147  ;;  %v1146_v16 = vpop.permute.xlu0 %1145 }
 0x138   : > { %1217 = vst.msk [vmem:[#allocation3 + $0x6c] sm:$0xf] %vm1189_vm7, %v1148_v48  ;;  %1216 = vst.msk [vmem:[#allocation3 + $0x68] sm:$0xf] %vm1189_vm7, %v1146_v16  ;;  %v2266_v48 = vsel %vm1222_vm4, %v2263_v28, %v2265_v2  ;;  %v5067_v28 = vld [vmem:[#allocation38_spill] sm:$0xff]  ;;  %v5068_v16 = vld [vmem:[#allocation37_spill] sm:$0xff] }
 0x139   : > { %2193 = vrot.lane.b32.xlu1 %v3088_v62, %s3231_s14  ;;  %2163 = vrot.lane.b32.xlu0 %v5066_v41, %s3231_s14  ;;  %v3091_v9 = vpack.c.bf16 %v2266_v48, %v2266_v48  ;;  %v5070_v48 = vld [vmem:[#allocation20_spill] sm:$0xff] }
 0x13b   : > { %v1152_v37 = vpop.permute.xlu1 %1151  ;;  %v1150_v18 = vpop.permute.xlu0 %1149 }
 0x13c   : > { %1219 = vst.msk [vmem:[#allocation3 + $0x74] sm:$0xf] %vm1189_vm7, %v1152_v37  ;;  %1218 = vst.msk [vmem:[#allocation3 + $0x70] sm:$0xf] %vm1189_vm7, %v1150_v18  ;;  %v5069_v37 = vld [vmem:[#allocation21_spill] sm:$0xff] }
 0x13d   : > { %2303 = vrot.lane.b32.xlu1 %v4107_v0, %s3232_s15  ;;  %2195 = vrot.lane.b32.xlu0 %v3089_v21, %s3231_s14 }
 0x13f   : > { %v1156_v45 = vpop.permute.xlu1 %1155  ;;  %v1154_v25 = vpop.permute.xlu0 %1153 }
 0x140   : > { %1221 = vst.msk [vmem:[#allocation3 + $0x7c] sm:$0xf] %vm1189_vm7, %v1156_v45  ;;  %1220 = vst.msk [vmem:[#allocation3 + $0x78] sm:$0xf] %vm1189_vm7, %v1154_v25 }
 0x141   : > { %2335 = vrot.lane.b32.xlu1 %v3090_v29, %s3232_s15  ;;  %2305 = vrot.lane.b32.xlu0 %v4105_v24, %s3232_s15 }
 0x143   : > { %v1438_v58 = vpop.permute.xlu1 %1437  ;;  %v1436_v62 = vpop.permute.xlu0 %1435 }
 0x144   : > { %1531 = vst.msk [vmem:[#allocation3 + $0xc] sm:$0xf] %vm1527_vm8, %v1438_v58  ;;  %1530 = vst.msk [vmem:[#allocation3 + $0x8] sm:$0xf] %vm1527_vm8, %v1436_v62 }
 0x145   : > { %1590 = vrot.lane.b32.xlu1 %v5067_v28, %s3227_s10  ;;  %2337 = vrot.lane.b32.xlu0 %v3091_v9, %s3232_s15 }
 0x147   : > { %v1442_v40 = vpop.permute.xlu1 %1441  ;;  %v1440_v30 = vpop.permute.xlu0 %1439 }
 0x148   : > { %1533 = vst.msk [vmem:[#allocation3 + $0x14] sm:$0xf] %vm1527_vm8, %v1442_v40  ;;  %1532 = vst.msk [vmem:[#allocation3 + $0x10] sm:$0xf] %vm1527_vm8, %v1440_v30 }
 0x149   : > { %1622 = vrot.lane.b32.xlu1 %v4000_v43, %s3227_s10  ;;  %1592 = vrot.lane.b32.xlu0 %v5068_v16, %s3227_s10 }
 0x14b   : > { %v1446_v21 = vpop.permute.xlu1 %1445  ;;  %v1444_v2 = vpop.permute.xlu0 %1443 }
 0x14c   : > { %1535 = vst.msk [vmem:[#allocation3 + $0x1c] sm:$0xf] %vm1527_vm8, %v1446_v21  ;;  %1534 = vst.msk [vmem:[#allocation3 + $0x18] sm:$0xf] %vm1527_vm8, %v1444_v2 }
 0x14d   : > { %1735 = vrot.lane.b32.xlu1 %v5069_v37, %s3228_s11  ;;  %1624 = vrot.lane.b32.xlu0 %v3996_v13, %s3227_s10 }
 0x14f   : > { %v1450_v18 = vpop.permute.xlu1 %1449  ;;  %v1448_v29 = vpop.permute.xlu0 %1447 }
 0x150   : > { %1537 = vst.msk [vmem:[#allocation3 + $0x24] sm:$0xf] %vm1527_vm8, %v1450_v18  ;;  %1536 = vst.msk [vmem:[#allocation3 + $0x20] sm:$0xf] %vm1527_vm8, %v1448_v29 }
 0x151   : > { %1767 = vrot.lane.b32.xlu1 %v3942_v33, %s3228_s11  ;;  %1737 = vrot.lane.b32.xlu0 %v5070_v48, %s3228_s11 }
 0x153   : > { %v1454_v45 = vpop.permute.xlu1 %1453  ;;  %v1452_v25 = vpop.permute.xlu0 %1451 }
 0x154   : > { %1539 = vst.msk [vmem:[#allocation3 + $0x2c] sm:$0xf] %vm1527_vm8, %v1454_v45  ;;  %1538 = vst.msk [vmem:[#allocation3 + $0x28] sm:$0xf] %vm1527_vm8, %v1452_v25 }
 0x155   : > { %1877 = vrot.lane.b32.xlu1 %v4081_v10, %s3229_s12  ;;  %1769 = vrot.lane.b32.xlu0 %v3940_v32, %s3228_s11 }
 0x157   : > { %v1458_v9 = vpop.permute.xlu1 %1457  ;;  %v1456_v58 = vpop.permute.xlu0 %1455 }
 0x158   : > { %1541 = vst.msk [vmem:[#allocation3 + $0x34] sm:$0xf] %vm1527_vm8, %v1458_v9  ;;  %1540 = vst.msk [vmem:[#allocation3 + $0x30] sm:$0xf] %vm1527_vm8, %v1456_v58 }
 0x159   : > { %1909 = vrot.lane.b32.xlu1 %v4182_v60, %s3229_s12  ;;  %1879 = vrot.lane.b32.xlu0 %v4079_v52, %s3229_s12 }
 0x15b   : > { %v1462_v62 = vpop.permute.xlu1 %1461  ;;  %v1460_v40 = vpop.permute.xlu0 %1459 }
 0x15c   : > { %1543 = vst.msk [vmem:[#allocation3 + $0x3c] sm:$0xf] %vm1527_vm8, %v1462_v62  ;;  %1542 = vst.msk [vmem:[#allocation3 + $0x38] sm:$0xf] %vm1527_vm8, %v1460_v40  ;;  %v5074_v62 = vld [vmem:[#allocation16_spill] sm:$0xff] }
 0x15d   : > { %2012 = vrot.lane.b32.xlu1 %v3723_v3, %s3230_s13  ;;  %1911 = vrot.lane.b32.xlu0 %v4180_v5, %s3229_s12 }
 0x15f   : > { %v1466_v30 = vpop.permute.xlu1 %1465  ;;  %v1464_v21 = vpop.permute.xlu0 %1463 }
 0x160   : > { %1545 = vst.msk [vmem:[#allocation3 + $0x44] sm:$0xf] %vm1527_vm8, %v1466_v30  ;;  %1544 = vst.msk [vmem:[#allocation3 + $0x40] sm:$0xf] %vm1527_vm8, %v1464_v21 }
 0x161   : > { %2044 = vrot.lane.b32.xlu1 %v4208_v61, %s3230_s13  ;;  %2014 = vrot.lane.b32.xlu0 %v5060_v56, %s3230_s13 }
 0x163   : > { %v1470_v2 = vpop.permute.xlu1 %1469  ;;  %v1468_v18 = vpop.permute.xlu0 %1467 }
 0x164   : > { %1547 = vst.msk [vmem:[#allocation3 + $0x4c] sm:$0xf] %vm1527_vm8, %v1470_v2  ;;  %1546 = vst.msk [vmem:[#allocation3 + $0x48] sm:$0xf] %vm1527_vm8, %v1468_v18 }
 0x165   : > { %2157 = vrot.lane.b32.xlu1 %v5061_v17, %s3231_s14  ;;  %2046 = vrot.lane.b32.xlu0 %v4216_v7, %s3230_s13 }
 0x167   : > { %v1474_v3 = vpop.permute.xlu1 %1473  ;;  %v1472_v29 = vpop.permute.xlu0 %1471 }
 0x168   : > { %1549 = vst.msk [vmem:[#allocation3 + $0x54] sm:$0xf] %vm1527_vm8, %v1474_v3  ;;  %1548 = vst.msk [vmem:[#allocation3 + $0x50] sm:$0xf] %vm1527_vm8, %v1472_v29 }
 0x169   : > { %2189 = vrot.lane.b32.xlu1 %v4225_v14, %s3231_s14  ;;  %2159 = vrot.lane.b32.xlu0 %v5062_v42, %s3231_s14 }
 0x16b   : > { %v1478_v61 = vpop.permute.xlu1 %1477  ;;  %v1476_v56 = vpop.permute.xlu0 %1475 }
 0x16c   : > { %1551 = vst.msk [vmem:[#allocation3 + $0x5c] sm:$0xf] %vm1527_vm8, %v1478_v61  ;;  %1550 = vst.msk [vmem:[#allocation3 + $0x58] sm:$0xf] %vm1527_vm8, %v1476_v56 }
 0x16d   : > { %2299 = vrot.lane.b32.xlu1 %v4094_v23, %s3232_s15  ;;  %2191 = vrot.lane.b32.xlu0 %v4234_v46, %s3231_s14  ;;  %v5071_v23 = vld [vmem:[#allocation34_spill] sm:$0xff] }
 0x16f   : > { %v1482_v7 = vpop.permute.xlu1 %1481  ;;  %v1480_v17 = vpop.permute.xlu0 %1479 }
 0x170   : > { %1553 = vst.msk [vmem:[#allocation3 + $0x64] sm:$0xf] %vm1527_vm8, %v1482_v7  ;;  %1552 = vst.msk [vmem:[#allocation3 + $0x60] sm:$0xf] %vm1527_vm8, %v1480_v17 }
 0x171   : > { %2331 = vrot.lane.b32.xlu1 %v4243_v4, %s3232_s15  ;;  %2301 = vrot.lane.b32.xlu0 %v4092_v22, %s3232_s15  ;;  %v5072_v22 = vld [vmem:[#allocation33_spill] sm:$0xff] }
 0x173   : > { %v1486_v14 = vpop.permute.xlu1 %1485  ;;  %v1484_v42 = vpop.permute.xlu0 %1483 }
 0x174   : > { %1555 = vst.msk [vmem:[#allocation3 + $0x6c] sm:$0xf] %vm1527_vm8, %v1486_v14  ;;  %1554 = vst.msk [vmem:[#allocation3 + $0x68] sm:$0xf] %vm1527_vm8, %v1484_v42 }
 0x175   : > { %1586 = vrot.lane.b32.xlu1 %v5071_v23, %s3227_s10  ;;  %2333 = vrot.lane.b32.xlu0 %v4252_v8, %s3232_s15  ;;  %v5073_v8 = vld [vmem:[#allocation17_spill] sm:$0xff] }
 0x177   : > { %v1490_v46 = vpop.permute.xlu1 %1489  ;;  %v1488_v45 = vpop.permute.xlu0 %1487 }
 0x178   : > { %1557 = vst.msk [vmem:[#allocation3 + $0x74] sm:$0xf] %vm1527_vm8, %v1490_v46  ;;  %1556 = vst.msk [vmem:[#allocation3 + $0x70] sm:$0xf] %vm1527_vm8, %v1488_v45 }
 0x179   : > { %1618 = vrot.lane.b32.xlu1 %v3986_v49, %s3227_s10  ;;  %1588 = vrot.lane.b32.xlu0 %v5072_v22, %s3227_s10 }
 0x17b   : > { %v1494_v4 = vpop.permute.xlu1 %1493  ;;  %v1492_v25 = vpop.permute.xlu0 %1491 }
 0x17c   : > { %1559 = vst.msk [vmem:[#allocation3 + $0x7c] sm:$0xf] %vm1527_vm8, %v1494_v4  ;;  %1558 = vst.msk [vmem:[#allocation3 + $0x78] sm:$0xf] %vm1527_vm8, %v1492_v25  ;;  %v5078_v4 = vld [vmem:[#allocation44_spill] sm:$0xff]  ;;  %v5079_v25 = vld [vmem:[#allocation13_spill] sm:$0xff] }
 0x17d   : > { %1731 = vrot.lane.b32.xlu1 %v5073_v8, %s3228_s11  ;;  %1620 = vrot.lane.b32.xlu0 %v3982_v26, %s3227_s10 }
 0x17f   : > { %v1569_v9 = vpop.permute.xlu1 %1568  ;;  %v1567_v58 = vpop.permute.xlu0 %1566 }
 0x180   : > { %1664 = vst.msk [vmem:[#allocation3 + $0x4] sm:$0xf] %vm1662_vm9, %v1569_v9  ;;  %1663 = vst.msk [vmem:[#allocation3] sm:$0xf] %vm1662_vm9, %v1567_v58 }
 0x181   : > { %1763 = vrot.lane.b32.xlu1 %v3915_v59, %s3228_s11  ;;  %1733 = vrot.lane.b32.xlu0 %v5074_v62, %s3228_s11 }
 0x183   : > { %v1573_v40 = vpop.permute.xlu1 %1572  ;;  %v1571_v30 = vpop.permute.xlu0 %1570 }
 0x184   : > { %1666 = vst.msk [vmem:[#allocation3 + $0xc] sm:$0xf] %vm1662_vm9, %v1573_v40  ;;  %1665 = vst.msk [vmem:[#allocation3 + $0x8] sm:$0xf] %vm1662_vm9, %v1571_v30  ;;  %v5080_v40 = vld [vmem:[#allocation43_spill] sm:$0xff] }
 0x185   : > { %1873 = vrot.lane.b32.xlu1 %v4068_v53, %s3229_s12  ;;  %1765 = vrot.lane.b32.xlu0 %v3913_v57, %s3228_s11 }
 0x187   : > { %v1595_v21 = vpop.permute.xlu1 %1594  ;;  %v1575_v2 = vpop.permute.xlu0 %1574 }
 0x188   : > { %1677 = vst.msk [vmem:[#allocation3 + $0x38] sm:$0xf] %vm1662_vm9, %v1595_v21  ;;  %1667 = vst.msk [vmem:[#allocation3 + $0x10] sm:$0xf] %vm1662_vm9, %v1575_v2 }
 0x189   : > { %1905 = vrot.lane.b32.xlu1 %v4172_v6, %s3229_s12  ;;  %1875 = vrot.lane.b32.xlu0 %v4066_v35, %s3229_s12 }
 0x18b   : > { %v1627_v18 = vpop.permute.xlu1 %1626  ;;  %v1597_v3 = vpop.permute.xlu0 %1596 }
 0x18c   : > { %1693 = vst.msk [vmem:[#allocation3 + $0x78] sm:$0xf] %vm1662_vm9, %v1627_v18  ;;  %1678 = vst.msk [vmem:[#allocation3 + $0x3c] sm:$0xf] %vm1662_vm9, %v1597_v3 }
 0x18d   : > { %2008 = vrot.lane.b32.xlu1 %v5067_v28, %s3230_s13  ;;  %1907 = vrot.lane.b32.xlu0 %v4170_v20, %s3229_s12 }
 0x18f   : > { %v1740_v29 = vpop.permute.xlu1 %1739  ;;  %v1629_v61 = vpop.permute.xlu0 %1628 }
 0x190   : > { %1822 = vst.msk [vmem:[#allocation3 + $0x38] sm:$0xf] %vm1807_vm10, %v1740_v29 }
 0x191   : > { %1694 = vst.msk [vmem:[#allocation3 + $0x7c] sm:$0xf] %vm1662_vm9, %v1629_v61  ;;  %2040 = vrot.lane.b32.xlu1 %v4000_v43, %s3230_s13  ;;  %2010 = vrot.lane.b32.xlu0 %v5068_v16, %s3230_s13 }
 0x193   : > { %v1772_v56 = vpop.permute.xlu1 %1771  ;;  %v1742_v7 = vpop.permute.xlu0 %1741 }
 0x194   : > { %1838 = vst.msk [vmem:[#allocation3 + $0x78] sm:$0xf] %vm1807_vm10, %v1772_v56  ;;  %1823 = vst.msk [vmem:[#allocation3 + $0x3c] sm:$0xf] %vm1807_vm10, %v1742_v7 }
 0x195   : > { %2153 = vrot.lane.b32.xlu1 %v5069_v37, %s3231_s14  ;;  %2042 = vrot.lane.b32.xlu0 %v3996_v13, %s3230_s13 }
 0x197   : > { %v1882_v28 = vpop.permute.xlu1 %1881  ;;  %v1774_v17 = vpop.permute.xlu0 %1773 }
 0x198   : > { %1964 = vst.msk [vmem:[#allocation3 + $0x38] sm:$0xf] %vm1949_vm11, %v1882_v28 }
 0x199   : > { %1839 = vst.msk [vmem:[#allocation3 + $0x7c] sm:$0xf] %vm1807_vm10, %v1774_v17  ;;  %2185 = vrot.lane.b32.xlu1 %v3942_v33, %s3231_s14  ;;  %2155 = vrot.lane.b32.xlu0 %v5070_v48, %s3231_s14 }
 0x19b   : > { %v1914_v43 = vpop.permute.xlu1 %1913  ;;  %v1884_v16 = vpop.permute.xlu0 %1883 }
 0x19c   : > { %1980 = vst.msk [vmem:[#allocation3 + $0x78] sm:$0xf] %vm1949_vm11, %v1914_v43  ;;  %1965 = vst.msk [vmem:[#allocation3 + $0x3c] sm:$0xf] %vm1949_vm11, %v1884_v16 }
 0x19d   : > { %2295 = vrot.lane.b32.xlu1 %v4081_v10, %s3232_s15  ;;  %2187 = vrot.lane.b32.xlu0 %v3940_v32, %s3231_s14  ;;  %v5075_v32 = vld [vmem:[#allocation29_spill] sm:$0xff] }
 0x19f   : > { %v2017_v13 = vpop.permute.xlu1 %2016  ;;  %v1916_v37 = vpop.permute.xlu0 %1915 }
 0x1a0   : > { %2099 = vst.msk [vmem:[#allocation3 + $0x38] sm:$0xf] %vm2084_vm12, %v2017_v13 }
 0x1a1   : > { %1981 = vst.msk [vmem:[#allocation3 + $0x7c] sm:$0xf] %vm1949_vm11, %v1916_v37  ;;  %2327 = vrot.lane.b32.xlu1 %v4182_v60, %s3232_s15  ;;  %2297 = vrot.lane.b32.xlu0 %v4079_v52, %s3232_s15  ;;  %v5076_v52 = vld [vmem:[#allocation26_spill] sm:$0xff]  ;;  %v5084_v37 = vld [vmem:[#allocation49_spill] sm:$0xff] }
 0x1a3   : > { %v2049_v33 = vpop.permute.xlu1 %2048  ;;  %v2019_v48 = vpop.permute.xlu0 %2018 }
 0x1a4   : > { %2115 = vst.msk [vmem:[#allocation3 + $0x78] sm:$0xf] %vm2084_vm12, %v2049_v33  ;;  %2100 = vst.msk [vmem:[#allocation3 + $0x3c] sm:$0xf] %vm2084_vm12, %v2019_v48 }
 0x1a5   : > { %1582 = vrot.lane.b32.xlu1 %v5075_v32, %s3227_s10  ;;  %2329 = vrot.lane.b32.xlu0 %v4180_v5, %s3232_s15  ;;  %v5077_v5 = vld [vmem:[#allocation14_spill] sm:$0xff] }
 0x1a7   : > { %v2162_v10 = vpop.permute.xlu1 %2161  ;;  %v2051_v14 = vpop.permute.xlu0 %2050 }
 0x1a8   : > { %2244 = vst.msk [vmem:[#allocation3 + $0x38] sm:$0xf] %vm2229_vm13, %v2162_v10  ;;  %v5085_v10 = vld [vmem:[#allocation40_spill] sm:$0xff] }
 0x1a9   : > { %2116 = vst.msk [vmem:[#allocation3 + $0x7c] sm:$0xf] %vm2084_vm12, %v2051_v14  ;;  %1614 = vrot.lane.b32.xlu1 %v3973_v15, %s3227_s10  ;;  %1584 = vrot.lane.b32.xlu0 %v5076_v52, %s3227_s10  ;;  %v5086_v14 = vld [vmem:[#allocation11_spill] sm:$0xff] }
 0x1ab   : > { %v2194_v60 = vpop.permute.xlu1 %2193  ;;  %v2164_v42 = vpop.permute.xlu0 %2163 }
 0x1ac   : > { %2260 = vst.msk [vmem:[#allocation3 + $0x78] sm:$0xf] %vm2229_vm13, %v2194_v60  ;;  %2245 = vst.msk [vmem:[#allocation3 + $0x3c] sm:$0xf] %vm2229_vm13, %v2164_v42 }
 0x1ad   : > { %1727 = vrot.lane.b32.xlu1 %v5077_v5, %s3228_s11  ;;  %1616 = vrot.lane.b32.xlu0 %v3969_v1, %s3227_s10 }
 0x1af   : > { %v2304_v46 = vpop.permute.xlu1 %2303  ;;  %v2196_v45 = vpop.permute.xlu0 %2195 }
 0x1b0   : > { %2386 = vst.msk [vmem:[#allocation3 + $0x38] sm:$0xf] %vm2371_vm14, %v2304_v46  ;;  %v5087_v46 = vld [vmem:[#allocation39_spill] sm:$0xff] }
 0x1b1   : > { %2261 = vst.msk [vmem:[#allocation3 + $0x7c] sm:$0xf] %vm2229_vm13, %v2196_v45  ;;  %1759 = vrot.lane.b32.xlu1 %v5078_v4, %s3228_s11  ;;  %1729 = vrot.lane.b32.xlu0 %v5079_v25, %s3228_s11 }
 0x1b3   : > { %v2336_v9 = vpop.permute.xlu1 %2335  ;;  %v2306_v58 = vpop.permute.xlu0 %2305 }
 0x1b4   : > { %2402 = vst.msk [vmem:[#allocation3 + $0x78] sm:$0xf] %vm2371_vm14, %v2336_v9  ;;  %2387 = vst.msk [vmem:[#allocation3 + $0x3c] sm:$0xf] %vm2371_vm14, %v2306_v58 }
 0x1b5   : > { %1869 = vrot.lane.b32.xlu1 %v4055_v44, %s3229_s12  ;;  %1761 = vrot.lane.b32.xlu0 %v5080_v40, %s3228_s11 }
 0x1b7   : > { %v1591_v30 = vpop.permute.xlu1 %1590  ;;  %v2338_v21 = vpop.permute.xlu0 %2337 }
 0x1b8   : > { %1675 = vst.msk [vmem:[#allocation3 + $0x30] sm:$0xf] %vm1662_vm9, %v1591_v30 }
 0x1b9   : > { %2403 = vst.msk [vmem:[#allocation3 + $0x7c] sm:$0xf] %vm2371_vm14, %v2338_v21  ;;  %1901 = vrot.lane.b32.xlu1 %v4159_v19, %s3229_s12  ;;  %1871 = vrot.lane.b32.xlu0 %v4053_v54, %s3229_s12 }
 0x1bb   : > { %v1623_v2 = vpop.permute.xlu1 %1622  ;;  %v1593_v18 = vpop.permute.xlu0 %1592  ;;  %v3166_v3 = vld [vmem:[#allocation3 + $0x38] sm:$0xff]  }
 0x1bc   : > { %1691 = vst.msk [vmem:[#allocation3 + $0x70] sm:$0xf] %vm1662_vm9, %v1623_v2  ;;  %1676 = vst.msk [vmem:[#allocation3 + $0x34] sm:$0xf] %vm1662_vm9, %v1593_v18 }
 0x1bd   : > { %2004 = vrot.lane.b32.xlu1 %v5071_v23, %s3230_s13  ;;  %1903 = vrot.lane.b32.xlu0 %v4157_v31, %s3229_s12  ;;  %v2583_v23 = vsel %vm2554_vm15, %v3166_v3, 0 }
 0x1bf   : > { %v1736_v29 = vpop.permute.xlu1 %1735  ;;  %v1625_v61 = vpop.permute.xlu0 %1624 }
 0x1c0   : > { %v3165_v56 = vld [vmem:[#allocation3 + $0x78] sm:$0xff]   ;;  %1820 = vst.msk [vmem:[#allocation3 + $0x30] sm:$0xf] %vm1807_vm10, %v1736_v29 }
 0x1c1   : > { %1692 = vst.msk [vmem:[#allocation3 + $0x74] sm:$0xf] %vm1662_vm9, %v1625_v61  ;;  %2036 = vrot.lane.b32.xlu1 %v3986_v49, %s3230_s13  ;;  %2006 = vrot.lane.b32.xlu0 %v5072_v22, %s3230_s13 }
 0x1c2   : > { %3128 = vmatprep.subr.msk.bf16.mxu0 %vm2554_vm15, %v3165_v56  ;;  %3129 = vmatprep.subr.msk.bf16.mxu1 %vm2554_vm15, %v3165_v56 }
 0x1c3   : > { %v1768_v7 = vpop.permute.xlu1 %1767  ;;  %3093 = vmatpush3.bf16.xpose.msra.mxu0 %v2583_v23  ;;  %3120 = vmatpush3.bf16.xpose.msra.mxu1 %v2583_v23  ;;  %v1738_v28 = vpop.permute.xlu0 %1737 }
 0x1c4   : > { %1836 = vst.msk [vmem:[#allocation3 + $0x70] sm:$0xf] %vm1807_vm10, %v1768_v7  ;;  %1821 = vst.msk [vmem:[#allocation3 + $0x34] sm:$0xf] %vm1807_vm10, %v1738_v28 }
 0x1c5   : > { %2149 = vrot.lane.b32.xlu1 %v5073_v8, %s3231_s14  ;;  %2038 = vrot.lane.b32.xlu0 %v3982_v26, %s3230_s13 }
 0x1c7   : > { %v1878_v49 = vpop.permute.xlu1 %1877  ;;  %v1770_v22 = vpop.permute.xlu0 %1769 }
 0x1c8   : > { %1962 = vst.msk [vmem:[#allocation3 + $0x30] sm:$0xf] %vm1949_vm11, %v1878_v49 }
 0x1c9   : > { %1837 = vst.msk [vmem:[#allocation3 + $0x74] sm:$0xf] %vm1807_vm10, %v1770_v22  ;;  %2181 = vrot.lane.b32.xlu1 %v3915_v59, %s3231_s14  ;;  %2151 = vrot.lane.b32.xlu0 %v5074_v62, %s3231_s14  ;;  %v5092_v22 = vld [vmem:[#allocation10_spill] sm:$0xff] }
 0x1cb   : > { %v1910_v17 = vpop.permute.xlu1 %1909  ;;  %v1880_v43 = vpop.permute.xlu0 %1879 }
 0x1cc   : > { %1978 = vst.msk [vmem:[#allocation3 + $0x70] sm:$0xf] %vm1949_vm11, %v1910_v17  ;;  %1963 = vst.msk [vmem:[#allocation3 + $0x34] sm:$0xf] %vm1949_vm11, %v1880_v43 }
 0x1cd   : > { %2291 = vrot.lane.b32.xlu1 %v4068_v53, %s3232_s15  ;;  %2183 = vrot.lane.b32.xlu0 %v3913_v57, %s3231_s14  ;;  %v5081_v57 = vld [vmem:[#allocation23_spill] sm:$0xff] }
 0x1cf   : > { %v2013_v26 = vpop.permute.xlu1 %2012  ;;  %v1912_v8 = vpop.permute.xlu0 %1911 }
 0x1d0   : > { %2097 = vst.msk [vmem:[#allocation3 + $0x30] sm:$0xf] %vm2084_vm12, %v2013_v26  ;;  %v5093_v26 = vld [vmem:[#allocation35_spill] sm:$0xff] }
 0x1d1   : > { %1979 = vst.msk [vmem:[#allocation3 + $0x74] sm:$0xf] %vm1949_vm11, %v1912_v8  ;;  %2323 = vrot.lane.b32.xlu1 %v4172_v6, %s3232_s15  ;;  %2293 = vrot.lane.b32.xlu0 %v4066_v35, %s3232_s15  ;;  %v5082_v35 = vld [vmem:[#allocation22_spill] sm:$0xff]  ;;  %v5094_v8 = vld [vmem:[#allocation36_spill] sm:$0xff] }
 0x1d3   : > { %v2045_v59 = vpop.permute.xlu1 %2044  ;;  %v2015_v62 = vpop.permute.xlu0 %2014 }
 0x1d4   : > { %2113 = vst.msk [vmem:[#allocation3 + $0x70] sm:$0xf] %vm2084_vm12, %v2045_v59  ;;  %2098 = vst.msk [vmem:[#allocation3 + $0x34] sm:$0xf] %vm2084_vm12, %v2015_v62 }
 0x1d5   : > { %1578 = vrot.lane.b32.xlu1 %v5081_v57, %s3227_s10  ;;  %2325 = vrot.lane.b32.xlu0 %v4170_v20, %s3232_s15  ;;  %v5083_v20 = vld [vmem:[#allocation12_spill] sm:$0xff] }
 0x1d7   : > { %v2158_v53 = vpop.permute.xlu1 %2157  ;;  %v2047_v16 = vpop.permute.xlu0 %2046 }
 0x1d8   : > { %2242 = vst.msk [vmem:[#allocation3 + $0x30] sm:$0xf] %vm2229_vm13, %v2158_v53 }
 0x1d9   : > { %2114 = vst.msk [vmem:[#allocation3 + $0x74] sm:$0xf] %vm2084_vm12, %v2047_v16  ;;  %1610 = vrot.lane.b32.xlu1 %v3963_v27, %s3227_s10  ;;  %1580 = vrot.lane.b32.xlu0 %v5082_v35, %s3227_s10 }
 0x1db   : > { %v2190_v6 = vpop.permute.xlu1 %2189  ;;  %v2160_v13 = vpop.permute.xlu0 %2159 }
 0x1dc   : > { %2258 = vst.msk [vmem:[#allocation3 + $0x70] sm:$0xf] %vm2229_vm13, %v2190_v6  ;;  %2243 = vst.msk [vmem:[#allocation3 + $0x34] sm:$0xf] %vm2229_vm13, %v2160_v13 }
 0x1dd   : > { %1723 = vrot.lane.b32.xlu1 %v5083_v20, %s3228_s11  ;;  %1612 = vrot.lane.b32.xlu0 %v5084_v37, %s3227_s10 }
 0x1df   : > { %v2300_v33 = vpop.permute.xlu1 %2299  ;;  %v2192_v48 = vpop.permute.xlu0 %2191 }
 0x1e0   : > { %2384 = vst.msk [vmem:[#allocation3 + $0x30] sm:$0xf] %vm2371_vm14, %v2300_v33 }
 0x1e1   : > { %2259 = vst.msk [vmem:[#allocation3 + $0x74] sm:$0xf] %vm2229_vm13, %v2192_v48  ;;  %1755 = vrot.lane.b32.xlu1 %v5085_v10, %s3228_s11  ;;  %1725 = vrot.lane.b32.xlu0 %v5086_v14, %s3228_s11 }
 0x1e3   : > { %v2332_v60 = vpop.permute.xlu1 %2331  ;;  %v2302_v42 = vpop.permute.xlu0 %2301 }
 0x1e4   : > { %2400 = vst.msk [vmem:[#allocation3 + $0x70] sm:$0xf] %vm2371_vm14, %v2332_v60  ;;  %2385 = vst.msk [vmem:[#allocation3 + $0x34] sm:$0xf] %vm2371_vm14, %v2302_v42 }
 0x1e5   : > { %1865 = vrot.lane.b32.xlu1 %v4042_v55, %s3229_s12  ;;  %1757 = vrot.lane.b32.xlu0 %v5087_v46, %s3228_s11 }
 0x1e7   : > { %v1587_v45 = vpop.permute.xlu1 %1586  ;;  %v2334_v9 = vpop.permute.xlu0 %2333 }
 0x1e8   : > { %1673 = vst.msk [vmem:[#allocation3 + $0x28] sm:$0xf] %vm1662_vm9, %v1587_v45 }
 0x1e9   : > { %2401 = vst.msk [vmem:[#allocation3 + $0x74] sm:$0xf] %vm2371_vm14, %v2334_v9  ;;  %1897 = vrot.lane.b32.xlu1 %v4146_v38, %s3229_s12  ;;  %1867 = vrot.lane.b32.xlu0 %v4040_v39, %s3229_s12 }
 0x1eb   : > { %v1619_v58 = vpop.permute.xlu1 %1618  ;;  %v1589_v30 = vpop.permute.xlu0 %1588  ;;  %v3168_v21 = vld [vmem:[#allocation3 + $0x30] sm:$0xff]  }
 0x1ec   : > { %1689 = vst.msk [vmem:[#allocation3 + $0x68] sm:$0xf] %vm1662_vm9, %v1619_v58  ;;  %1674 = vst.msk [vmem:[#allocation3 + $0x2c] sm:$0xf] %vm1662_vm9, %v1589_v30 }
 0x1ed   : > { %2000 = vrot.lane.b32.xlu1 %v5075_v32, %s3230_s13  ;;  %1899 = vrot.lane.b32.xlu0 %v4144_v63, %s3229_s12  ;;  %v2580_v32 = vsel %vm2554_vm15, %v3168_v21, 0 }
 0x1ef   : > { %v1732_v2 = vpop.permute.xlu1 %1731  ;;  %v1621_v18 = vpop.permute.xlu0 %1620 }
 0x1f0   : > { %v3167_v3 = vld [vmem:[#allocation3 + $0x70] sm:$0xff]   ;;  %1818 = vst.msk [vmem:[#allocation3 + $0x28] sm:$0xf] %vm1807_vm10, %v1732_v2 }
 0x1f1   : > { %1690 = vst.msk [vmem:[#allocation3 + $0x6c] sm:$0xf] %vm1662_vm9, %v1621_v18  ;;  %2032 = vrot.lane.b32.xlu1 %v3973_v15, %s3230_s13  ;;  %2002 = vrot.lane.b32.xlu0 %v5076_v52, %s3230_s13 }
 0x1f2   : > { %3130 = vmatprep.subr.msk.bf16.mxu0 %vm2554_vm15, %v3167_v3  ;;  %3131 = vmatprep.subr.msk.bf16.mxu1 %vm2554_vm15, %v3167_v3  ;;  %v5099_v3 = vld [vmem:[#allocation31_spill] sm:$0xff] }
 0x1f3   : > { %v1764_v29 = vpop.permute.xlu1 %1763  ;;  %3095 = vmatpush3.bf16.xpose.msra.mxu0 %v2580_v32  ;;  %3121 = vmatpush3.bf16.xpose.msra.mxu1 %v2580_v32  ;;  %v1734_v61 = vpop.permute.xlu0 %1733  ;;  %v5100_v32 = vld [vmem:[#allocation32_spill] sm:$0xff] }
 0x1f4   : > { %1834 = vst.msk [vmem:[#allocation3 + $0x68] sm:$0xf] %vm1807_vm10, %v1764_v29  ;;  %1819 = vst.msk [vmem:[#allocation3 + $0x2c] sm:$0xf] %vm1807_vm10, %v1734_v61 }
 0x1f5   : > { %2145 = vrot.lane.b32.xlu1 %v5077_v5, %s3231_s14  ;;  %2034 = vrot.lane.b32.xlu0 %v3969_v1, %s3230_s13 }
 0x1f7   : > { %v1874_v15 = vpop.permute.xlu1 %1873  ;;  %v1766_v52 = vpop.permute.xlu0 %1765 }
 0x1f8   : > { %1960 = vst.msk [vmem:[#allocation3 + $0x28] sm:$0xf] %vm1949_vm11, %v1874_v15 }
 0x1f9   : > { %1835 = vst.msk [vmem:[#allocation3 + $0x6c] sm:$0xf] %vm1807_vm10, %v1766_v52  ;;  %2177 = vrot.lane.b32.xlu1 %v5078_v4, %s3231_s14  ;;  %2147 = vrot.lane.b32.xlu0 %v5079_v25, %s3231_s14 }
 0x1fb   : > { %v1906_v56 = vpop.permute.xlu1 %1905  ;;  %v1876_v23 = vpop.permute.xlu0 %1875 }
 0x1fc   : > { %1976 = vst.msk [vmem:[#allocation3 + $0x68] sm:$0xf] %vm1949_vm11, %v1906_v56  ;;  %1961 = vst.msk [vmem:[#allocation3 + $0x2c] sm:$0xf] %vm1949_vm11, %v1876_v23  ;;  %v5101_v56 = vld [vmem:[#allocation52_spill] sm:$0xff] }
 0x1fd   : > { %2287 = vrot.lane.b32.xlu1 %v4055_v44, %s3232_s15  ;;  %2179 = vrot.lane.b32.xlu0 %v5080_v40, %s3231_s14  ;;  %v5088_v44 = vld [vmem:[#allocation18_spill] sm:$0xff] }
 0x1ff   : > { %v2009_v1 = vpop.permute.xlu1 %2008  ;;  %v1908_v5 = vpop.permute.xlu0 %1907 }
 0x200   : > { %2095 = vst.msk [vmem:[#allocation3 + $0x28] sm:$0xf] %vm2084_vm12, %v2009_v1 }
 0x201   : > { %1977 = vst.msk [vmem:[#allocation3 + $0x6c] sm:$0xf] %vm1949_vm11, %v1908_v5  ;;  %2319 = vrot.lane.b32.xlu1 %v4159_v19, %s3232_s15  ;;  %2289 = vrot.lane.b32.xlu0 %v4053_v54, %s3232_s15  ;;  %v5089_v54 = vld [vmem:[#allocation47_spill] sm:$0xff]  ;;  %v5090_v19 = vld [vmem:[#allocation48_spill] sm:$0xff] }
 0x202   : > { %v5102_v5 = vld [vmem:[#allocation19_spill] sm:$0xff] }
 0x203   : > { %v2041_v4 = vpop.permute.xlu1 %2040  ;;  %v2011_v25 = vpop.permute.xlu0 %2010 }
 0x204   : > { %2111 = vst.msk [vmem:[#allocation3 + $0x68] sm:$0xf] %vm2084_vm12, %v2041_v4  ;;  %2096 = vst.msk [vmem:[#allocation3 + $0x2c] sm:$0xf] %vm2084_vm12, %v2011_v25 }
 0x205   : > { %1576 = vrot.lane.b32.xlu1 %v5088_v44, %s3227_s10  ;;  %2321 = vrot.lane.b32.xlu0 %v4157_v31, %s3232_s15  ;;  %v5091_v31 = vld [vmem:[#allocation9_spill] sm:$0xff] }
 0x207   : > { %v2154_v40 = vpop.permute.xlu1 %2153  ;;  %v2043_v7 = vpop.permute.xlu0 %2042 }
 0x208   : > { %2240 = vst.msk [vmem:[#allocation3 + $0x28] sm:$0xf] %vm2229_vm13, %v2154_v40 }
 0x209   : > { %2112 = vst.msk [vmem:[#allocation3 + $0x6c] sm:$0xf] %vm2084_vm12, %v2043_v7  ;;  %1608 = vrot.lane.b32.xlu1 %v5089_v54, %s3227_s10  ;;  %1606 = vrot.lane.b32.xlu0 %v5090_v19, %s3227_s10 }
 0x20b   : > { %v2186_v28 = vpop.permute.xlu1 %2185  ;;  %v2156_v49 = vpop.permute.xlu0 %2155 }
 0x20c   : > { %2256 = vst.msk [vmem:[#allocation3 + $0x68] sm:$0xf] %vm2229_vm13, %v2186_v28  ;;  %2241 = vst.msk [vmem:[#allocation3 + $0x2c] sm:$0xf] %vm2229_vm13, %v2156_v49 }
 0x20d   : > { %1721 = vrot.lane.b32.xlu1 %v5091_v31, %s3228_s11  ;;  %1719 = vrot.lane.b32.xlu0 %v5092_v22, %s3228_s11 }
 0x20f   : > { %v2296_v17 = vpop.permute.xlu1 %2295  ;;  %v2188_v43 = vpop.permute.xlu0 %2187 }
 0x210   : > { %2382 = vst.msk [vmem:[#allocation3 + $0x28] sm:$0xf] %vm2371_vm14, %v2296_v17 }
 0x211   : > { %2257 = vst.msk [vmem:[#allocation3 + $0x6c] sm:$0xf] %vm2229_vm13, %v2188_v43  ;;  %1753 = vrot.lane.b32.xlu1 %v5093_v26, %s3228_s11  ;;  %1751 = vrot.lane.b32.xlu0 %v5094_v8, %s3228_s11 }
 0x213   : > { %v2328_v59 = vpop.permute.xlu1 %2327  ;;  %v2298_v62 = vpop.permute.xlu0 %2297 }
 0x214   : > { %2398 = vst.msk [vmem:[#allocation3 + $0x68] sm:$0xf] %vm2371_vm14, %v2328_v59  ;;  %2383 = vst.msk [vmem:[#allocation3 + $0x2c] sm:$0xf] %vm2371_vm14, %v2298_v62 }
 0x215   : > { %1863 = vrot.lane.b32.xlu1 %v4027_v34, %s3229_s12  ;;  %1861 = vrot.lane.b32.xlu0 %v4029_v36, %s3229_s12 }
 0x217   : > { %v1583_v53 = vpop.permute.xlu1 %1582  ;;  %v2330_v16 = vpop.permute.xlu0 %2329 }
 0x218   : > { %1671 = vst.msk [vmem:[#allocation3 + $0x20] sm:$0xf] %vm1662_vm9, %v1583_v53 }
 0x219   : > { %2399 = vst.msk [vmem:[#allocation3 + $0x6c] sm:$0xf] %vm2371_vm14, %v2330_v16  ;;  %1895 = vrot.lane.b32.xlu1 %v4131_v11, %s3229_s12  ;;  %1893 = vrot.lane.b32.xlu0 %v4133_v12, %s3229_s12 }
 0x21b   : > { %v1615_v6 = vpop.permute.xlu1 %1614  ;;  %v1585_v13 = vpop.permute.xlu0 %1584  ;;  %v3170_v33 = vld [vmem:[#allocation3 + $0x28] sm:$0xff]  }
 0x21c   : > { %1687 = vst.msk [vmem:[#allocation3 + $0x60] sm:$0xf] %vm1662_vm9, %v1615_v6  ;;  %1672 = vst.msk [vmem:[#allocation3 + $0x24] sm:$0xf] %vm1662_vm9, %v1585_v13  ;;  %v5107_v6 = vld [vmem:[#allocation28_spill] sm:$0xff] }
 0x21d   : > { %1998 = vrot.lane.b32.xlu1 %v5082_v35, %s3230_s13  ;;  %1996 = vrot.lane.b32.xlu0 %v5081_v57, %s3230_s13  ;;  %v2577_v57 = vsel %vm2554_vm15, %v3170_v33, 0 }
 0x21f   : > { %v1728_v48 = vpop.permute.xlu1 %1727  ;;  %v1617_v60 = vpop.permute.xlu0 %1616 }
 0x220   : > { %v3169_v42 = vld [vmem:[#allocation3 + $0x68] sm:$0xff]   ;;  %1816 = vst.msk [vmem:[#allocation3 + $0x20] sm:$0xf] %vm1807_vm10, %v1728_v48  ;;  %v5108_v48 = vld [vmem:[#allocation51_spill] sm:$0xff] }
 0x221   : > { %1688 = vst.msk [vmem:[#allocation3 + $0x64] sm:$0xf] %vm1662_vm9, %v1617_v60  ;;  %2030 = vrot.lane.b32.xlu1 %v5084_v37, %s3230_s13  ;;  %2028 = vrot.lane.b32.xlu0 %v3963_v27, %s3230_s13  ;;  %v5109_v60 = vld [vmem:[#allocation50_spill] sm:$0xff] }
 0x222   : > { %3132 = vmatprep.subr.msk.bf16.mxu0 %vm2554_vm15, %v3169_v42  ;;  %3133 = vmatprep.subr.msk.bf16.mxu1 %vm2554_vm15, %v3169_v42 }
 0x223   : > { %v1760_v35 = vpop.permute.xlu1 %1759  ;;  %3097 = vmatpush3.bf16.xpose.msra.mxu0 %v2577_v57  ;;  %3122 = vmatpush3.bf16.xpose.msra.mxu1 %v2577_v57  ;;  %v1730_v45 = vpop.permute.xlu0 %1729 }
 0x224   : > { %1832 = vst.msk [vmem:[#allocation3 + $0x60] sm:$0xf] %vm1807_vm10, %v1760_v35  ;;  %1817 = vst.msk [vmem:[#allocation3 + $0x24] sm:$0xf] %vm1807_vm10, %v1730_v45  ;;  %v5110_v45 = vld [vmem:[#allocation15_spill] sm:$0xff] }
 0x225   : > { %2143 = vrot.lane.b32.xlu1 %v5086_v14, %s3231_s14  ;;  %2141 = vrot.lane.b32.xlu0 %v5083_v20, %s3231_s14 }
 0x227   : > { %v1870_v27 = vpop.permute.xlu1 %1869  ;;  %v1762_v37 = vpop.permute.xlu0 %1761 }
 0x228   : > { %1958 = vst.msk [vmem:[#allocation3 + $0x20] sm:$0xf] %vm1949_vm11, %v1870_v27  ;;  %v5111_v27 = vld [vmem:[#allocation4_spill] sm:$0xff] }
 0x229   : > { %1833 = vst.msk [vmem:[#allocation3 + $0x64] sm:$0xf] %vm1807_vm10, %v1762_v37  ;;  %2175 = vrot.lane.b32.xlu1 %v5087_v46, %s3231_s14  ;;  %2173 = vrot.lane.b32.xlu0 %v5085_v10, %s3231_s14 }
 0x22b   : > { %v1902_v9 = vpop.permute.xlu1 %1901  ;;  %v1872_v58 = vpop.permute.xlu0 %1871 }
 0x22c   : > { %1974 = vst.msk [vmem:[#allocation3 + $0x60] sm:$0xf] %vm1949_vm11, %v1902_v9  ;;  %1959 = vst.msk [vmem:[#allocation3 + $0x24] sm:$0xf] %vm1949_vm11, %v1872_v58 }
 0x22d   : > { %2285 = vrot.lane.b32.xlu1 %v4040_v39, %s3232_s15  ;;  %2283 = vrot.lane.b32.xlu0 %v4042_v55, %s3232_s15  ;;  %v5095_v39 = vld [vmem:[#allocation45_spill] sm:$0xff]  ;;  %v5096_v55 = vld [vmem:[#allocation46_spill] sm:$0xff] }
 0x22f   : > { %v2005_v20 = vpop.permute.xlu1 %2004  ;;  %v1904_v14 = vpop.permute.xlu0 %1903 }
 0x230   : > { %2093 = vst.msk [vmem:[#allocation3 + $0x20] sm:$0xf] %vm2084_vm12, %v2005_v20 }
 0x231   : > { %1975 = vst.msk [vmem:[#allocation3 + $0x64] sm:$0xf] %vm1949_vm11, %v1904_v14  ;;  %2317 = vrot.lane.b32.xlu1 %v4144_v63, %s3232_s15  ;;  %2315 = vrot.lane.b32.xlu0 %v4146_v38, %s3232_s15  ;;  %v5097_v63 = vld [vmem:[#allocation7_spill] sm:$0xff]  ;;  %v5098_v38 = vld [vmem:[#allocation8_spill] sm:$0xff] }
 0x233   : > { %v2037_v10 = vpop.permute.xlu1 %2036  ;;  %v2007_v46 = vpop.permute.xlu0 %2006 }
 0x234   : > { %2109 = vst.msk [vmem:[#allocation3 + $0x60] sm:$0xf] %vm2084_vm12, %v2037_v10  ;;  %2094 = vst.msk [vmem:[#allocation3 + $0x24] sm:$0xf] %vm2084_vm12, %v2007_v46 }
 0x235   : > { %1604 = vrot.lane.b32.xlu1 %v5095_v39, %s3227_s10  ;;  %1602 = vrot.lane.b32.xlu0 %v5096_v55, %s3227_s10 }
 0x237   : > { %v2150_v30 = vpop.permute.xlu1 %2149  ;;  %v2039_v21 = vpop.permute.xlu0 %2038 }
 0x238   : > { %2238 = vst.msk [vmem:[#allocation3 + $0x20] sm:$0xf] %vm2229_vm13, %v2150_v30  ;;  %v4792_v30 = vld [vmem:[%s4912_s2] sm:$0xff]  }
 0x239   : > { %2110 = vst.msk [vmem:[#allocation3 + $0x64] sm:$0xf] %vm2084_vm12, %v2039_v21  ;;  %1717 = vrot.lane.b32.xlu1 %v5097_v63, %s3228_s11  ;;  %1715 = vrot.lane.b32.xlu0 %v5098_v38, %s3228_s11  ;;  %v4797_v21 = vld [vmem:[%s4912_s2 + $0x8] sm:$0xff]  }
 0x23a   : > { %3108 = vmatprep.mubr.msk.bf16.mxu0 %vm2554_vm15, %v4792_v30  ;;  %3110 = vmatprep.mubr.msk.bf16.mxu1 %vm2554_vm15, %v4797_v21 }
 0x23b   : > { %v2182_v2 = vpop.permute.xlu1 %2181  ;;  %v2152_v18 = vpop.permute.xlu0 %2151 }
 0x23c   : > { %2254 = vst.msk [vmem:[#allocation3 + $0x60] sm:$0xf] %vm2229_vm13, %v2182_v2  ;;  %2239 = vst.msk [vmem:[#allocation3 + $0x24] sm:$0xf] %vm2229_vm13, %v2152_v18  ;;  %v2440_v2 = vld [vmem:[%s4913_s3] sm:$0xff]  ;;  %v2441_v18 = vld [vmem:[%s4913_s3 + $0x8] sm:$0xff] }
 0x23d   : > { %1749 = vrot.lane.b32.xlu1 %v5099_v3, %s3228_s11  ;;  %1747 = vrot.lane.b32.xlu0 %v5100_v32, %s3228_s11 }
 0x23f   : > { %v2292_v29 = vpop.permute.xlu1 %2291  ;;  %v2184_v61 = vpop.permute.xlu0 %2183 }
 0x240   : > { %2380 = vst.msk [vmem:[#allocation3 + $0x20] sm:$0xf] %vm2371_vm14, %v2292_v29  ;;  %v2442_v29 = vld [vmem:[%s4913_s3 + $0x10] sm:$0xff] }
 0x241   : > { %2255 = vst.msk [vmem:[#allocation3 + $0x64] sm:$0xf] %vm2229_vm13, %v2184_v61  ;;  %1859 = vrot.lane.b32.xlu1 %v4014_v50, %s3229_s12  ;;  %1857 = vrot.lane.b32.xlu0 %v4016_v51, %s3229_s12  ;;  %v2443_v61 = vld [vmem:[%s4913_s3 + $0x18] sm:$0xff] }
 0x243   : > { %v2324_v15 = vpop.permute.xlu1 %2323  ;;  %v2294_v52 = vpop.permute.xlu0 %2293 }
 0x244   : > { %2396 = vst.msk [vmem:[#allocation3 + $0x60] sm:$0xf] %vm2371_vm14, %v2324_v15  ;;  %2381 = vst.msk [vmem:[#allocation3 + $0x24] sm:$0xf] %vm2371_vm14, %v2294_v52 }
 0x245   : > { %1891 = vrot.lane.b32.xlu1 %v4118_v47, %s3229_s12  ;;  %1889 = vrot.lane.b32.xlu0 %v5101_v56, %s3229_s12 }
 0x247   : > { %v1579_v23 = vpop.permute.xlu1 %1578  ;;  %v2326_v1 = vpop.permute.xlu0 %2325 }
 0x248   : > { %1669 = vst.msk [vmem:[#allocation3 + $0x18] sm:$0xf] %vm1662_vm9, %v1579_v23 }
 0x249   : > { %2397 = vst.msk [vmem:[#allocation3 + $0x64] sm:$0xf] %vm2371_vm14, %v2326_v1  ;;  %1994 = vrot.lane.b32.xlu1 %v5088_v44, %s3230_s13  ;;  %1992 = vrot.lane.b32.xlu0 %v5102_v5, %s3230_s13 }
 0x24b   : > { %v1611_v4 = vpop.permute.xlu1 %1610  ;;  %v1581_v25 = vpop.permute.xlu0 %1580  ;;  %v3172_v40 = vld [vmem:[#allocation3 + $0x20] sm:$0xff]  }
 0x24c   : > { %1685 = vst.msk [vmem:[#allocation3 + $0x58] sm:$0xf] %vm1662_vm9, %v1611_v4  ;;  %1670 = vst.msk [vmem:[#allocation3 + $0x1c] sm:$0xf] %vm1662_vm9, %v1581_v25  ;;  %v2574_v44 = vsel %vm2554_vm15, %v3172_v40, 0 }
 0x24d   : > { %2026 = vrot.lane.b32.xlu1 %v5089_v54, %s3230_s13  ;;  %2024 = vrot.lane.b32.xlu0 %v5090_v19, %s3230_s13 }
 0x24f   : > { %v1724_v7 = vpop.permute.xlu1 %1723  ;;  %v1613_v28 = vpop.permute.xlu0 %1612 }
 0x250   : > { %v3171_v49 = vld [vmem:[#allocation3 + $0x60] sm:$0xff]   ;;  %1814 = vst.msk [vmem:[#allocation3 + $0x18] sm:$0xf] %vm1807_vm10, %v1724_v7 }
 0x251   : > { %1686 = vst.msk [vmem:[#allocation3 + $0x5c] sm:$0xf] %vm1662_vm9, %v1613_v28  ;;  %2139 = vrot.lane.b32.xlu1 %v5091_v31, %s3231_s14  ;;  %2137 = vrot.lane.b32.xlu0 %v5092_v22, %s3231_s14 }
 0x252   : > { %3134 = vmatprep.subr.msk.bf16.mxu0 %vm2554_vm15, %v3171_v49  ;;  %3135 = vmatprep.subr.msk.bf16.mxu1 %vm2554_vm15, %v3171_v49 }
 0x253   : > { %v1756_v54 = vpop.permute.xlu1 %1755  ;;  %3099 = vmatpush3.bf16.xpose.msra.mxu0 %v2574_v44  ;;  %3123 = vmatpush3.bf16.xpose.msra.mxu1 %v2574_v44  ;;  %v1726_v19 = vpop.permute.xlu0 %1725 }
 0x254   : > { %1830 = vst.msk [vmem:[#allocation3 + $0x58] sm:$0xf] %vm1807_vm10, %v1756_v54  ;;  %1815 = vst.msk [vmem:[#allocation3 + $0x1c] sm:$0xf] %vm1807_vm10, %v1726_v19 }
 0x255   : > { %2171 = vrot.lane.b32.xlu1 %v5093_v26, %s3231_s14  ;;  %2169 = vrot.lane.b32.xlu0 %v5094_v8, %s3231_s14 }
 0x257   : > { %v1866_v31 = vpop.permute.xlu1 %1865  ;;  %v1758_v22 = vpop.permute.xlu0 %1757 }
 0x258   : > { %1956 = vst.msk [vmem:[#allocation3 + $0x18] sm:$0xf] %vm1949_vm11, %v1866_v31 }
 0x259   : > { %1831 = vst.msk [vmem:[#allocation3 + $0x5c] sm:$0xf] %vm1807_vm10, %v1758_v22  ;;  %2281 = vrot.lane.b32.xlu1 %v4027_v34, %s3232_s15  ;;  %2279 = vrot.lane.b32.xlu0 %v4029_v36, %s3232_s15  ;;  %v5103_v34 = vld [vmem:[#allocation41_spill] sm:$0xff]  ;;  %v5104_v36 = vld [vmem:[#allocation42_spill] sm:$0xff] }
 0x25b   : > { %v1898_v17 = vpop.permute.xlu1 %1897  ;;  %v1868_v43 = vpop.permute.xlu0 %1867 }
 0x25c   : > { %1972 = vst.msk [vmem:[#allocation3 + $0x58] sm:$0xf] %vm1949_vm11, %v1898_v17  ;;  %1957 = vst.msk [vmem:[#allocation3 + $0x1c] sm:$0xf] %vm1949_vm11, %v1868_v43 }
 0x25d   : > { %2313 = vrot.lane.b32.xlu1 %v4131_v11, %s3232_s15  ;;  %2311 = vrot.lane.b32.xlu0 %v4133_v12, %s3232_s15  ;;  %v5105_v11 = vld [vmem:[#allocation5_spill] sm:$0xff]  ;;  %v5106_v12 = vld [vmem:[#allocation6_spill] sm:$0xff] }
 0x25f   : > { %v2001_v26 = vpop.permute.xlu1 %2000  ;;  %v1900_v8 = vpop.permute.xlu0 %1899 }
 0x260   : > { %2091 = vst.msk [vmem:[#allocation3 + $0x18] sm:$0xf] %vm2084_vm12, %v2001_v26 }
 0x261   : > { %1973 = vst.msk [vmem:[#allocation3 + $0x5c] sm:$0xf] %vm1949_vm11, %v1900_v8  ;;  %1600 = vrot.lane.b32.xlu1 %v5103_v34, %s3227_s10  ;;  %1598 = vrot.lane.b32.xlu0 %v5104_v36, %s3227_s10 }
 0x263   : > { %v2033_v59 = vpop.permute.xlu1 %2032  ;;  %v2003_v62 = vpop.permute.xlu0 %2002 }
 0x264   : > { %2107 = vst.msk [vmem:[#allocation3 + $0x58] sm:$0xf] %vm2084_vm12, %v2033_v59  ;;  %2092 = vst.msk [vmem:[#allocation3 + $0x1c] sm:$0xf] %vm2084_vm12, %v2003_v62 }
 0x265   : > { %1713 = vrot.lane.b32.xlu1 %v5105_v11, %s3228_s11  ;;  %1711 = vrot.lane.b32.xlu0 %v5106_v12, %s3228_s11 }
 0x267   : > { %v2146_v53 = vpop.permute.xlu1 %2145  ;;  %v2035_v16 = vpop.permute.xlu0 %2034 }
 0x268   : > { %2236 = vst.msk [vmem:[#allocation3 + $0x18] sm:$0xf] %vm2229_vm13, %v2146_v53 }
 0x269   : > { %2108 = vst.msk [vmem:[#allocation3 + $0x5c] sm:$0xf] %vm2084_vm12, %v2035_v16  ;;  %1745 = vrot.lane.b32.xlu1 %v5066_v41, %s3228_s11  ;;  %1743 = vrot.lane.b32.xlu0 %v5107_v6, %s3228_s11  ;;  %s304_s11 = scalar_lea.vmem %s4916_s6, %s4893_s30 }
 0x26b   : > { %v2178_v13 = vpop.permute.xlu1 %2177  ;;  %v2148_v33 = vpop.permute.xlu0 %2147 }
 0x26c   : > { %2252 = vst.msk [vmem:[#allocation3 + $0x58] sm:$0xf] %vm2229_vm13, %v2178_v13  ;;  %2237 = vst.msk [vmem:[#allocation3 + $0x1c] sm:$0xf] %vm2229_vm13, %v2148_v33 }
 0x26d   : > { %1855 = vrot.lane.b32.xlu1 %v5108_v48, %s3229_s12  ;;  %1853 = vrot.lane.b32.xlu0 %v5109_v60, %s3229_s12 }
 0x26f   : > { %v2288_v42 = vpop.permute.xlu1 %2287  ;;  %v2180_v57 = vpop.permute.xlu0 %2179 }
 0x270   : > { %2378 = vst.msk [vmem:[#allocation3 + $0x18] sm:$0xf] %vm2371_vm14, %v2288_v42 }
 0x271   : > { %2253 = vst.msk [vmem:[#allocation3 + $0x5c] sm:$0xf] %vm2229_vm13, %v2180_v57  ;;  %1887 = vrot.lane.b32.xlu1 %v4105_v24, %s3229_s12  ;;  %1885 = vrot.lane.b32.xlu0 %v4107_v0, %s3229_s12 }
 0x273   : > { %v2320_v41 = vpop.permute.xlu1 %2319  ;;  %v2290_v35 = vpop.permute.xlu0 %2289 }
 0x274   : > { %2394 = vst.msk [vmem:[#allocation3 + $0x58] sm:$0xf] %vm2371_vm14, %v2320_v41  ;;  %2379 = vst.msk [vmem:[#allocation3 + $0x1c] sm:$0xf] %vm2371_vm14, %v2290_v35 }
 0x275   : > { %1990 = vrot.lane.b32.xlu1 %v5110_v45, %s3230_s13  ;;  %1988 = vrot.lane.b32.xlu0 %v5111_v27, %s3230_s13 }
 0x277   : > { %v1577_v37 = vpop.permute.xlu1 %1576  ;;  %v2322_v9 = vpop.permute.xlu0 %2321 }
 0x278   : > { %1668 = vst.msk [vmem:[#allocation3 + $0x14] sm:$0xf] %vm1662_vm9, %v1577_v37 }
 0x279   : > { %2395 = vst.msk [vmem:[#allocation3 + $0x5c] sm:$0xf] %vm2371_vm14, %v2322_v9  ;;  %2022 = vrot.lane.b32.xlu1 %v5095_v39, %s3230_s13  ;;  %2020 = vrot.lane.b32.xlu0 %v5096_v55, %s3230_s13 }
 0x27b   : > { %v1609_v24 = vpop.permute.xlu1 %1608  ;;  %v1607_v0 = vpop.permute.xlu0 %1606  ;;  %v3174_v58 = vld [vmem:[#allocation3 + $0x18] sm:$0xff]  }
 0x27c   : > { %1684 = vst.msk [vmem:[#allocation3 + $0x54] sm:$0xf] %vm1662_vm9, %v1609_v24  ;;  %1683 = vst.msk [vmem:[#allocation3 + $0x50] sm:$0xf] %vm1662_vm9, %v1607_v0  ;;  %v2571_v46 = vsel %vm2554_vm15, %v3174_v58, 0 }
 0x27d   : > { %2135 = vrot.lane.b32.xlu1 %v5097_v63, %s3231_s14  ;;  %2133 = vrot.lane.b32.xlu0 %v5098_v38, %s3231_s14 }
 0x27f   : > { %v1722_v20 = vpop.permute.xlu1 %1721  ;;  %v1720_v14 = vpop.permute.xlu0 %1719 }
 0x280   : > { %v3173_v10 = vld [vmem:[#allocation3 + $0x58] sm:$0xff]   ;;  %1813 = vst.msk [vmem:[#allocation3 + $0x14] sm:$0xf] %vm1807_vm10, %v1722_v20  ;;  %1812 = vst.msk [vmem:[#allocation3 + $0x10] sm:$0xf] %vm1807_vm10, %v1720_v14 }
 0x281   : > { %2167 = vrot.lane.b32.xlu1 %v5099_v3, %s3231_s14  ;;  %2165 = vrot.lane.b32.xlu0 %v5100_v32, %s3231_s14  ;;  %v3233_v3 = vmov 0   ;;  %s299_s14 = scalar_lea.vmem %s4915_s5, %s4893_s30 }
 0x282   : > { %3136 = vmatprep.subr.msk.bf16.mxu0 %vm2554_vm15, %v3173_v10  ;;  %3137 = vmatprep.subr.msk.bf16.mxu1 %vm2554_vm15, %v3173_v10 }
 0x283   : > { %v1754_v39 = vpop.permute.xlu1 %1753  ;;  %3101 = vmatpush3.bf16.xpose.msra.mxu0 %v2571_v46  ;;  %3124 = vmatpush3.bf16.xpose.msra.mxu1 %v2571_v46  ;;  %v1752_v55 = vpop.permute.xlu0 %1751 }
 0x284   : > { %1829 = vst.msk [vmem:[#allocation3 + $0x54] sm:$0xf] %vm1807_vm10, %v1754_v39  ;;  %1828 = vst.msk [vmem:[#allocation3 + $0x50] sm:$0xf] %vm1807_vm10, %v1752_v55  ;;  %3163 = vset.pattern.permute.xlu0 %v3233_v3  ;;  %3164 = vset.pattern.permute.xlu1 %v3233_v3 }
 0x285   : > { %2277 = vrot.lane.b32.xlu1 %v4014_v50, %s3232_s15  ;;  %2275 = vrot.lane.b32.xlu0 %v4016_v51, %s3232_s15 }
 0x287   : > { %v1864_v63 = vpop.permute.xlu1 %1863  ;;  %v1862_v38 = vpop.permute.xlu0 %1861 }
 0x288   : > { %1955 = vst.msk [vmem:[#allocation3 + $0x14] sm:$0xf] %vm1949_vm11, %v1864_v63  ;;  %1954 = vst.msk [vmem:[#allocation3 + $0x10] sm:$0xf] %vm1949_vm11, %v1862_v38 }
 0x289   : > { %2309 = vrot.lane.b32.xlu1 %v4118_v47, %s3232_s15  ;;  %2307 = vrot.lane.b32.xlu0 %v5101_v56, %s3232_s15 }
 0x28b   : > { %v1896_v50 = vpop.permute.xlu1 %1895  ;;  %v1894_v51 = vpop.permute.xlu0 %1893 }
 0x28c   : > { %1971 = vst.msk [vmem:[#allocation3 + $0x54] sm:$0xf] %vm1949_vm11, %v1896_v50  ;;  %1970 = vst.msk [vmem:[#allocation3 + $0x50] sm:$0xf] %vm1949_vm11, %v1894_v51 }
 0x28d   : > { %2446 = vperm.xlu0 %3163, %v2440_v2   ;;  %2451 = vperm.xlu1 %3164, %v2441_v18  }
 0x28f   : > { %v1999_v47 = vpop.permute.xlu1 %1998  ;;  %v1997_v32 = vpop.permute.xlu0 %1996 }
 0x290   : > { %2090 = vst.msk [vmem:[#allocation3 + $0x14] sm:$0xf] %vm2084_vm12, %v1999_v47  ;;  %2089 = vst.msk [vmem:[#allocation3 + $0x10] sm:$0xf] %vm2084_vm12, %v1997_v32 }
 0x291   : > { %2456 = vperm.xlu1 %3164, %v2442_v29   ;;  %2461 = vperm.xlu0 %3163, %v2443_v61  }
 0x293   : > { %v2031_v15 = vpop.permute.xlu1 %2030  ;;  %v2029_v52 = vpop.permute.xlu0 %2028 }
 0x294   : > { %2106 = vst.msk [vmem:[#allocation3 + $0x54] sm:$0xf] %vm2084_vm12, %v2031_v15  ;;  %2105 = vst.msk [vmem:[#allocation3 + $0x50] sm:$0xf] %vm2084_vm12, %v2029_v52 }
 0x297   : > { %v2144_v56 = vpop.permute.xlu1 %2143  ;;  %v2142_v23 = vpop.permute.xlu0 %2141 }
 0x298   : > { %2235 = vst.msk [vmem:[#allocation3 + $0x14] sm:$0xf] %vm2229_vm13, %v2144_v56  ;;  %2234 = vst.msk [vmem:[#allocation3 + $0x10] sm:$0xf] %vm2229_vm13, %v2142_v23 }
 0x29b   : > { %v2176_v1 = vpop.permute.xlu1 %2175  ;;  %v2174_v5 = vpop.permute.xlu0 %2173 }
 0x29c   : > { %2251 = vst.msk [vmem:[#allocation3 + $0x54] sm:$0xf] %vm2229_vm13, %v2176_v1  ;;  %2250 = vst.msk [vmem:[#allocation3 + $0x50] sm:$0xf] %vm2229_vm13, %v2174_v5 }
 0x29f   : > { %v2286_v4 = vpop.permute.xlu1 %2285  ;;  %v2284_v25 = vpop.permute.xlu0 %2283 }
 0x2a0   : > { %2377 = vst.msk [vmem:[#allocation3 + $0x14] sm:$0xf] %vm2371_vm14, %v2286_v4  ;;  %2376 = vst.msk [vmem:[#allocation3 + $0x10] sm:$0xf] %vm2371_vm14, %v2284_v25 }
 0x2a3   : > { %v2318_v40 = vpop.permute.xlu1 %2317  ;;  %v2316_v7 = vpop.permute.xlu0 %2315 }
 0x2a4   : > { %2393 = vst.msk [vmem:[#allocation3 + $0x54] sm:$0xf] %vm2371_vm14, %v2318_v40  ;;  %2392 = vst.msk [vmem:[#allocation3 + $0x50] sm:$0xf] %vm2371_vm14, %v2316_v7 }
 0x2a7   : > { %v1605_v28 = vpop.permute.xlu1 %1604  ;;  %v1603_v49 = vpop.permute.xlu0 %1602  ;;  %v3176_v44 = vld [vmem:[#allocation3 + $0x10] sm:$0xff]  }
 0x2a8   : > { %1682 = vst.msk [vmem:[#allocation3 + $0x4c] sm:$0xf] %vm1662_vm9, %v1605_v28  ;;  %1681 = vst.msk [vmem:[#allocation3 + $0x48] sm:$0xf] %vm1662_vm9, %v1603_v49  ;;  %v2568_v22 = vsel %vm2554_vm15, %v3176_v44, 0 }
 0x2ab   : > { %v1718_v54 = vpop.permute.xlu1 %1717  ;;  %v1716_v19 = vpop.permute.xlu0 %1715  ;;  %v3175_v31 = vld [vmem:[#allocation3 + $0x50] sm:$0xff]  }
 0x2ac   : > { %1811 = vst.msk [vmem:[#allocation3 + $0xc] sm:$0xf] %vm1807_vm10, %v1718_v54  ;;  %1810 = vst.msk [vmem:[#allocation3 + $0x8] sm:$0xf] %vm1807_vm10, %v1716_v19  ;;  %3138 = vmatprep.subr.msk.bf16.mxu0 %vm2554_vm15, %v3175_v31  ;;  %3139 = vmatprep.subr.msk.bf16.mxu1 %vm2554_vm15, %v3175_v31 }
 0x2ad   : > { %3103 = vmatpush3.bf16.xpose.msra.mxu0 %v2568_v22  ;;  %3125 = vmatpush3.bf16.xpose.msra.mxu1 %v2568_v22 }
 0x2af   : > { %v1750_v17 = vpop.permute.xlu1 %1749  ;;  %v1748_v43 = vpop.permute.xlu0 %1747 }
 0x2b0   : > { %1827 = vst.msk [vmem:[#allocation3 + $0x4c] sm:$0xf] %vm1807_vm10, %v1750_v17  ;;  %1826 = vst.msk [vmem:[#allocation3 + $0x48] sm:$0xf] %vm1807_vm10, %v1748_v43 }
 0x2b3   : > { %v1860_v26 = vpop.permute.xlu1 %1859  ;;  %v1858_v8 = vpop.permute.xlu0 %1857 }
 0x2b4   : > { %1953 = vst.msk [vmem:[#allocation3 + $0xc] sm:$0xf] %vm1949_vm11, %v1860_v26  ;;  %1952 = vst.msk [vmem:[#allocation3 + $0x8] sm:$0xf] %vm1949_vm11, %v1858_v8 }
 0x2b7   : > { %v1892_v34 = vpop.permute.xlu1 %1891  ;;  %v1890_v36 = vpop.permute.xlu0 %1889 }
 0x2b8   : > { %1969 = vst.msk [vmem:[#allocation3 + $0x4c] sm:$0xf] %vm1949_vm11, %v1892_v34  ;;  %1968 = vst.msk [vmem:[#allocation3 + $0x48] sm:$0xf] %vm1949_vm11, %v1890_v36 }
 0x2bb   : > { %v1995_v59 = vpop.permute.xlu1 %1994  ;;  %v1993_v62 = vpop.permute.xlu0 %1992 }
 0x2bc   : > { %2088 = vst.msk [vmem:[#allocation3 + $0xc] sm:$0xf] %vm2084_vm12, %v1995_v59  ;;  %2087 = vst.msk [vmem:[#allocation3 + $0x8] sm:$0xf] %vm2084_vm12, %v1993_v62 }
 0x2bf   : > { %v2027_v11 = vpop.permute.xlu1 %2026  ;;  %v2025_v12 = vpop.permute.xlu0 %2024 }
 0x2c0   : > { %2104 = vst.msk [vmem:[#allocation3 + $0x4c] sm:$0xf] %vm2084_vm12, %v2027_v11  ;;  %2103 = vst.msk [vmem:[#allocation3 + $0x48] sm:$0xf] %vm2084_vm12, %v2025_v12 }
 0x2c3   : > { %v2140_v53 = vpop.permute.xlu1 %2139  ;;  %v2138_v16 = vpop.permute.xlu0 %2137 }
 0x2c4   : > { %2233 = vst.msk [vmem:[#allocation3 + $0xc] sm:$0xf] %vm2229_vm13, %v2140_v53  ;;  %2232 = vst.msk [vmem:[#allocation3 + $0x8] sm:$0xf] %vm2229_vm13, %v2138_v16 }
 0x2c7   : > { %v2172_v6 = vpop.permute.xlu1 %2171  ;;  %v2170_v13 = vpop.permute.xlu0 %2169 }
 0x2c8   : > { %2249 = vst.msk [vmem:[#allocation3 + $0x4c] sm:$0xf] %vm2229_vm13, %v2172_v6  ;;  %2248 = vst.msk [vmem:[#allocation3 + $0x48] sm:$0xf] %vm2229_vm13, %v2170_v13 }
 0x2cb   : > { %v2282_v33 = vpop.permute.xlu1 %2281  ;;  %v2280_v48 = vpop.permute.xlu0 %2279 }
 0x2cc   : > { %2375 = vst.msk [vmem:[#allocation3 + $0xc] sm:$0xf] %vm2371_vm14, %v2282_v33  ;;  %2374 = vst.msk [vmem:[#allocation3 + $0x8] sm:$0xf] %vm2371_vm14, %v2280_v48 }
 0x2cf   : > { %v2314_v60 = vpop.permute.xlu1 %2313  ;;  %v2312_v42 = vpop.permute.xlu0 %2311 }
 0x2d0   : > { %2391 = vst.msk [vmem:[#allocation3 + $0x4c] sm:$0xf] %vm2371_vm14, %v2314_v60  ;;  %2390 = vst.msk [vmem:[#allocation3 + $0x48] sm:$0xf] %vm2371_vm14, %v2312_v42 }
 0x2d3   : > { %v1601_v57 = vpop.permute.xlu1 %1600  ;;  %v1599_v41 = vpop.permute.xlu0 %1598  ;;  %v3178_v35 = vld [vmem:[#allocation3 + $0x8] sm:$0xff]  }
 0x2d4   : > { %1680 = vst.msk [vmem:[#allocation3 + $0x44] sm:$0xf] %vm1662_vm9, %v1601_v57  ;;  %1679 = vst.msk [vmem:[#allocation3 + $0x40] sm:$0xf] %vm1662_vm9, %v1599_v41  ;;  %v2565_v9 = vsel %vm2554_vm15, %v3178_v35, 0  ;;  %v2700_v35 = vld [vmem:[%s294_s9] sm:$0xff] }
 0x2d7   : > { %v1714_v45 = vpop.permute.xlu1 %1713  ;;  %v1712_v27 = vpop.permute.xlu0 %1711  ;;  %v3177_v37 = vld [vmem:[#allocation3 + $0x48] sm:$0xff]  }
 0x2d8   : > { %1809 = vst.msk [vmem:[#allocation3 + $0x4] sm:$0xf] %vm1807_vm10, %v1714_v45  ;;  %1808 = vst.msk [vmem:[#allocation3] sm:$0xf] %vm1807_vm10, %v1712_v27  ;;  %3140 = vmatprep.subr.msk.bf16.mxu0 %vm2554_vm15, %v3177_v37  ;;  %3141 = vmatprep.subr.msk.bf16.mxu1 %vm2554_vm15, %v3177_v37 }
 0x2d9   : > { %3105 = vmatpush3.bf16.xpose.msra.mxu0 %v2565_v9  ;;  %3126 = vmatpush3.bf16.xpose.msra.mxu1 %v2565_v9  ;;  %v2701_v9 = vld [vmem:[%s294_s9 + $0x8] sm:$0xff] }
 0x2db   : > { %v1746_v24 = vpop.permute.xlu1 %1745  ;;  %v1744_v0 = vpop.permute.xlu0 %1743 }
 0x2dc   : > { %1825 = vst.msk [vmem:[#allocation3 + $0x44] sm:$0xf] %vm1807_vm10, %v1746_v24  ;;  %1824 = vst.msk [vmem:[#allocation3 + $0x40] sm:$0xf] %vm1807_vm10, %v1744_v0 }
 0x2df   : > { %v1856_v58 = vpop.permute.xlu1 %1855  ;;  %v1854_v20 = vpop.permute.xlu0 %1853 }
 0x2e0   : > { %1951 = vst.msk [vmem:[#allocation3 + $0x4] sm:$0xf] %vm1949_vm11, %v1856_v58  ;;  %1950 = vst.msk [vmem:[#allocation3] sm:$0xf] %vm1949_vm11, %v1854_v20 }
 0x2e3   : > { %v1888_v14 = vpop.permute.xlu1 %1887  ;;  %v1886_v10 = vpop.permute.xlu0 %1885 }
 0x2e4   : > { %1967 = vst.msk [vmem:[#allocation3 + $0x44] sm:$0xf] %vm1949_vm11, %v1888_v14  ;;  %1966 = vst.msk [vmem:[#allocation3 + $0x40] sm:$0xf] %vm1949_vm11, %v1886_v10 }
 0x2e7   : > { %v1991_v46 = vpop.permute.xlu1 %1990  ;;  %v1989_v39 = vpop.permute.xlu0 %1988 }
 0x2e8   : > { %2086 = vst.msk [vmem:[#allocation3 + $0x4] sm:$0xf] %vm2084_vm12, %v1991_v46  ;;  %2085 = vst.msk [vmem:[#allocation3] sm:$0xf] %vm2084_vm12, %v1989_v39 }
 0x2eb   : > { %v2023_v55 = vpop.permute.xlu1 %2022  ;;  %v2021_v63 = vpop.permute.xlu0 %2020 }
 0x2ec   : > { %2102 = vst.msk [vmem:[#allocation3 + $0x44] sm:$0xf] %vm2084_vm12, %v2023_v55  ;;  %2101 = vst.msk [vmem:[#allocation3 + $0x40] sm:$0xf] %vm2084_vm12, %v2021_v63 }
 0x2ef   : > { %v2136_v38 = vpop.permute.xlu1 %2135  ;;  %v2134_v50 = vpop.permute.xlu0 %2133 }
 0x2f0   : > { %2231 = vst.msk [vmem:[#allocation3 + $0x4] sm:$0xf] %vm2229_vm13, %v2136_v38  ;;  %2230 = vst.msk [vmem:[#allocation3] sm:$0xf] %vm2229_vm13, %v2134_v50 }
 0x2f3   : > { %v2168_v51 = vpop.permute.xlu1 %2167  ;;  %v2166_v2 = vpop.permute.xlu0 %2165 }
 0x2f4   : > { %2247 = vst.msk [vmem:[#allocation3 + $0x44] sm:$0xf] %vm2229_vm13, %v2168_v51  ;;  %2246 = vst.msk [vmem:[#allocation3 + $0x40] sm:$0xf] %vm2229_vm13, %v2166_v2 }
 0x2f7   : > { %v2278_v18 = vpop.permute.xlu1 %2277  ;;  %v2276_v3 = vpop.permute.xlu0 %2275 }
 0x2f8   : > { %2373 = vst.msk [vmem:[#allocation3 + $0x4] sm:$0xf] %vm2371_vm14, %v2278_v18  ;;  %2372 = vst.msk [vmem:[#allocation3] sm:$0xf] %vm2371_vm14, %v2276_v3 }
 0x2fb   : > { %v2310_v47 = vpop.permute.xlu1 %2309  ;;  %v2308_v32 = vpop.permute.xlu0 %2307 }
 0x2fc   : > { %2389 = vst.msk [vmem:[#allocation3 + $0x44] sm:$0xf] %vm2371_vm14, %v2310_v47  ;;  %2388 = vst.msk [vmem:[#allocation3 + $0x40] sm:$0xf] %vm2371_vm14, %v2308_v32 }
 0x2ff   : > { %v3180_v29 = vld [vmem:[#allocation3] sm:$0xff]  }
 0x300   : > { %v2562_v15 = vsel %vm2554_vm15, %v3180_v29, 0 }
 0x303   : > { %v3179_v61 = vld [vmem:[#allocation3 + $0x40] sm:$0xff]  }
 0x304   : > { %3142 = vmatprep.subr.msk.bf16.mxu0 %vm2554_vm15, %v3179_v61  ;;  %3143 = vmatprep.subr.msk.bf16.mxu1 %vm2554_vm15, %v3179_v61 }
 0x305   : > { %3107 = vmatpush3.bf16.xpose.msra.mxu0 %v2562_v15  ;;  %3127 = vmatpush3.bf16.xpose.msra.mxu1 %v2562_v15 }
 0x308   : > { %v2447_v52 = vpop.permute.xlu0 %2446  ;;  %v2452_v4 = vpop.permute.xlu1 %2451 }
 0x30c   : > { %3109 = vmatmul.mubr.msk.bf16.vlgmr.msra.gmra.mxu0 %vm2554_vm15, %v4792_v30  ;;  %3111 = vmatmul.mubr.msk.bf16.vlgmr.msra.gmra.mxu1 %vm2554_vm15, %v4797_v21  ;;  %v2457_v30 = vpop.permute.xlu1 %2456  ;;  %v2462_v26 = vpop.permute.xlu0 %2461 }
 0x3cc   : > { %v2643_v56 = vpop.f32.mrf.mxu0  ;;  %v2653_v44 = vpop.f32.mrf.mxu1 }
 0x3cd   : > { %v2644_v23 = vadd.f32 %v2643_v56, %v2447_v52  ;;  %v2654_v22 = vadd.f32 %v2653_v44, %v2457_v30 }
 0x3ce   : > { %v2645_v1 = vpop.f32.mrf.mxu0  ;;  %v2655_v21 = vpop.f32.mrf.mxu1 }
 0x3cf   : > { %v2971_v5 = vmul.f32 -1.442695, %v2644_v23  ;;  %v2646_v25 = vadd.f32 %v2645_v1, %v2447_v52  ;;  %v2656_v17 = vadd.f32 %v2655_v21, %v2457_v30  ;;  %v2975_v8 = vmul.f32 -1.442695, %v2654_v22 }
 0x3d0   : > { %v2647_v40 = vpop.f32.mrf.mxu0  ;;  %v2657_v43 = vpop.f32.mrf.mxu1 }
 0x3d1   : > { %3183 = vpow2.f32 %v2971_v5  ;;  %v2972_v7 = vmul.f32 -1.442695, %v2646_v25  ;;  %v2648_v28 = vadd.f32 %v2647_v40, %v2452_v4  ;;  %v2976_v34 = vmul.f32 -1.442695, %v2656_v17 }
 0x3d2   : > { %v2649_v49 = vpop.f32.mrf.mxu0  ;;  %v2658_v59 = vadd.f32 %v2657_v43, %v2462_v26  ;;  %v2659_v11 = vpop.f32.mrf.mxu1 }
 0x3d3   : > { %3185 = vpow2.f32 %v2972_v7  ;;  %v2973_v54 = vmul.f32 -1.442695, %v2648_v28  ;;  %v2650_v19 = vadd.f32 %v2649_v49, %v2452_v4  ;;  %v2660_v6 = vadd.f32 %v2659_v11, %v2462_v26 }
 0x3d5   : > { %3187 = vpow2.f32 %v2973_v54  ;;  %v2974_v31 = vmul.f32 -1.442695, %v2650_v19 }
 0x3d7   : > { %3189 = vpow2.f32 %v2974_v31 }
 0x3d8   : > { %3191 = vpow2.f32 %v2975_v8 }
 0x3d9   : > { %3193 = vpow2.f32 %v2976_v34 }
 0x3da   : > { %3195 = vtanh.f32 %v2658_v59 }
 0x3de   : > { %v3184_v36 = vpop.eup %3183 }
 0x3df   : > { %v2668_v62 = vadd.f32 1.0, %v3184_v36 }
 0x3e0   : > { %v3186_v12 = vpop.eup %3185 }
 0x3e1   : > { %v2669_v53 = vadd.f32 1.0, %v3186_v12  ;;  %3197 = vrcp.f32 %v2668_v62 }
 0x3e2   : > { %v3188_v16 = vpop.eup %3187 }
 0x3e3   : > { %v2680_v13 = vadd.f32 1.0, %v3188_v16  ;;  %3199 = vrcp.f32 %v2669_v53 }
 0x3e4   : > { %v3190_v33 = vpop.eup %3189 }
 0x3e5   : > { %3201 = vrcp.f32 %v2680_v13  ;;  %v2681_v48 = vadd.f32 1.0, %v3190_v33  ;;  %v3192_v60 = vpop.eup %3191 }
 0x3e6   : > { %3203 = vtanh.f32 %v2660_v6  ;;  %v3194_v42 = vpop.eup %3193  ;;  %v2692_v37 = vadd.f32 1.0, %v3192_v60 }
 0x3e7   : > { %3205 = vrcp.f32 %v2681_v48  ;;  %v3196_v57 = vpop.eup %3195  ;;  %v2693_v14 = vadd.f32 1.0, %v3194_v42 }
 0x3e8   : > { %3207 = vrcp.f32 %v2692_v37 }
 0x3ee   : > { %v3198_v41 = vpop.eup %3197 }
 0x3ef   : > { %v2704_v58 = vmul.f32 %v3198_v41, %v3196_v57 }
 0x3f0   : > { %v3200_v45 = vpop.eup %3199 }
 0x3f2   : > { %v3202_v27 = vpop.eup %3201 }
 0x3f3   : > { %v3204_v24 = vpop.eup %3203  ;;  %v2702_v0 = vmul.f32 %v3202_v27, %v2700_v35 }
 0x3f4   : > { %v3206_v20 = vpop.eup %3205  ;;  %v2705_v39 = vmul.f32 %v3204_v24, %v3200_v45 }
 0x3f5   : > { %v2706_v10 = vadd.f32 %v2704_v58, %v2702_v0  ;;  %v2703_v46 = vmul.f32 %v3206_v20, %v2701_v9  ;;  %v3208_v63 = vpop.eup %3207 }
 0x3f7   : > { %3209 = vtanh.f32 %v2706_v10  ;;  %2714 = vst [vmem:[%s304_s11] sm:$0xff] %v2706_v10  ;;  %v2707_v55 = vadd.f32 %v2705_v39, %v2703_v46 }
 0x3f8   : > { %3211 = vrcp.f32 %v2693_v14 }
 0x3f9   : > { %3213 = vtanh.f32 %v2707_v55  ;;  %2715 = vst [vmem:[%s304_s11 + $0x8] sm:$0xff] %v2707_v55 }
 0x404   : > { %v3210_v38 = vpop.eup %3209 }
 0x405   : > { %v3212_v50 = vpop.eup %3211  ;;  %v2710_v51 = vmul.f32 %v3210_v38, %v3208_v63 }
 0x406   : > { %v3214_v2 = vpop.eup %3213 }
 0x407   : > { %2712 = vst [vmem:[%s299_s14] sm:$0xff] %v2710_v51  ;;  %v2711_v18 = vmul.f32 %v3214_v2, %v3212_v50 }
 0x409   : > { %2713 = vst [vmem:[%s299_s14 + $0x8] sm:$0xff] %v2711_v18 }
 0x40a PF: > { %s17_s21 = sadd.s32 1, %s3221_s21  }
 0x40b   : > { %p14_p4 = scmp.ge.s32.totalorder %s17_s21, 4  }
 0x40d   :  { %16 = sbr.rel (!%p14_p4) target bundleno = 1 (0x1), region = 89 }

</bundles_post_ra>
